<compile_context>
chip_gen: v5e
topology: v5e:2x2
jax: 0.10.0
libtpu: 0.0.40
codegen_flags: <defaults>
</compile_context>

<pallas_src>
import functools

import jax
import jax.numpy as jnp
from jax.experimental import pallas as pl
from jax.experimental.pallas import tpu as pltpu

BN_EPS = 1e-5
TM_MM = 256           # row tile for matmul-style kernels
TM_EW = 1024          # row tile for lane-dense elementwise kernels
VMEM_SPEC = pl.BlockSpec(memory_space=pltpu.MemorySpace.VMEM)


def _round_up(x, m):
    return (x + m - 1) // m * m


def _pad_rows(m, tile):
    """Padded row count mp and tile tm with tm | mp and tm % 8 == 0."""
    mp = _round_up(m, 8)
    if mp > tile:
        mp = _round_up(m, tile)
    return mp, min(tile, mp)


# ----------------------------- Pallas kernels --------------------------------

def _matmul_epi_kernel(x_ref, w_ref, b_ref, o_ref, *, relu):
    """Conv-as-matmul with folded-BN bias and optional ReLU fused in."""
    y = jnp.dot(x_ref[...], w_ref[...], preferred_element_type=jnp.float32)
    y = y + b_ref[...]
    if relu:
        y = jnp.maximum(y, 0.0)
    o_ref[...] = y.astype(o_ref.dtype)


def _matmul_add_relu_kernel(x_ref, w_ref, b_ref, r_ref, o_ref):
    """Bottleneck conv3: matmul + folded-BN bias + residual add + ReLU."""
    y = jnp.dot(x_ref[...], w_ref[...], preferred_element_type=jnp.float32)
    y = y + b_ref[...] + r_ref[...].astype(jnp.float32)
    o_ref[...] = jnp.maximum(y, 0.0).astype(o_ref.dtype)


def _conv3x3_kernel(x_ref, w_ref, b_ref, o_ref, *, wp, relu):
    """Implicit-GEMM 3x3 stride-1 conv on one image.

    x_ref  : (1, Ltot, C) guarded flattened padded image (bf16)
    w_ref  : (9, C, Cout) tap-major folded weights (bf16, block-diag for groups)
    o_ref  : (1, Lr, Cout) outputs on the padded grid (border rows are garbage
             and get cropped by the caller).
    Tap (di, dj) of output flat position p reads input flat row p + di*wp + dj
    thanks to the guard band of wp+1 zero rows at the start.
    """
    lr, cout = o_ref.shape[1], o_ref.shape[2]
    acc = jnp.zeros((lr, cout), jnp.float32)
    for di in range(3):
        for dj in range(3):
            win = x_ref[0, pl.ds(di * wp + dj, lr), :]
            acc = acc + jnp.dot(win, w_ref[di * 3 + dj],
                                preferred_element_type=jnp.float32)
    y = acc + b_ref[...]
    if relu:
        y = jnp.maximum(y, 0.0)
    o_ref[0] = y.astype(o_ref.dtype)


def _max3_kernel(a_ref, b_ref, c_ref, o_ref):
    o_ref[...] = jnp.maximum(jnp.maximum(a_ref[...], b_ref[...]), c_ref[...])


def _pool_fc_kernel(x_ref, w_ref, b_ref, o_ref):
    pooled = jnp.mean(x_ref[...].astype(jnp.float32), axis=1)   # global avg pool
    o_ref[...] = jnp.dot(pooled, w_ref[...],
                         preferred_element_type=jnp.float32) + b_ref[...]


# ----------------------------- pallas_call wrappers ---------------------------

def matmul_fused(x2d, w, b, relu, residual=None):
    """(M, K) bf16 @ (K, Cout) bf16 + bias [+ residual] [+ ReLU] -> (M, Cout) bf16."""
    m, k = x2d.shape
    cout = w.shape[1]
    mp, tm = _pad_rows(m, TM_MM)
    if mp != m:
        x2d = jnp.pad(x2d, ((0, mp - m), (0, 0)))
    args = [x2d, w, b]
    in_specs = [pl.BlockSpec((tm, k), lambda i: (i, 0)),
                pl.BlockSpec((k, cout), lambda i: (0, 0)),
                pl.BlockSpec((1, cout), lambda i: (0, 0))]
    if residual is None:
        kern = functools.partial(_matmul_epi_kernel, relu=relu)
    else:
        r = residual
        if r.shape[0] != mp:
            r = jnp.pad(r, ((0, mp - r.shape[0]), (0, 0)))
        args.append(r)
        in_specs.append(pl.BlockSpec((tm, cout), lambda i: (i, 0)))
        kern = _matmul_add_relu_kernel
    out = pl.pallas_call(
        kern,
        out_shape=jax.ShapeDtypeStruct((mp, cout), jnp.bfloat16),
        grid=(mp // tm,),
        in_specs=in_specs,
        out_specs=pl.BlockSpec((tm, cout), lambda i: (i, 0)),
        compiler_params=pltpu.CompilerParams(dimension_semantics=("parallel",)),
    )(*args)
    return out[:m] if mp != m else out


def conv3x3_s1(x, p, relu):
    """Implicit-GEMM 3x3 stride-1 conv (+folded BN bias, +ReLU). NHWC bf16 in/out."""
    n, h, w, c = x.shape
    cout = p["b"].shape[1]
    hp, wp = h + 2, w + 2
    L = hp * wp
    lr = _round_up(L, 8)
    guard = wp + 1
    ltot = _round_up(lr + 2 * wp + 2, 8)
    xp = jnp.pad(x, ((0, 0), (1, 1), (1, 1), (0, 0)))
    xg = jnp.pad(xp.reshape(n, L, c), ((0, 0), (guard, ltot - L - guard), (0, 0)))
    out = pl.pallas_call(
        functools.partial(_conv3x3_kernel, wp=wp, relu=relu),
        out_shape=jax.ShapeDtypeStruct((n, lr, cout), jnp.bfloat16),
        grid=(n,),
        in_specs=[pl.BlockSpec((1, ltot, c), lambda i: (i, 0, 0)),
                  pl.BlockSpec((9, c, cout), lambda i: (0, 0, 0)),
                  pl.BlockSpec((1, cout), lambda i: (0, 0))],
        out_specs=pl.BlockSpec((1, lr, cout), lambda i: (i, 0, 0)),
        compiler_params=pltpu.CompilerParams(dimension_semantics=("parallel",)),
    )(xg, p["w"], p["b"])
    y = out[:, :L, :].reshape(n, hp, wp, cout)
    return y[:, 1:hp - 1, 1:wp - 1, :]


def _max3(a, b, c):
    """Elementwise max of three same-shaped arrays, lane-dense tiled."""
    shape = a.shape
    total = a.size
    if total % 128 == 0:
        rows, cols = total // 128, 128
    else:
        cols = shape[-1]
        rows = total // cols
    af, bf, cf = (v.reshape(rows, cols) for v in (a, b, c))
    rp, tm = _pad_rows(rows, TM_EW)
    if rp != rows:
        af, bf, cf = (jnp.pad(v, ((0, rp - rows), (0, 0))) for v in (af, bf, cf))
    out = pl.pallas_call(
        _max3_kernel,
        out_shape=jax.ShapeDtypeStruct((rp, cols), a.dtype),
        grid=(rp // tm,),
        in_specs=[pl.BlockSpec((tm, cols), lambda i: (i, 0)) for _ in range(3)],
        out_specs=pl.BlockSpec((tm, cols), lambda i: (i, 0)),
        compiler_params=pltpu.CompilerParams(dimension_semantics=("parallel",)),
    )(af, bf, cf)
    if rp != rows:
        out = out[:rows]
    return out.reshape(shape)


# ----------------------------- layer glue --------------------------------------

def extract_patches(x, k, stride, pad):
    """Materialized im2col fallback (embedder 7x7 and strided 3x3 only)."""
    n, h, w, c = x.shape
    oh = (h + 2 * pad - k) // stride + 1
    ow = (w + 2 * pad - k) // stride + 1
    xp = jnp.pad(x, ((0, 0), (pad, pad), (pad, pad), (0, 0)))
    cols = [xp[:, i:i + stride * oh:stride, j:j + stride * ow:stride, :]
            for i in range(k) for j in range(k)]
    patches = jnp.concatenate(cols, axis=-1)
    return patches.reshape(n * oh * ow, k * k * c), n, oh, ow


def conv_bn_act(x, p, stride, relu):
    """ResNextConvLayer / ResNextResidual with eval-mode BN folded in."""
    n, h, w, cin = x.shape
    k = p["k"]
    cout = p["b"].shape[1]
    if k == 1:
        xs = x[:, ::stride, ::stride, :] if stride > 1 else x
        ns, hs, ws, _ = xs.shape
        y = matmul_fused(xs.reshape(ns * hs * ws, cin),
                         p["w"].reshape(cin, cout), p["b"], relu)
        return y.reshape(ns, hs, ws, cout)
    if k == 3 and stride == 1:
        return conv3x3_s1(x, p, relu)
    # TODO(synk): strided 3x3 and the 7x7 embedder still use a materialized
    # im2col; an implicit GEMM with even/odd phase splitting would remove it.
    patches, n2, oh, ow = extract_patches(x, k, stride, k // 2)
    y = matmul_fused(patches, p["w"].reshape(k * k * cin, cout), p["b"], relu)
    return y.reshape(n2, oh, ow, cout)


def bottleneck_layer(x, p):
    stride = p["stride"]
    h1 = conv_bn_act(x, p["conv1"], 1, relu=True)
    h2 = conv_bn_act(h1, p["conv2"], stride, relu=True)
    if p["residual"] is not None:
        r = conv_bn_act(x, p["residual"], stride, relu=False)
    else:
        r = x
    n, oh, ow, cmid = h2.shape
    cout = p["conv3"]["b"].shape[1]
    m = n * oh * ow
    # conv3 (1x1, no activation) + residual add + final ReLU fused in one kernel.
    y = matmul_fused(h2.reshape(m, cmid), p["conv3"]["w"].reshape(cmid, cout),
                     p["conv3"]["b"], relu=True, residual=r.reshape(m, cout))
    return y.reshape(n, oh, ow, cout)


def maxpool_3x3_s2(x):
    """nn.MaxPool2d(kernel_size=3, stride=2, padding=1) as a separable max."""
    n, h, w, c = x.shape
    oh, ow = (h - 1) // 2 + 1, (w - 1) // 2 + 1
    xp = jnp.pad(x, ((0, 0), (1, 1), (1, 1), (0, 0)), constant_values=-jnp.inf)
    t = _max3(*[xp[:, :, j:j + 2 * ow:2, :] for j in range(3)])    # 1x3, stride 2
    return _max3(*[t[:, i:i + 2 * oh:2, :, :] for i in range(3)])  # 3x1, stride 2


# ----------------------------- parameter construction -------------------------

def init_conv_bn(key, cin, cout, k, groups=1, zero_gamma=False):
    """Conv2d (bias=False, kaiming_normal_ fan_out) + BatchNorm2d folded in
    eval mode (fresh running stats mean=0, var=1).  Weight stored tap-major as
    (k*k, Cin, Cout) bf16, block-diagonal over groups so grouped convolution is
    a single lane-dense matmul per tap."""
    cin_g, cout_g = cin // groups, cout // groups
    fan_out = cout * k * k
    std = (2.0 / fan_out) ** 0.5
    wg = jax.random.normal(key, (groups, k * k, cin_g, cout_g), jnp.float32) * std
    w = jnp.zeros((k * k, cin, cout), jnp.float32)
    for g in range(groups):
        w = w.at[:, g * cin_g:(g + 1) * cin_g,
                 g * cout_g:(g + 1) * cout_g].set(wg[g])
    gamma = (jnp.zeros if zero_gamma else jnp.ones)((cout,), jnp.float32)
    beta = jnp.zeros((cout,), jnp.float32)
    running_mean = jnp.zeros((cout,), jnp.float32)
    running_var = jnp.ones((cout,), jnp.float32)
    scale = gamma * jax.lax.rsqrt(running_var + BN_EPS)
    shift = beta - running_mean * scale
    w = w * scale[None, None, :]
    return dict(w=w.astype(jnp.bfloat16), b=shift.reshape(1, cout), k=k)


def init_bottleneck(keyiter, in_ch, out_ch, stride, bw, card, red):
    bottleneck_channels = int(out_ch // red * (bw / 64)) * card
    p = dict(stride=stride)
    p["conv1"] = init_conv_bn(next(keyiter), in_ch, bottleneck_channels, 1)
    # TODO(synk): at large cardinality (e.g. 32) the dense block-diagonal weight
    # wastes MXU flops; a per-group grid axis would be preferable there.
    p["conv2"] = init_conv_bn(next(keyiter), bottleneck_channels,
                              bottleneck_channels, 3, groups=card)
    # last BN of each bottleneck is zero-initialized (as in ResNextModel.__init__)
    p["conv3"] = init_conv_bn(next(keyiter), bottleneck_channels, out_ch, 1,
                              zero_gamma=True)
    if in_ch != out_ch or stride != 1:
        p["residual"] = init_conv_bn(next(keyiter), in_ch, out_ch, 1)
    else:
        p["residual"] = None
    return p


def init_model(key, cfg):
    keys = iter(jax.random.split(key, 256))
    params = dict(cfg=cfg)
    params["embedder"] = init_conv_bn(next(keys), cfg["num_channels"],
                                      cfg["embedding_size"],
                                      cfg["embedding_kernel_size"])

    hidden, depths = cfg["hidden_sizes"], cfg["depths"]

    def build_stage(in_ch, out_ch, depth, stride):
        blocks = [init_bottleneck(keys, in_ch, out_ch, stride,
                                  cfg["bottleneck_width"], cfg["cardinality"],
                                  cfg["reduction"])]
        for _ in range(depth - 1):
            blocks.append(init_bottleneck(keys, out_ch, out_ch, 1,
                                          cfg["bottleneck_width"],
                                          cfg["cardinality"], cfg["reduction"]))
        return blocks

    stages = [dict(blocks=build_stage(cfg["embedding_size"], hidden[0],
                                      depths[0],
                                      2 if cfg["downsample_in_first_stage"] else 1),
                   post=None)]
    for (ic, oc), depth in zip(zip(hidden, hidden[1:]), depths[1:]):
        blocks = build_stage(ic, oc, depth,
                             1 if cfg["downsample_after_stage"] else 2)
        post = (init_conv_bn(next(keys), oc, oc, 3)
                if cfg["downsample_after_stage"] else None)
        stages.append(dict(blocks=blocks, post=post))
    params["stages"] = stages

    # classifier head (nn.Linear default init)
    bound = 1.0 / (hidden[-1] ** 0.5)
    k1, k2 = jax.random.split(next(keys))
    params["fc_w"] = jax.random.uniform(k1, (hidden[-1], cfg["num_labels"]),
                                        jnp.float32, -bound, bound)
    params["fc_b"] = jax.random.uniform(k2, (1, cfg["num_labels"]),
                                        jnp.float32, -bound, bound)
    return params


# ----------------------------- forward -----------------------------------------

def resnext_forward(params, pixel_values_nchw):
    cfg = params["cfg"]
    x = jnp.transpose(pixel_values_nchw, (0, 2, 3, 1)).astype(jnp.bfloat16)  # NHWC

    # embeddings
    x = conv_bn_act(x, params["embedder"], cfg["embedding_stride"], relu=True)
    if cfg["embedding_pooling_with_downsample"]:
        x = maxpool_3x3_s2(x)

    # encoder
    for stage in params["stages"]:
        for block in stage["blocks"]:
            x = bottleneck_layer(x, block)
        if stage["post"] is not None:
            x = conv_bn_act(x, stage["post"], 2, relu=True)

    # fused adaptive avg pool (1,1) + flatten + classifier
    n, h, w, c = x.shape
    logits = pl.pallas_call(
        _pool_fc_kernel,
        out_shape=jax.ShapeDtypeStruct((n, cfg["num_labels"]), jnp.float32),
        in_specs=[VMEM_SPEC, VMEM_SPEC, VMEM_SPEC],
        out_specs=VMEM_SPEC,
    )(x.reshape(n, h * w, c), params["fc_w"], params["fc_b"])
    return logits


# ----------------------------- main ---------------------------------------------

if __name__ == "__main__":
    cfg = dict(
        num_channels=3,
        embedding_size=16,
        embedding_kernel_size=7,
        embedding_stride=2,
        embedding_pooling_with_downsample=True,
        hidden_sizes=[32, 64],
        depths=[2, 1],
        cardinality=4,
        bottleneck_width=64,
        reduction=4,
        downsample_in_first_stage=False,
        downsample_after_stage=False,
        num_labels=10,
    )

    key = jax.random.PRNGKey(0)
    k_params, k_input = jax.random.split(key)
    params = init_model(k_params, cfg)

    pixel_values = jax.random.normal(k_input, (2, cfg["num_channels"], 32, 32),
                                     jnp.float32)   # NCHW, as in PyTorch

    forward = jax.jit(functools.partial(resnext_forward, params))
    logits = jax.block_until_ready(forward(pixel_values))
    assert logits.shape == (2, cfg["num_labels"]) and logits.dtype == jnp.float32
    assert bool(jnp.all(jnp.isfinite(logits)))
    print("KERNEL_OK")
</pallas_src>

<mosaic_0001>
module attributes {stable_mosaic.version = 11 : i64} {
  func.func @_matmul_epi_kernel(%arg0: i32, %arg1: memref<256x147xbf16, #tpu.memory_space<vmem>>, %arg2: memref<147x16xbf16, #tpu.memory_space<vmem>>, %arg3: memref<1x16xf32, #tpu.memory_space<vmem>>, %arg4: memref<256x16xbf16, #tpu.memory_space<vmem>>) attributes {dimension_semantics = [#tpu.dimension_semantics<parallel>], iteration_bounds = array<i64: 2>, scalar_prefetch = 0 : i64, scratch_operands = 0 : i64, tpu.core_type = #tpu.core_type<tc>, window_params = [{transform_indices = @transform_0, window_bounds = array<i64: 256, 147>}, {pipeline_mode = #tpu.pipeline_mode<synchronous>, transform_indices = @transform_1, window_bounds = array<i64: 147, 16>}, {pipeline_mode = #tpu.pipeline_mode<synchronous>, transform_indices = @transform_2, window_bounds = array<i64: 1, 16>}, {transform_indices = @transform_3, window_bounds = array<i64: 256, 16>}]} {
    %c0 = arith.constant 0 : index
    %c0_0 = arith.constant 0 : index
    %0 = vector.load %arg1[%c0, %c0_0] : memref<256x147xbf16, #tpu.memory_space<vmem>>, vector<256x147xbf16>
    %c0_1 = arith.constant 0 : index
    %c0_2 = arith.constant 0 : index
    %1 = vector.load %arg2[%c0_1, %c0_2] : memref<147x16xbf16, #tpu.memory_space<vmem>>, vector<147x16xbf16>
    %cst = arith.constant dense<0.000000e+00> : vector<256x16xf32>
    %2 = tpu.matmul %0, %1, %cst {dimension_numbers = #tpu.dot_dimension_numbers<[1], [0], [0], [1], [0, 0, 1, 1], [], []>} : vector<256x147xbf16>, vector<147x16xbf16>, vector<256x16xf32> -> vector<256x16xf32>
    %c0_3 = arith.constant 0 : index
    %c0_4 = arith.constant 0 : index
    %3 = vector.load %arg3[%c0_3, %c0_4] : memref<1x16xf32, #tpu.memory_space<vmem>>, vector<1x16xf32>
    %4 = vector.broadcast %3 : vector<1x16xf32> to vector<256x16xf32>
    %5 = arith.addf %2, %4 : vector<256x16xf32>
    %cst_5 = arith.constant 0.000000e+00 : f32
    %6 = vector.broadcast %cst_5 : f32 to vector<256x16xf32>
    %7 = arith.maximumf %5, %6 : vector<256x16xf32>
    %8 = arith.truncf %7 : vector<256x16xf32> to vector<256x16xbf16>
    %c0_6 = arith.constant 0 : index
    %c0_7 = arith.constant 0 : index
    %9 = vector.load %arg4[%c0_6, %c0_7] : memref<256x16xbf16, #tpu.memory_space<vmem>>, vector<256x16xbf16>
    tpu.vector_store %arg4[%c0_6, %c0_7], %8 {strides = array<i32>} : memref<256x16xbf16, #tpu.memory_space<vmem>>, vector<256x16xbf16>,
    return
  }
  func.func @transform_0(%arg0: i32) -> (i32, i32) {
    %c0_i32 = arith.constant 0 : i32
    %c0_i32_0 = arith.constant 0 : i32
    return %arg0, %c0_i32 : i32, i32
  }
  func.func @transform_1(%arg0: i32) -> (i32, i32) {
    %c0_i32 = arith.constant 0 : i32
    %c0_i32_0 = arith.constant 0 : i32
    %c0_i32_1 = arith.constant 0 : i32
    return %c0_i32, %c0_i32_0 : i32, i32
  }
  func.func @transform_2(%arg0: i32) -> (i32, i32) {
    %c0_i32 = arith.constant 0 : i32
    %c0_i32_0 = arith.constant 0 : i32
    %c0_i32_1 = arith.constant 0 : i32
    return %c0_i32, %c0_i32_0 : i32, i32
  }
  func.func @transform_3(%arg0: i32) -> (i32, i32) {
    %c0_i32 = arith.constant 0 : i32
    %c0_i32_0 = arith.constant 0 : i32
    return %arg0, %c0_i32 : i32, i32
  }
}

module attributes {stable_mosaic.version = 11 : i64} {
  func.func @_max3_kernel(%arg0: i32, %arg1: memref<40x128xbf16, #tpu.memory_space<vmem>>, %arg2: memref<40x128xbf16, #tpu.memory_space<vmem>>, %arg3: memref<40x128xbf16, #tpu.memory_space<vmem>>, %arg4: memref<40x128xbf16, #tpu.memory_space<vmem>>) attributes {dimension_semantics = [#tpu.dimension_semantics<parallel>], iteration_bounds = array<i64: 1>, scalar_prefetch = 0 : i64, scratch_operands = 0 : i64, tpu.core_type = #tpu.core_type<tc>, window_params = [{transform_indices = @transform_0, window_bounds = array<i64: 40, 128>}, {transform_indices = @transform_1, window_bounds = array<i64: 40, 128>}, {transform_indices = @transform_2, window_bounds = array<i64: 40, 128>}, {transform_indices = @transform_3, window_bounds = array<i64: 40, 128>}]} {
    %c0 = arith.constant 0 : index
    %c0_0 = arith.constant 0 : index
    %0 = vector.load %arg1[%c0, %c0_0] : memref<40x128xbf16, #tpu.memory_space<vmem>>, vector<40x128xbf16>
    %c0_1 = arith.constant 0 : index
    %c0_2 = arith.constant 0 : index
    %1 = vector.load %arg2[%c0_1, %c0_2] : memref<40x128xbf16, #tpu.memory_space<vmem>>, vector<40x128xbf16>
    %2 = arith.maximumf %0, %1 : vector<40x128xbf16>
    %c0_3 = arith.constant 0 : index
    %c0_4 = arith.constant 0 : index
    %3 = vector.load %arg3[%c0_3, %c0_4] : memref<40x128xbf16, #tpu.memory_space<vmem>>, vector<40x128xbf16>
    %4 = arith.maximumf %2, %3 : vector<40x128xbf16>
    %c0_5 = arith.constant 0 : index
    %c0_6 = arith.constant 0 : index
    %5 = vector.load %arg4[%c0_5, %c0_6] : memref<40x128xbf16, #tpu.memory_space<vmem>>, vector<40x128xbf16>
    tpu.vector_store %arg4[%c0_5, %c0_6], %4 {strides = array<i32>} : memref<40x128xbf16, #tpu.memory_space<vmem>>, vector<40x128xbf16>,
    return
  }
  func.func @transform_0(%arg0: i32) -> (i32, i32) {
    %c0_i32 = arith.constant 0 : i32
    %c0_i32_0 = arith.constant 0 : i32
    return %arg0, %c0_i32 : i32, i32
  }
  func.func @transform_1(%arg0: i32) -> (i32, i32) {
    %c0_i32 = arith.constant 0 : i32
    %c0_i32_0 = arith.constant 0 : i32
    return %arg0, %c0_i32 : i32, i32
  }
  func.func @transform_2(%arg0: i32) -> (i32, i32) {
    %c0_i32 = arith.constant 0 : i32
    %c0_i32_0 = arith.constant 0 : i32
    return %arg0, %c0_i32 : i32, i32
  }
  func.func @transform_3(%arg0: i32) -> (i32, i32) {
    %c0_i32 = arith.constant 0 : i32
    %c0_i32_0 = arith.constant 0 : i32
    return %arg0, %c0_i32 : i32, i32
  }
}

module attributes {stable_mosaic.version = 11 : i64} {
  func.func @_max3_kernel(%arg0: i32, %arg1: memref<16x128xbf16, #tpu.memory_space<vmem>>, %arg2: memref<16x128xbf16, #tpu.memory_space<vmem>>, %arg3: memref<16x128xbf16, #tpu.memory_space<vmem>>, %arg4: memref<16x128xbf16, #tpu.memory_space<vmem>>) attributes {dimension_semantics = [#tpu.dimension_semantics<parallel>], iteration_bounds = array<i64: 1>, scalar_prefetch = 0 : i64, scratch_operands = 0 : i64, tpu.core_type = #tpu.core_type<tc>, window_params = [{transform_indices = @transform_0, window_bounds = array<i64: 16, 128>}, {transform_indices = @transform_1, window_bounds = array<i64: 16, 128>}, {transform_indices = @transform_2, window_bounds = array<i64: 16, 128>}, {transform_indices = @transform_3, window_bounds = array<i64: 16, 128>}]} {
    %c0 = arith.constant 0 : index
    %c0_0 = arith.constant 0 : index
    %0 = vector.load %arg1[%c0, %c0_0] : memref<16x128xbf16, #tpu.memory_space<vmem>>, vector<16x128xbf16>
    %c0_1 = arith.constant 0 : index
    %c0_2 = arith.constant 0 : index
    %1 = vector.load %arg2[%c0_1, %c0_2] : memref<16x128xbf16, #tpu.memory_space<vmem>>, vector<16x128xbf16>
    %2 = arith.maximumf %0, %1 : vector<16x128xbf16>
    %c0_3 = arith.constant 0 : index
    %c0_4 = arith.constant 0 : index
    %3 = vector.load %arg3[%c0_3, %c0_4] : memref<16x128xbf16, #tpu.memory_space<vmem>>, vector<16x128xbf16>
    %4 = arith.maximumf %2, %3 : vector<16x128xbf16>
    %c0_5 = arith.constant 0 : index
    %c0_6 = arith.constant 0 : index
    %5 = vector.load %arg4[%c0_5, %c0_6] : memref<16x128xbf16, #tpu.memory_space<vmem>>, vector<16x128xbf16>
    tpu.vector_store %arg4[%c0_5, %c0_6], %4 {strides = array<i32>} : memref<16x128xbf16, #tpu.memory_space<vmem>>, vector<16x128xbf16>,
    return
  }
  func.func @transform_0(%arg0: i32) -> (i32, i32) {
    %c0_i32 = arith.constant 0 : i32
    %c0_i32_0 = arith.constant 0 : i32
    return %arg0, %c0_i32 : i32, i32
  }
  func.func @transform_1(%arg0: i32) -> (i32, i32) {
    %c0_i32 = arith.constant 0 : i32
    %c0_i32_0 = arith.constant 0 : i32
    return %arg0, %c0_i32 : i32, i32
  }
  func.func @transform_2(%arg0: i32) -> (i32, i32) {
    %c0_i32 = arith.constant 0 : i32
    %c0_i32_0 = arith.constant 0 : i32
    return %arg0, %c0_i32 : i32, i32
  }
  func.func @transform_3(%arg0: i32) -> (i32, i32) {
    %c0_i32 = arith.constant 0 : i32
    %c0_i32_0 = arith.constant 0 : i32
    return %arg0, %c0_i32 : i32, i32
  }
}

module attributes {stable_mosaic.version = 11 : i64} {
  func.func @_matmul_epi_kernel(%arg0: i32, %arg1: memref<128x16xbf16, #tpu.memory_space<vmem>>, %arg2: memref<16x32xbf16, #tpu.memory_space<vmem>>, %arg3: memref<1x32xf32, #tpu.memory_space<vmem>>, %arg4: memref<128x32xbf16, #tpu.memory_space<vmem>>) attributes {dimension_semantics = [#tpu.dimension_semantics<parallel>], iteration_bounds = array<i64: 1>, scalar_prefetch = 0 : i64, scratch_operands = 0 : i64, tpu.core_type = #tpu.core_type<tc>, window_params = [{transform_indices = @transform_0, window_bounds = array<i64: 128, 16>}, {pipeline_mode = #tpu.pipeline_mode<synchronous>, transform_indices = @transform_1, window_bounds = array<i64: 16, 32>}, {pipeline_mode = #tpu.pipeline_mode<synchronous>, transform_indices = @transform_2, window_bounds = array<i64: 1, 32>}, {transform_indices = @transform_3, window_bounds = array<i64: 128, 32>}]} {
    %c0 = arith.constant 0 : index
    %c0_0 = arith.constant 0 : index
    %0 = vector.load %arg1[%c0, %c0_0] : memref<128x16xbf16, #tpu.memory_space<vmem>>, vector<128x16xbf16>
    %c0_1 = arith.constant 0 : index
    %c0_2 = arith.constant 0 : index
    %1 = vector.load %arg2[%c0_1, %c0_2] : memref<16x32xbf16, #tpu.memory_space<vmem>>, vector<16x32xbf16>
    %cst = arith.constant dense<0.000000e+00> : vector<128x32xf32>
    %2 = tpu.matmul %0, %1, %cst {dimension_numbers = #tpu.dot_dimension_numbers<[1], [0], [0], [1], [0, 0, 1, 1], [], []>} : vector<128x16xbf16>, vector<16x32xbf16>, vector<128x32xf32> -> vector<128x32xf32>
    %c0_3 = arith.constant 0 : index
    %c0_4 = arith.constant 0 : index
    %3 = vector.load %arg3[%c0_3, %c0_4] : memref<1x32xf32, #tpu.memory_space<vmem>>, vector<1x32xf32>
    %4 = vector.broadcast %3 : vector<1x32xf32> to vector<128x32xf32>
    %5 = arith.addf %2, %4 : vector<128x32xf32>
    %cst_5 = arith.constant 0.000000e+00 : f32
    %6 = vector.broadcast %cst_5 : f32 to vector<128x32xf32>
    %7 = arith.maximumf %5, %6 : vector<128x32xf32>
    %8 = arith.truncf %7 : vector<128x32xf32> to vector<128x32xbf16>
    %c0_6 = arith.constant 0 : index
    %c0_7 = arith.constant 0 : index
    %9 = vector.load %arg4[%c0_6, %c0_7] : memref<128x32xbf16, #tpu.memory_space<vmem>>, vector<128x32xbf16>
    tpu.vector_store %arg4[%c0_6, %c0_7], %8 {strides = array<i32>} : memref<128x32xbf16, #tpu.memory_space<vmem>>, vector<128x32xbf16>,
    return
  }
  func.func @transform_0(%arg0: i32) -> (i32, i32) {
    %c0_i32 = arith.constant 0 : i32
    %c0_i32_0 = arith.constant 0 : i32
    return %arg0, %c0_i32 : i32, i32
  }
  func.func @transform_1(%arg0: i32) -> (i32, i32) {
    %c0_i32 = arith.constant 0 : i32
    %c0_i32_0 = arith.constant 0 : i32
    %c0_i32_1 = arith.constant 0 : i32
    return %c0_i32, %c0_i32_0 : i32, i32
  }
  func.func @transform_2(%arg0: i32) -> (i32, i32) {
    %c0_i32 = arith.constant 0 : i32
    %c0_i32_0 = arith.constant 0 : i32
    %c0_i32_1 = arith.constant 0 : i32
    return %c0_i32, %c0_i32_0 : i32, i32
  }
  func.func @transform_3(%arg0: i32) -> (i32, i32) {
    %c0_i32 = arith.constant 0 : i32
    %c0_i32_0 = arith.constant 0 : i32
    return %arg0, %c0_i32 : i32, i32
  }
}

module attributes {stable_mosaic.version = 11 : i64} {
  func.func @_conv3x3_kernel(%arg0: i32, %arg1: memref<1x128x32xbf16, #tpu.memory_space<vmem>>, %arg2: memref<9x32x32xbf16, #tpu.memory_space<vmem>>, %arg3: memref<1x32xf32, #tpu.memory_space<vmem>>, %arg4: memref<1x104x32xbf16, #tpu.memory_space<vmem>>) attributes {dimension_semantics = [#tpu.dimension_semantics<parallel>], iteration_bounds = array<i64: 2>, scalar_prefetch = 0 : i64, scratch_operands = 0 : i64, tpu.core_type = #tpu.core_type<tc>, window_params = [{transform_indices = @transform_0, window_bounds = array<i64: 1, 128, 32>}, {pipeline_mode = #tpu.pipeline_mode<synchronous>, transform_indices = @transform_1, window_bounds = array<i64: 9, 32, 32>}, {pipeline_mode = #tpu.pipeline_mode<synchronous>, transform_indices = @transform_2, window_bounds = array<i64: 1, 32>}, {transform_indices = @transform_3, window_bounds = array<i64: 1, 104, 32>}]} {
    %cst = arith.constant 0.000000e+00 : f32
    %0 = vector.broadcast %cst : f32 to vector<104x32xf32>
    %c0 = arith.constant 0 : index
    %c0_0 = arith.constant 0 : index
    %c0_1 = arith.constant 0 : index
    %1 = vector.load %arg1[%c0, %c0_0, %c0_1] : memref<1x128x32xbf16, #tpu.memory_space<vmem>>, vector<1x104x32xbf16>
    %2 = vector.shape_cast %1 : vector<1x104x32xbf16> to vector<104x32xbf16>
    %c0_2 = arith.constant 0 : index
    %c0_3 = arith.constant 0 : index
    %c0_4 = arith.constant 0 : index
    %3 = vector.load %arg2[%c0_2, %c0_3, %c0_4] : memref<9x32x32xbf16, #tpu.memory_space<vmem>>, vector<1x32x32xbf16>
    %4 = vector.shape_cast %3 : vector<1x32x32xbf16> to vector<32x32xbf16>
    %cst_5 = arith.constant dense<0.000000e+00> : vector<104x32xf32>
    %5 = tpu.matmul %2, %4, %cst_5 {dimension_numbers = #tpu.dot_dimension_numbers<[1], [0], [0], [1], [0, 0, 1, 1], [], []>} : vector<104x32xbf16>, vector<32x32xbf16>, vector<104x32xf32> -> vector<104x32xf32>
    %6 = arith.addf %0, %5 : vector<104x32xf32>
    %c0_6 = arith.constant 0 : index
    %c1 = arith.constant 1 : index
    %c0_7 = arith.constant 0 : index
    %7 = vector.load %arg1[%c0_6, %c1, %c0_7] : memref<1x128x32xbf16, #tpu.memory_space<vmem>>, vector<1x104x32xbf16>
    %8 = vector.shape_cast %7 : vector<1x104x32xbf16> to vector<104x32xbf16>
    %c1_8 = arith.constant 1 : index
    %c0_9 = arith.constant 0 : index
    %c0_10 = arith.constant 0 : index
    %9 = vector.load %arg2[%c1_8, %c0_9, %c0_10] : memref<9x32x32xbf16, #tpu.memory_space<vmem>>, vector<1x32x32xbf16>
    %10 = vector.shape_cast %9 : vector<1x32x32xbf16> to vector<32x32xbf16>
    %cst_11 = arith.constant dense<0.000000e+00> : vector<104x32xf32>
    %11 = tpu.matmul %8, %10, %cst_11 {dimension_numbers = #tpu.dot_dimension_numbers<[1], [0], [0], [1], [0, 0, 1, 1], [], []>} : vector<104x32xbf16>, vector<32x32xbf16>, vector<104x32xf32> -> vector<104x32xf32>
    %12 = arith.addf %6, %11 : vector<104x32xf32>
    %c0_12 = arith.constant 0 : index
    %c2 = arith.constant 2 : index
    %c0_13 = arith.constant 0 : index
    %13 = vector.load %arg1[%c0_12, %c2, %c0_13] : memref<1x128x32xbf16, #tpu.memory_space<vmem>>, vector<1x104x32xbf16>
    %14 = vector.shape_cast %13 : vector<1x104x32xbf16> to vector<104x32xbf16>
    %c2_14 = arith.constant 2 : index
    %c0_15 = arith.constant 0 : index
    %c0_16 = arith.constant 0 : index
    %15 = vector.load %arg2[%c2_14, %c0_15, %c0_16] : memref<9x32x32xbf16, #tpu.memory_space<vmem>>, vector<1x32x32xbf16>
    %16 = vector.shape_cast %15 : vector<1x32x32xbf16> to vector<32x32xbf16>
    %cst_17 = arith.constant dense<0.000000e+00> : vector<104x32xf32>
    %17 = tpu.matmul %14, %16, %cst_17 {dimension_numbers = #tpu.dot_dimension_numbers<[1], [0], [0], [1], [0, 0, 1, 1], [], []>} : vector<104x32xbf16>, vector<32x32xbf16>, vector<104x32xf32> -> vector<104x32xf32>
    %18 = arith.addf %12, %17 : vector<104x32xf32>
    %c0_18 = arith.constant 0 : index
    %c10 = arith.constant 10 : index
    %c0_19 = arith.constant 0 : index
    %19 = vector.load %arg1[%c0_18, %c10, %c0_19] : memref<1x128x32xbf16, #tpu.memory_space<vmem>>, vector<1x104x32xbf16>
    %20 = vector.shape_cast %19 : vector<1x104x32xbf16> to vector<104x32xbf16>
    %c3 = arith.constant 3 : index
    %c0_20 = arith.constant 0 : index
    %c0_21 = arith.constant 0 : index
    %21 = vector.load %arg2[%c3, %c0_20, %c0_21] : memref<9x32x32xbf16, #tpu.memory_space<vmem>>, vector<1x32x32xbf16>
    %22 = vector.shape_cast %21 : vector<1x32x32xbf16> to vector<32x32xbf16>
    %cst_22 = arith.constant dense<0.000000e+00> : vector<104x32xf32>
    %23 = tpu.matmul %20, %22, %cst_22 {dimension_numbers = #tpu.dot_dimension_numbers<[1], [0], [0], [1], [0, 0, 1, 1], [], []>} : vector<104x32xbf16>, vector<32x32xbf16>, vector<104x32xf32> -> vector<104x32xf32>
    %24 = arith.addf %18, %23 : vector<104x32xf32>
    %c0_23 = arith.constant 0 : index
    %c11 = arith.constant 11 : index
    %c0_24 = arith.constant 0 : index
    %25 = vector.load %arg1[%c0_23, %c11, %c0_24] : memref<1x128x32xbf16, #tpu.memory_space<vmem>>, vector<1x104x32xbf16>
    %26 = vector.shape_cast %25 : vector<1x104x32xbf16> to vector<104x32xbf16>
    %c4 = arith.constant 4 : index
    %c0_25 = arith.constant 0 : index
    %c0_26 = arith.constant 0 : index
    %27 = vector.load %arg2[%c4, %c0_25, %c0_26] : memref<9x32x32xbf16, #tpu.memory_space<vmem>>, vector<1x32x32xbf16>
    %28 = vector.shape_cast %27 : vector<1x32x32xbf16> to vector<32x32xbf16>
    %cst_27 = arith.constant dense<0.000000e+00> : vector<104x32xf32>
    %29 = tpu.matmul %26, %28, %cst_27 {dimension_numbers = #tpu.dot_dimension_numbers<[1], [0], [0], [1], [0, 0, 1, 1], [], []>} : vector<104x32xbf16>, vector<32x32xbf16>, vector<104x32xf32> -> vector<104x32xf32>
    %30 = arith.addf %24, %29 : vector<104x32xf32>
    %c0_28 = arith.constant 0 : index
    %c12 = arith.constant 12 : index
    %c0_29 = arith.constant 0 : index
    %31 = vector.load %arg1[%c0_28, %c12, %c0_29] : memref<1x128x32xbf16, #tpu.memory_space<vmem>>, vector<1x104x32xbf16>
    %32 = vector.shape_cast %31 : vector<1x104x32xbf16> to vector<104x32xbf16>
    %c5 = arith.constant 5 : index
    %c0_30 = arith.constant 0 : index
    %c0_31 = arith.constant 0 : index
    %33 = vector.load %arg2[%c5, %c0_30, %c0_31] : memref<9x32x32xbf16, #tpu.memory_space<vmem>>, vector<1x32x32xbf16>
    %34 = vector.shape_cast %33 : vector<1x32x32xbf16> to vector<32x32xbf16>
    %cst_32 = arith.constant dense<0.000000e+00> : vector<104x32xf32>
    %35 = tpu.matmul %32, %34, %cst_32 {dimension_numbers = #tpu.dot_dimension_numbers<[1], [0], [0], [1], [0, 0, 1, 1], [], []>} : vector<104x32xbf16>, vector<32x32xbf16>, vector<104x32xf32> -> vector<104x32xf32>
    %36 = arith.addf %30, %35 : vector<104x32xf32>
    %c0_33 = arith.constant 0 : index
    %c20 = arith.constant 20 : index
    %c0_34 = arith.constant 0 : index
    %37 = vector.load %arg1[%c0_33, %c20, %c0_34] : memref<1x128x32xbf16, #tpu.memory_space<vmem>>, vector<1x104x32xbf16>
    %38 = vector.shape_cast %37 : vector<1x104x32xbf16> to vector<104x32xbf16>
    %c6 = arith.constant 6 : index
    %c0_35 = arith.constant 0 : index
    %c0_36 = arith.constant 0 : index
    %39 = vector.load %arg2[%c6, %c0_35, %c0_36] : memref<9x32x32xbf16, #tpu.memory_space<vmem>>, vector<1x32x32xbf16>
    %40 = vector.shape_cast %39 : vector<1x32x32xbf16> to vector<32x32xbf16>
    %cst_37 = arith.constant dense<0.000000e+00> : vector<104x32xf32>
    %41 = tpu.matmul %38, %40, %cst_37 {dimension_numbers = #tpu.dot_dimension_numbers<[1], [0], [0], [1], [0, 0, 1, 1], [], []>} : vector<104x32xbf16>, vector<32x32xbf16>, vector<104x32xf32> -> vector<104x32xf32>
    %42 = arith.addf %36, %41 : vector<104x32xf32>
    %c0_38 = arith.constant 0 : index
    %c21 = arith.constant 21 : index
    %c0_39 = arith.constant 0 : index
    %43 = vector.load %arg1[%c0_38, %c21, %c0_39] : memref<1x128x32xbf16, #tpu.memory_space<vmem>>, vector<1x104x32xbf16>
    %44 = vector.shape_cast %43 : vector<1x104x32xbf16> to vector<104x32xbf16>
    %c7 = arith.constant 7 : index
    %c0_40 = arith.constant 0 : index
    %c0_41 = arith.constant 0 : index
    %45 = vector.load %arg2[%c7, %c0_40, %c0_41] : memref<9x32x32xbf16, #tpu.memory_space<vmem>>, vector<1x32x32xbf16>
    %46 = vector.shape_cast %45 : vector<1x32x32xbf16> to vector<32x32xbf16>
    %cst_42 = arith.constant dense<0.000000e+00> : vector<104x32xf32>
    %47 = tpu.matmul %44, %46, %cst_42 {dimension_numbers = #tpu.dot_dimension_numbers<[1], [0], [0], [1], [0, 0, 1, 1], [], []>} : vector<104x32xbf16>, vector<32x32xbf16>, vector<104x32xf32> -> vector<104x32xf32>
    %48 = arith.addf %42, %47 : vector<104x32xf32>
    %c0_43 = arith.constant 0 : index
    %c22 = arith.constant 22 : index
    %c0_44 = arith.constant 0 : index
    %49 = vector.load %arg1[%c0_43, %c22, %c0_44] : memref<1x128x32xbf16, #tpu.memory_space<vmem>>, vector<1x104x32xbf16>
    %50 = vector.shape_cast %49 : vector<1x104x32xbf16> to vector<104x32xbf16>
    %c8 = arith.constant 8 : index
    %c0_45 = arith.constant 0 : index
    %c0_46 = arith.constant 0 : index
    %51 = vector.load %arg2[%c8, %c0_45, %c0_46] : memref<9x32x32xbf16, #tpu.memory_space<vmem>>, vector<1x32x32xbf16>
    %52 = vector.shape_cast %51 : vector<1x32x32xbf16> to vector<32x32xbf16>
    %cst_47 = arith.constant dense<0.000000e+00> : vector<104x32xf32>
    %53 = tpu.matmul %50, %52, %cst_47 {dimension_numbers = #tpu.dot_dimension_numbers<[1], [0], [0], [1], [0, 0, 1, 1], [], []>} : vector<104x32xbf16>, vector<32x32xbf16>, vector<104x32xf32> -> vector<104x32xf32>
    %54 = arith.addf %48, %53 : vector<104x32xf32>
    %c0_48 = arith.constant 0 : index
    %c0_49 = arith.constant 0 : index
    %55 = vector.load %arg3[%c0_48, %c0_49] : memref<1x32xf32, #tpu.memory_space<vmem>>, vector<1x32xf32>
    %56 = vector.broadcast %55 : vector<1x32xf32> to vector<104x32xf32>
    %57 = arith.addf %54, %56 : vector<104x32xf32>
    %cst_50 = arith.constant 0.000000e+00 : f32
    %58 = vector.broadcast %cst_50 : f32 to vector<104x32xf32>
    %59 = arith.maximumf %57, %58 : vector<104x32xf32>
    %60 = arith.truncf %59 : vector<104x32xf32> to vector<104x32xbf16>
    %c0_51 = arith.constant 0 : index
    %c0_52 = arith.constant 0 : index
    %c0_53 = arith.constant 0 : index
    %61 = vector.load %arg4[%c0_51, %c0_52, %c0_53] : memref<1x104x32xbf16, #tpu.memory_space<vmem>>, vector<1x104x32xbf16>
    %62 = vector.shape_cast %61 : vector<1x104x32xbf16> to vector<104x32xbf16>
    %63 = vector.shape_cast %60 : vector<104x32xbf16> to vector<1x104x32xbf16>
    tpu.vector_store %arg4[%c0_51, %c0_52, %c0_53], %63 {strides = array<i32>} : memref<1x104x32xbf16, #tpu.memory_space<vmem>>, vector<1x104x32xbf16>,
    return
  }
  func.func @transform_0(%arg0: i32) -> (i32, i32, i32) {
    %c0_i32 = arith.constant 0 : i32
    %c0_i32_0 = arith.constant 0 : i32
    %c0_i32_1 = arith.constant 0 : i32
    return %arg0, %c0_i32, %c0_i32_0 : i32, i32, i32
  }
  func.func @transform_1(%arg0: i32) -> (i32, i32, i32) {
    %c0_i32 = arith.constant 0 : i32
    %c0_i32_0 = arith.constant 0 : i32
    %c0_i32_1 = arith.constant 0 : i32
    %c0_i32_2 = arith.constant 0 : i32
    return %c0_i32, %c0_i32_0, %c0_i32_1 : i32, i32, i32
  }
  func.func @transform_2(%arg0: i32) -> (i32, i32) {
    %c0_i32 = arith.constant 0 : i32
    %c0_i32_0 = arith.constant 0 : i32
    %c0_i32_1 = arith.constant 0 : i32
    return %c0_i32, %c0_i32_0 : i32, i32
  }
  func.func @transform_3(%arg0: i32) -> (i32, i32, i32) {
    %c0_i32 = arith.constant 0 : i32
    %c0_i32_0 = arith.constant 0 : i32
    %c0_i32_1 = arith.constant 0 : i32
    return %arg0, %c0_i32, %c0_i32_0 : i32, i32, i32
  }
}

module attributes {stable_mosaic.version = 11 : i64} {
  func.func @_matmul_epi_kernel(%arg0: i32, %arg1: memref<128x16xbf16, #tpu.memory_space<vmem>>, %arg2: memref<16x32xbf16, #tpu.memory_space<vmem>>, %arg3: memref<1x32xf32, #tpu.memory_space<vmem>>, %arg4: memref<128x32xbf16, #tpu.memory_space<vmem>>) attributes {dimension_semantics = [#tpu.dimension_semantics<parallel>], iteration_bounds = array<i64: 1>, scalar_prefetch = 0 : i64, scratch_operands = 0 : i64, tpu.core_type = #tpu.core_type<tc>, window_params = [{transform_indices = @transform_0, window_bounds = array<i64: 128, 16>}, {pipeline_mode = #tpu.pipeline_mode<synchronous>, transform_indices = @transform_1, window_bounds = array<i64: 16, 32>}, {pipeline_mode = #tpu.pipeline_mode<synchronous>, transform_indices = @transform_2, window_bounds = array<i64: 1, 32>}, {transform_indices = @transform_3, window_bounds = array<i64: 128, 32>}]} {
    %c0 = arith.constant 0 : index
    %c0_0 = arith.constant 0 : index
    %0 = vector.load %arg1[%c0, %c0_0] : memref<128x16xbf16, #tpu.memory_space<vmem>>, vector<128x16xbf16>
    %c0_1 = arith.constant 0 : index
    %c0_2 = arith.constant 0 : index
    %1 = vector.load %arg2[%c0_1, %c0_2] : memref<16x32xbf16, #tpu.memory_space<vmem>>, vector<16x32xbf16>
    %cst = arith.constant dense<0.000000e+00> : vector<128x32xf32>
    %2 = tpu.matmul %0, %1, %cst {dimension_numbers = #tpu.dot_dimension_numbers<[1], [0], [0], [1], [0, 0, 1, 1], [], []>} : vector<128x16xbf16>, vector<16x32xbf16>, vector<128x32xf32> -> vector<128x32xf32>
    %c0_3 = arith.constant 0 : index
    %c0_4 = arith.constant 0 : index
    %3 = vector.load %arg3[%c0_3, %c0_4] : memref<1x32xf32, #tpu.memory_space<vmem>>, vector<1x32xf32>
    %4 = vector.broadcast %3 : vector<1x32xf32> to vector<128x32xf32>
    %5 = arith.addf %2, %4 : vector<128x32xf32>
    %6 = arith.truncf %5 : vector<128x32xf32> to vector<128x32xbf16>
    %c0_5 = arith.constant 0 : index
    %c0_6 = arith.constant 0 : index
    %7 = vector.load %arg4[%c0_5, %c0_6] : memref<128x32xbf16, #tpu.memory_space<vmem>>, vector<128x32xbf16>
    tpu.vector_store %arg4[%c0_5, %c0_6], %6 {strides = array<i32>} : memref<128x32xbf16, #tpu.memory_space<vmem>>, vector<128x32xbf16>,
    return
  }
  func.func @transform_0(%arg0: i32) -> (i32, i32) {
    %c0_i32 = arith.constant 0 : i32
    %c0_i32_0 = arith.constant 0 : i32
    return %arg0, %c0_i32 : i32, i32
  }
  func.func @transform_1(%arg0: i32) -> (i32, i32) {
    %c0_i32 = arith.constant 0 : i32
    %c0_i32_0 = arith.constant 0 : i32
    %c0_i32_1 = arith.constant 0 : i32
    return %c0_i32, %c0_i32_0 : i32, i32
  }
  func.func @transform_2(%arg0: i32) -> (i32, i32) {
    %c0_i32 = arith.constant 0 : i32
    %c0_i32_0 = arith.constant 0 : i32
    %c0_i32_1 = arith.constant 0 : i32
    return %c0_i32, %c0_i32_0 : i32, i32
  }
  func.func @transform_3(%arg0: i32) -> (i32, i32) {
    %c0_i32 = arith.constant 0 : i32
    %c0_i32_0 = arith.constant 0 : i32
    return %arg0, %c0_i32 : i32, i32
  }
}

module attributes {stable_mosaic.version = 11 : i64} {
  func.func @_matmul_epi_kernel(%arg0: i32, %arg1: memref<128x32xbf16, #tpu.memory_space<vmem>>, %arg2: memref<32x32xbf16, #tpu.memory_space<vmem>>, %arg3: memref<1x32xf32, #tpu.memory_space<vmem>>, %arg4: memref<128x32xbf16, #tpu.memory_space<vmem>>) attributes {dimension_semantics = [#tpu.dimension_semantics<parallel>], iteration_bounds = array<i64: 1>, scalar_prefetch = 0 : i64, scratch_operands = 0 : i64, tpu.core_type = #tpu.core_type<tc>, window_params = [{transform_indices = @transform_0, window_bounds = array<i64: 128, 32>}, {pipeline_mode = #tpu.pipeline_mode<synchronous>, transform_indices = @transform_1, window_bounds = array<i64: 32, 32>}, {pipeline_mode = #tpu.pipeline_mode<synchronous>, transform_indices = @transform_2, window_bounds = array<i64: 1, 32>}, {transform_indices = @transform_3, window_bounds = array<i64: 128, 32>}]} {
    %c0 = arith.constant 0 : index
    %c0_0 = arith.constant 0 : index
    %0 = vector.load %arg1[%c0, %c0_0] : memref<128x32xbf16, #tpu.memory_space<vmem>>, vector<128x32xbf16>
    %c0_1 = arith.constant 0 : index
    %c0_2 = arith.constant 0 : index
    %1 = vector.load %arg2[%c0_1, %c0_2] : memref<32x32xbf16, #tpu.memory_space<vmem>>, vector<32x32xbf16>
    %cst = arith.constant dense<0.000000e+00> : vector<128x32xf32>
    %2 = tpu.matmul %0, %1, %cst {dimension_numbers = #tpu.dot_dimension_numbers<[1], [0], [0], [1], [0, 0, 1, 1], [], []>} : vector<128x32xbf16>, vector<32x32xbf16>, vector<128x32xf32> -> vector<128x32xf32>
    %c0_3 = arith.constant 0 : index
    %c0_4 = arith.constant 0 : index
    %3 = vector.load %arg3[%c0_3, %c0_4] : memref<1x32xf32, #tpu.memory_space<vmem>>, vector<1x32xf32>
    %4 = vector.broadcast %3 : vector<1x32xf32> to vector<128x32xf32>
    %5 = arith.addf %2, %4 : vector<128x32xf32>
    %cst_5 = arith.constant 0.000000e+00 : f32
    %6 = vector.broadcast %cst_5 : f32 to vector<128x32xf32>
    %7 = arith.maximumf %5, %6 : vector<128x32xf32>
    %8 = arith.truncf %7 : vector<128x32xf32> to vector<128x32xbf16>
    %c0_6 = arith.constant 0 : index
    %c0_7 = arith.constant 0 : index
    %9 = vector.load %arg4[%c0_6, %c0_7] : memref<128x32xbf16, #tpu.memory_space<vmem>>, vector<128x32xbf16>
    tpu.vector_store %arg4[%c0_6, %c0_7], %8 {strides = array<i32>} : memref<128x32xbf16, #tpu.memory_space<vmem>>, vector<128x32xbf16>,
    return
  }
  func.func @transform_0(%arg0: i32) -> (i32, i32) {
    %c0_i32 = arith.constant 0 : i32
    %c0_i32_0 = arith.constant 0 : i32
    return %arg0, %c0_i32 : i32, i32
  }
  func.func @transform_1(%arg0: i32) -> (i32, i32) {
    %c0_i32 = arith.constant 0 : i32
    %c0_i32_0 = arith.constant 0 : i32
    %c0_i32_1 = arith.constant 0 : i32
    return %c0_i32, %c0_i32_0 : i32, i32
  }
  func.func @transform_2(%arg0: i32) -> (i32, i32) {
    %c0_i32 = arith.constant 0 : i32
    %c0_i32_0 = arith.constant 0 : i32
    %c0_i32_1 = arith.constant 0 : i32
    return %c0_i32, %c0_i32_0 : i32, i32
  }
  func.func @transform_3(%arg0: i32) -> (i32, i32) {
    %c0_i32 = arith.constant 0 : i32
    %c0_i32_0 = arith.constant 0 : i32
    return %arg0, %c0_i32 : i32, i32
  }
}

module attributes {stable_mosaic.version = 11 : i64} {
  func.func @_matmul_add_relu_kernel(%arg0: i32, %arg1: memref<128x32xbf16, #tpu.memory_space<vmem>>, %arg2: memref<32x32xbf16, #tpu.memory_space<vmem>>, %arg3: memref<1x32xf32, #tpu.memory_space<vmem>>, %arg4: memref<128x32xbf16, #tpu.memory_space<vmem>>, %arg5: memref<128x32xbf16, #tpu.memory_space<vmem>>) attributes {dimension_semantics = [#tpu.dimension_semantics<parallel>], iteration_bounds = array<i64: 1>, scalar_prefetch = 0 : i64, scratch_operands = 0 : i64, tpu.core_type = #tpu.core_type<tc>, window_params = [{transform_indices = @transform_0, window_bounds = array<i64: 128, 32>}, {pipeline_mode = #tpu.pipeline_mode<synchronous>, transform_indices = @transform_1, window_bounds = array<i64: 32, 32>}, {pipeline_mode = #tpu.pipeline_mode<synchronous>, transform_indices = @transform_2, window_bounds = array<i64: 1, 32>}, {transform_indices = @transform_3, window_bounds = array<i64: 128, 32>}, {transform_indices = @transform_4, window_bounds = array<i64: 128, 32>}]} {
    %c0 = arith.constant 0 : index
    %c0_0 = arith.constant 0 : index
    %0 = vector.load %arg1[%c0, %c0_0] : memref<128x32xbf16, #tpu.memory_space<vmem>>, vector<128x32xbf16>
    %c0_1 = arith.constant 0 : index
    %c0_2 = arith.constant 0 : index
    %1 = vector.load %arg2[%c0_1, %c0_2] : memref<32x32xbf16, #tpu.memory_space<vmem>>, vector<32x32xbf16>
    %cst = arith.constant dense<0.000000e+00> : vector<128x32xf32>
    %2 = tpu.matmul %0, %1, %cst {dimension_numbers = #tpu.dot_dimension_numbers<[1], [0], [0], [1], [0, 0, 1, 1], [], []>} : vector<128x32xbf16>, vector<32x32xbf16>, vector<128x32xf32> -> vector<128x32xf32>
    %c0_3 = arith.constant 0 : index
    %c0_4 = arith.constant 0 : index
    %3 = vector.load %arg3[%c0_3, %c0_4] : memref<1x32xf32, #tpu.memory_space<vmem>>, vector<1x32xf32>
    %4 = vector.broadcast %3 : vector<1x32xf32> to vector<128x32xf32>
    %5 = arith.addf %2, %4 : vector<128x32xf32>
    %c0_5 = arith.constant 0 : index
    %c0_6 = arith.constant 0 : index
    %6 = vector.load %arg4[%c0_5, %c0_6] : memref<128x32xbf16, #tpu.memory_space<vmem>>, vector<128x32xbf16>
    %7 = arith.extf %6 : vector<128x32xbf16> to vector<128x32xf32>
    %8 = arith.addf %5, %7 : vector<128x32xf32>
    %cst_7 = arith.constant 0.000000e+00 : f32
    %9 = vector.broadcast %cst_7 : f32 to vector<128x32xf32>
    %10 = arith.maximumf %8, %9 : vector<128x32xf32>
    %11 = arith.truncf %10 : vector<128x32xf32> to vector<128x32xbf16>
    %c0_8 = arith.constant 0 : index
    %c0_9 = arith.constant 0 : index
    %12 = vector.load %arg5[%c0_8, %c0_9] : memref<128x32xbf16, #tpu.memory_space<vmem>>, vector<128x32xbf16>
    tpu.vector_store %arg5[%c0_8, %c0_9], %11 {strides = array<i32>} : memref<128x32xbf16, #tpu.memory_space<vmem>>, vector<128x32xbf16>,
    return
  }
  func.func @transform_0(%arg0: i32) -> (i32, i32) {
    %c0_i32 = arith.constant 0 : i32
    %c0_i32_0 = arith.constant 0 : i32
    return %arg0, %c0_i32 : i32, i32
  }
  func.func @transform_1(%arg0: i32) -> (i32, i32) {
    %c0_i32 = arith.constant 0 : i32
    %c0_i32_0 = arith.constant 0 : i32
    %c0_i32_1 = arith.constant 0 : i32
    return %c0_i32, %c0_i32_0 : i32, i32
  }
  func.func @transform_2(%arg0: i32) -> (i32, i32) {
    %c0_i32 = arith.constant 0 : i32
    %c0_i32_0 = arith.constant 0 : i32
    %c0_i32_1 = arith.constant 0 : i32
    return %c0_i32, %c0_i32_0 : i32, i32
  }
  func.func @transform_3(%arg0: i32) -> (i32, i32) {
    %c0_i32 = arith.constant 0 : i32
    %c0_i32_0 = arith.constant 0 : i32
    return %arg0, %c0_i32 : i32, i32
  }
  func.func @transform_4(%arg0: i32) -> (i32, i32) {
    %c0_i32 = arith.constant 0 : i32
    %c0_i32_0 = arith.constant 0 : i32
    return %arg0, %c0_i32 : i32, i32
  }
}

module attributes {stable_mosaic.version = 11 : i64} {
  func.func @_matmul_epi_kernel(%arg0: i32, %arg1: memref<128x32xbf16, #tpu.memory_space<vmem>>, %arg2: memref<32x64xbf16, #tpu.memory_space<vmem>>, %arg3: memref<1x64xf32, #tpu.memory_space<vmem>>, %arg4: memref<128x64xbf16, #tpu.memory_space<vmem>>) attributes {dimension_semantics = [#tpu.dimension_semantics<parallel>], iteration_bounds = array<i64: 1>, scalar_prefetch = 0 : i64, scratch_operands = 0 : i64, tpu.core_type = #tpu.core_type<tc>, window_params = [{transform_indices = @transform_0, window_bounds = array<i64: 128, 32>}, {pipeline_mode = #tpu.pipeline_mode<synchronous>, transform_indices = @transform_1, window_bounds = array<i64: 32, 64>}, {pipeline_mode = #tpu.pipeline_mode<synchronous>, transform_indices = @transform_2, window_bounds = array<i64: 1, 64>}, {transform_indices = @transform_3, window_bounds = array<i64: 128, 64>}]} {
    %c0 = arith.constant 0 : index
    %c0_0 = arith.constant 0 : index
    %0 = vector.load %arg1[%c0, %c0_0] : memref<128x32xbf16, #tpu.memory_space<vmem>>, vector<128x32xbf16>
    %c0_1 = arith.constant 0 : index
    %c0_2 = arith.constant 0 : index
    %1 = vector.load %arg2[%c0_1, %c0_2] : memref<32x64xbf16, #tpu.memory_space<vmem>>, vector<32x64xbf16>
    %cst = arith.constant dense<0.000000e+00> : vector<128x64xf32>
    %2 = tpu.matmul %0, %1, %cst {dimension_numbers = #tpu.dot_dimension_numbers<[1], [0], [0], [1], [0, 0, 1, 1], [], []>} : vector<128x32xbf16>, vector<32x64xbf16>, vector<128x64xf32> -> vector<128x64xf32>
    %c0_3 = arith.constant 0 : index
    %c0_4 = arith.constant 0 : index
    %3 = vector.load %arg3[%c0_3, %c0_4] : memref<1x64xf32, #tpu.memory_space<vmem>>, vector<1x64xf32>
    %4 = vector.broadcast %3 : vector<1x64xf32> to vector<128x64xf32>
    %5 = arith.addf %2, %4 : vector<128x64xf32>
    %cst_5 = arith.constant 0.000000e+00 : f32
    %6 = vector.broadcast %cst_5 : f32 to vector<128x64xf32>
    %7 = arith.maximumf %5, %6 : vector<128x64xf32>
    %8 = arith.truncf %7 : vector<128x64xf32> to vector<128x64xbf16>
    %c0_6 = arith.constant 0 : index
    %c0_7 = arith.constant 0 : index
    %9 = vector.load %arg4[%c0_6, %c0_7] : memref<128x64xbf16, #tpu.memory_space<vmem>>, vector<128x64xbf16>
    tpu.vector_store %arg4[%c0_6, %c0_7], %8 {strides = array<i32>} : memref<128x64xbf16, #tpu.memory_space<vmem>>, vector<128x64xbf16>,
    return
  }
  func.func @transform_0(%arg0: i32) -> (i32, i32) {
    %c0_i32 = arith.constant 0 : i32
    %c0_i32_0 = arith.constant 0 : i32
    return %arg0, %c0_i32 : i32, i32
  }
  func.func @transform_1(%arg0: i32) -> (i32, i32) {
    %c0_i32 = arith.constant 0 : i32
    %c0_i32_0 = arith.constant 0 : i32
    %c0_i32_1 = arith.constant 0 : i32
    return %c0_i32, %c0_i32_0 : i32, i32
  }
  func.func @transform_2(%arg0: i32) -> (i32, i32) {
    %c0_i32 = arith.constant 0 : i32
    %c0_i32_0 = arith.constant 0 : i32
    %c0_i32_1 = arith.constant 0 : i32
    return %c0_i32, %c0_i32_0 : i32, i32
  }
  func.func @transform_3(%arg0: i32) -> (i32, i32) {
    %c0_i32 = arith.constant 0 : i32
    %c0_i32_0 = arith.constant 0 : i32
    return %arg0, %c0_i32 : i32, i32
  }
}

module attributes {stable_mosaic.version = 11 : i64} {
  func.func @_matmul_add_relu_kernel(%arg0: i32, %arg1: memref<32x64xbf16, #tpu.memory_space<vmem>>, %arg2: memref<64x64xbf16, #tpu.memory_space<vmem>>, %arg3: memref<1x64xf32, #tpu.memory_space<vmem>>, %arg4: memref<32x64xbf16, #tpu.memory_space<vmem>>, %arg5: memref<32x64xbf16, #tpu.memory_space<vmem>>) attributes {dimension_semantics = [#tpu.dimension_semantics<parallel>], iteration_bounds = array<i64: 1>, scalar_prefetch = 0 : i64, scratch_operands = 0 : i64, tpu.core_type = #tpu.core_type<tc>, window_params = [{transform_indices = @transform_0, window_bounds = array<i64: 32, 64>}, {pipeline_mode = #tpu.pipeline_mode<synchronous>, transform_indices = @transform_1, window_bounds = array<i64: 64, 64>}, {pipeline_mode = #tpu.pipeline_mode<synchronous>, transform_indices = @transform_2, window_bounds = array<i64: 1, 64>}, {transform_indices = @transform_3, window_bounds = array<i64: 32, 64>}, {transform_indices = @transform_4, window_bounds = array<i64: 32, 64>}]} {
    %c0 = arith.constant 0 : index
    %c0_0 = arith.constant 0 : index
    %0 = vector.load %arg1[%c0, %c0_0] : memref<32x64xbf16, #tpu.memory_space<vmem>>, vector<32x64xbf16>
    %c0_1 = arith.constant 0 : index
    %c0_2 = arith.constant 0 : index
    %1 = vector.load %arg2[%c0_1, %c0_2] : memref<64x64xbf16, #tpu.memory_space<vmem>>, vector<64x64xbf16>
    %cst = arith.constant dense<0.000000e+00> : vector<32x64xf32>
    %2 = tpu.matmul %0, %1, %cst {dimension_numbers = #tpu.dot_dimension_numbers<[1], [0], [0], [1], [0, 0, 1, 1], [], []>} : vector<32x64xbf16>, vector<64x64xbf16>, vector<32x64xf32> -> vector<32x64xf32>
    %c0_3 = arith.constant 0 : index
    %c0_4 = arith.constant 0 : index
    %3 = vector.load %arg3[%c0_3, %c0_4] : memref<1x64xf32, #tpu.memory_space<vmem>>, vector<1x64xf32>
    %4 = vector.broadcast %3 : vector<1x64xf32> to vector<32x64xf32>
    %5 = arith.addf %2, %4 : vector<32x64xf32>
    %c0_5 = arith.constant 0 : index
    %c0_6 = arith.constant 0 : index
    %6 = vector.load %arg4[%c0_5, %c0_6] : memref<32x64xbf16, #tpu.memory_space<vmem>>, vector<32x64xbf16>
    %7 = arith.extf %6 : vector<32x64xbf16> to vector<32x64xf32>
    %8 = arith.addf %5, %7 : vector<32x64xf32>
    %cst_7 = arith.constant 0.000000e+00 : f32
    %9 = vector.broadcast %cst_7 : f32 to vector<32x64xf32>
    %10 = arith.maximumf %8, %9 : vector<32x64xf32>
    %11 = arith.truncf %10 : vector<32x64xf32> to vector<32x64xbf16>
    %c0_8 = arith.constant 0 : index
    %c0_9 = arith.constant 0 : index
    %12 = vector.load %arg5[%c0_8, %c0_9] : memref<32x64xbf16, #tpu.memory_space<vmem>>, vector<32x64xbf16>
    tpu.vector_store %arg5[%c0_8, %c0_9], %11 {strides = array<i32>} : memref<32x64xbf16, #tpu.memory_space<vmem>>, vector<32x64xbf16>,
    return
  }
  func.func @transform_0(%arg0: i32) -> (i32, i32) {
    %c0_i32 = arith.constant 0 : i32
    %c0_i32_0 = arith.constant 0 : i32
    return %arg0, %c0_i32 : i32, i32
  }
  func.func @transform_1(%arg0: i32) -> (i32, i32) {
    %c0_i32 = arith.constant 0 : i32
    %c0_i32_0 = arith.constant 0 : i32
    %c0_i32_1 = arith.constant 0 : i32
    return %c0_i32, %c0_i32_0 : i32, i32
  }
  func.func @transform_2(%arg0: i32) -> (i32, i32) {
    %c0_i32 = arith.constant 0 : i32
    %c0_i32_0 = arith.constant 0 : i32
    %c0_i32_1 = arith.constant 0 : i32
    return %c0_i32, %c0_i32_0 : i32, i32
  }
  func.func @transform_3(%arg0: i32) -> (i32, i32) {
    %c0_i32 = arith.constant 0 : i32
    %c0_i32_0 = arith.constant 0 : i32
    return %arg0, %c0_i32 : i32, i32
  }
  func.func @transform_4(%arg0: i32) -> (i32, i32) {
    %c0_i32 = arith.constant 0 : i32
    %c0_i32_0 = arith.constant 0 : i32
    return %arg0, %c0_i32 : i32, i32
  }
}

module attributes {stable_mosaic.version = 11 : i64} {
  func.func @_matmul_epi_kernel(%arg0: i32, %arg1: memref<32x32xbf16, #tpu.memory_space<vmem>>, %arg2: memref<32x64xbf16, #tpu.memory_space<vmem>>, %arg3: memref<1x64xf32, #tpu.memory_space<vmem>>, %arg4: memref<32x64xbf16, #tpu.memory_space<vmem>>) attributes {dimension_semantics = [#tpu.dimension_semantics<parallel>], iteration_bounds = array<i64: 1>, scalar_prefetch = 0 : i64, scratch_operands = 0 : i64, tpu.core_type = #tpu.core_type<tc>, window_params = [{transform_indices = @transform_0, window_bounds = array<i64: 32, 32>}, {pipeline_mode = #tpu.pipeline_mode<synchronous>, transform_indices = @transform_1, window_bounds = array<i64: 32, 64>}, {pipeline_mode = #tpu.pipeline_mode<synchronous>, transform_indices = @transform_2, window_bounds = array<i64: 1, 64>}, {transform_indices = @transform_3, window_bounds = array<i64: 32, 64>}]} {
    %c0 = arith.constant 0 : index
    %c0_0 = arith.constant 0 : index
    %0 = vector.load %arg1[%c0, %c0_0] : memref<32x32xbf16, #tpu.memory_space<vmem>>, vector<32x32xbf16>
    %c0_1 = arith.constant 0 : index
    %c0_2 = arith.constant 0 : index
    %1 = vector.load %arg2[%c0_1, %c0_2] : memref<32x64xbf16, #tpu.memory_space<vmem>>, vector<32x64xbf16>
    %cst = arith.constant dense<0.000000e+00> : vector<32x64xf32>
    %2 = tpu.matmul %0, %1, %cst {dimension_numbers = #tpu.dot_dimension_numbers<[1], [0], [0], [1], [0, 0, 1, 1], [], []>} : vector<32x32xbf16>, vector<32x64xbf16>, vector<32x64xf32> -> vector<32x64xf32>
    %c0_3 = arith.constant 0 : index
    %c0_4 = arith.constant 0 : index
    %3 = vector.load %arg3[%c0_3, %c0_4] : memref<1x64xf32, #tpu.memory_space<vmem>>, vector<1x64xf32>
    %4 = vector.broadcast %3 : vector<1x64xf32> to vector<32x64xf32>
    %5 = arith.addf %2, %4 : vector<32x64xf32>
    %6 = arith.truncf %5 : vector<32x64xf32> to vector<32x64xbf16>
    %c0_5 = arith.constant 0 : index
    %c0_6 = arith.constant 0 : index
    %7 = vector.load %arg4[%c0_5, %c0_6] : memref<32x64xbf16, #tpu.memory_space<vmem>>, vector<32x64xbf16>
    tpu.vector_store %arg4[%c0_5, %c0_6], %6 {strides = array<i32>} : memref<32x64xbf16, #tpu.memory_space<vmem>>, vector<32x64xbf16>,
    return
  }
  func.func @transform_0(%arg0: i32) -> (i32, i32) {
    %c0_i32 = arith.constant 0 : i32
    %c0_i32_0 = arith.constant 0 : i32
    return %arg0, %c0_i32 : i32, i32
  }
  func.func @transform_1(%arg0: i32) -> (i32, i32) {
    %c0_i32 = arith.constant 0 : i32
    %c0_i32_0 = arith.constant 0 : i32
    %c0_i32_1 = arith.constant 0 : i32
    return %c0_i32, %c0_i32_0 : i32, i32
  }
  func.func @transform_2(%arg0: i32) -> (i32, i32) {
    %c0_i32 = arith.constant 0 : i32
    %c0_i32_0 = arith.constant 0 : i32
    %c0_i32_1 = arith.constant 0 : i32
    return %c0_i32, %c0_i32_0 : i32, i32
  }
  func.func @transform_3(%arg0: i32) -> (i32, i32) {
    %c0_i32 = arith.constant 0 : i32
    %c0_i32_0 = arith.constant 0 : i32
    return %arg0, %c0_i32 : i32, i32
  }
}

module attributes {stable_mosaic.version = 11 : i64} {
  func.func @_matmul_epi_kernel(%arg0: i32, %arg1: memref<32x576xbf16, #tpu.memory_space<vmem>>, %arg2: memref<576x64xbf16, #tpu.memory_space<vmem>>, %arg3: memref<1x64xf32, #tpu.memory_space<vmem>>, %arg4: memref<32x64xbf16, #tpu.memory_space<vmem>>) attributes {dimension_semantics = [#tpu.dimension_semantics<parallel>], iteration_bounds = array<i64: 1>, scalar_prefetch = 0 : i64, scratch_operands = 0 : i64, tpu.core_type = #tpu.core_type<tc>, window_params = [{transform_indices = @transform_0, window_bounds = array<i64: 32, 576>}, {pipeline_mode = #tpu.pipeline_mode<synchronous>, transform_indices = @transform_1, window_bounds = array<i64: 576, 64>}, {pipeline_mode = #tpu.pipeline_mode<synchronous>, transform_indices = @transform_2, window_bounds = array<i64: 1, 64>}, {transform_indices = @transform_3, window_bounds = array<i64: 32, 64>}]} {
    %c0 = arith.constant 0 : index
    %c0_0 = arith.constant 0 : index
    %0 = vector.load %arg1[%c0, %c0_0] : memref<32x576xbf16, #tpu.memory_space<vmem>>, vector<32x576xbf16>
    %c0_1 = arith.constant 0 : index
    %c0_2 = arith.constant 0 : index
    %1 = vector.load %arg2[%c0_1, %c0_2] : memref<576x64xbf16, #tpu.memory_space<vmem>>, vector<576x64xbf16>
    %cst = arith.constant dense<0.000000e+00> : vector<32x64xf32>
    %2 = tpu.matmul %0, %1, %cst {dimension_numbers = #tpu.dot_dimension_numbers<[1], [0], [0], [1], [0, 0, 1, 1], [], []>} : vector<32x576xbf16>, vector<576x64xbf16>, vector<32x64xf32> -> vector<32x64xf32>
    %c0_3 = arith.constant 0 : index
    %c0_4 = arith.constant 0 : index
    %3 = vector.load %arg3[%c0_3, %c0_4] : memref<1x64xf32, #tpu.memory_space<vmem>>, vector<1x64xf32>
    %4 = vector.broadcast %3 : vector<1x64xf32> to vector<32x64xf32>
    %5 = arith.addf %2, %4 : vector<32x64xf32>
    %cst_5 = arith.constant 0.000000e+00 : f32
    %6 = vector.broadcast %cst_5 : f32 to vector<32x64xf32>
    %7 = arith.maximumf %5, %6 : vector<32x64xf32>
    %8 = arith.truncf %7 : vector<32x64xf32> to vector<32x64xbf16>
    %c0_6 = arith.constant 0 : index
    %c0_7 = arith.constant 0 : index
    %9 = vector.load %arg4[%c0_6, %c0_7] : memref<32x64xbf16, #tpu.memory_space<vmem>>, vector<32x64xbf16>
    tpu.vector_store %arg4[%c0_6, %c0_7], %8 {strides = array<i32>} : memref<32x64xbf16, #tpu.memory_space<vmem>>, vector<32x64xbf16>,
    return
  }
  func.func @transform_0(%arg0: i32) -> (i32, i32) {
    %c0_i32 = arith.constant 0 : i32
    %c0_i32_0 = arith.constant 0 : i32
    return %arg0, %c0_i32 : i32, i32
  }
  func.func @transform_1(%arg0: i32) -> (i32, i32) {
    %c0_i32 = arith.constant 0 : i32
    %c0_i32_0 = arith.constant 0 : i32
    %c0_i32_1 = arith.constant 0 : i32
    return %c0_i32, %c0_i32_0 : i32, i32
  }
  func.func @transform_2(%arg0: i32) -> (i32, i32) {
    %c0_i32 = arith.constant 0 : i32
    %c0_i32_0 = arith.constant 0 : i32
    %c0_i32_1 = arith.constant 0 : i32
    return %c0_i32, %c0_i32_0 : i32, i32
  }
  func.func @transform_3(%arg0: i32) -> (i32, i32) {
    %c0_i32 = arith.constant 0 : i32
    %c0_i32_0 = arith.constant 0 : i32
    return %arg0, %c0_i32 : i32, i32
  }
}

module attributes {stable_mosaic.version = 11 : i64} {
  func.func @_pool_fc_kernel(%arg0: memref<2x16x64xbf16, #tpu.memory_space<vmem>>, %arg1: memref<64x10xf32, #tpu.memory_space<vmem>>, %arg2: memref<1x10xf32, #tpu.memory_space<vmem>>, %arg3: memref<2x10xf32, #tpu.memory_space<vmem>>) attributes {dimension_semantics = [], scalar_prefetch = 0 : i64, scratch_operands = 0 : i64, tpu.core_type = #tpu.core_type<tc>} {
    %c0 = arith.constant 0 : index
    %c0_0 = arith.constant 0 : index
    %c0_1 = arith.constant 0 : index
    %0 = vector.load %arg0[%c0, %c0_0, %c0_1] : memref<2x16x64xbf16, #tpu.memory_space<vmem>>, vector<2x16x64xbf16>
    %1 = arith.extf %0 : vector<2x16x64xbf16> to vector<2x16x64xf32>
    %cst = arith.constant dense<0.000000e+00> : vector<2x64xf32>
    %2 = vector.multi_reduction <add>, %1, %cst [1] : vector<2x16x64xf32> to vector<2x64xf32>
    %cst_2 = arith.constant 1.600000e+01 : f32
    %3 = vector.broadcast %cst_2 : f32 to vector<2x64xf32>
    %4 = arith.divf %2, %3 : vector<2x64xf32>
    %c0_3 = arith.constant 0 : index
    %c0_4 = arith.constant 0 : index
    %5 = vector.load %arg1[%c0_3, %c0_4] : memref<64x10xf32, #tpu.memory_space<vmem>>, vector<64x10xf32>
    %cst_5 = arith.constant dense<0.000000e+00> : vector<2x10xf32>
    %6 = tpu.matmul %4, %5, %cst_5 {dimension_numbers = #tpu.dot_dimension_numbers<[1], [0], [0], [1], [0, 0, 1, 1], [], []>} : vector<2x64xf32>, vector<64x10xf32>, vector<2x10xf32> -> vector<2x10xf32>
    %c0_6 = arith.constant 0 : index
    %c0_7 = arith.constant 0 : index
    %7 = vector.load %arg2[%c0_6, %c0_7] : memref<1x10xf32, #tpu.memory_space<vmem>>, vector<1x10xf32>
    %8 = vector.broadcast %7 : vector<1x10xf32> to vector<2x10xf32>
    %9 = arith.addf %6, %8 : vector<2x10xf32>
    %c0_8 = arith.constant 0 : index
    %c0_9 = arith.constant 0 : index
    %10 = vector.load %arg3[%c0_8, %c0_9] : memref<2x10xf32, #tpu.memory_space<vmem>>, vector<2x10xf32>
    tpu.vector_store %arg3[%c0_8, %c0_9], %9 {strides = array<i32>} : memref<2x10xf32, #tpu.memory_space<vmem>>, vector<2x10xf32>,
    return
  }
}

</mosaic_0001>

<bundles_post_ra>
// kernel: resnext_forward.15
= control target key start
LH: loop header
LB: loop body
LE: loop exit
PB: predicated region body
PF: predicated region fallthrough
CT: control target
= control target key end

     0   :  { %s1104_s12 = smov 0   ;;  %s1346_s0 = inlined_call_operand.vmem [shape: bf16[512,147], index: 0, kind: input, shape index: {}]   ;;  %s1347_s1 = inlined_call_operand.vmem [shape: bf16[147,16], index: 1, kind: input, shape index: {}]   ;;  %s1348_s2 = inlined_call_operand.vmem [shape: f32[1,16], index: 2, kind: input, shape index: {}]   ;;  %s1349_s3 = inlined_call_operand.vmem [shape: bf16[512,16], index: 3, kind: output, shape index: {}]  }
   0x1 LB: > { %s821_s13 = sadd.s32 4294967295, %s1081_s12   ;;  %p825_p0 = scmp.ge.s32.totalorder %s1081_s12, 1  ;;  %s1081_s12 = sphi %s1104_s12, %s13_s12  }
   0x2   : > { %p139_p1 = scmp.lt.s32.totalorder %s1081_s12, 3 }
   0x4   : > { %p140_p2 = pnand %p825_p0, %p139_p1 }
   0x5   : > { %s826_s18 = sshll.u32 (!%p140_p2), %s821_s13, 5 }
   0x6   : > { %143 = sbr.rel (%p140_p2) target bundleno = 304 (0x130), region = 32  ;;  %p165_p3 = scmp.lt.s32.totalorder (!%p140_p2), %s826_s18, 63 }
   0xb   : > { %v1053_v0 = vld [vmem:[%s1347_s1 + $0x38] sm:$0xff]  ;;  %v228_v1 = vld [vmem:[%s1347_s1 + $0x48] sm:$0x3]  ;;  %vm483_vm0 = vcmask 1040384   ;;  %vm484_vm1 = vcmask 1041408   ;;  %v1052_v3 = vld [vmem:[%s1347_s1 + $0x30] sm:$0xff] }
   0xc   : > { %v414_v2 = vunpack.c.l.b16 %v228_v1  ;;  %490 = vmatpush.bf16.msra.mxu0 %v1053_v0  ;;  %1055 = vmatpush.bf16.msra.mxu2 %v1053_v0  ;;  %v1083_v4 = vmov 65535   ;;  %s1351_s18 = smov (!%p165_p3, %s826_s18), 63  ;;  %v1051_v9 = vld [vmem:[%s1347_s1 + $0x28] sm:$0xff]  ;;  %v1054_v10 = vld [vmem:[%s1347_s1 + $0x40] sm:$0xff]  ;;  %vm434_vm2 = vcmask 154624   ;;  %v1049_v18 = vld [vmem:[%s1347_s1 + $0x18] sm:$0xff] }
   0xd   : > { %v485_v5 = vsel %vm483_vm0, 4294967295, %v1083_v4  ;;  %s1013_s23 = sshll.u32 %s1351_s18, 3  ;;  %v1050_v14 = vld [vmem:[%s1347_s1 + $0x20] sm:$0xff]  ;;  %v1048_v19 = vld [vmem:[%s1347_s1 + $0x10] sm:$0xff]  ;;  %v1047_v20 = vld [vmem:[%s1347_s1 + $0x8] sm:$0xff]  ;;  %s830_s15 = sshll.u32 %s1351_s18, 2 }
   0xe   : > { %v424_v6 = vpack.c.b16 %v414_v2, %v414_v2  ;;  %v486_v7 = vsel %vm484_vm1, %v485_v5, 0  ;;  %s1133_s28 = scalar_lea.vmem %s1346_s0, %s1013_s23  ;;  %v1046_v26 = vld [vmem:[%s1347_s1] sm:$0xff]  ;;  %s1240_s19 = scalar_lea.vmem %s1349_s3, %s830_s15  ;;  %vm732_vm3 = vcmask 125952  }
   0xf   : > { %v1014_v11 = vld [vmem:[%s1133_s28 + $0x4] sm:$0xf]  ;;  %v835_v12 = vld [vmem:[%s1133_s28 + $0x8] sm:$0xf0]  ;;  %v1032_v15 = vld [vmem:[%s1133_s28 + $0x94] sm:$0xf] }
  0x10   : > { %v488_v8 = vand.u32 %v486_v7, %v424_v6  ;;  %491 = vmatpush.bf16.msra.mxu0 %v1052_v3  ;;  %1056 = vmatpush.bf16.msra.mxu2 %v1052_v3  ;;  %v838_v13 = vor.u32 %v1014_v11, %v835_v12  ;;  %v907_v16 = vld [vmem:[%s1133_s28 + $0x98] sm:$0xf0]  ;;  %v1016_v21 = vld [vmem:[%s1133_s28 + $0x14] sm:$0xf]  ;;  %v1034_v23 = vld [vmem:[%s1133_s28 + $0xa4] sm:$0xf] }
  0x11   : > { %v910_v17 = vor.u32 %v1032_v15, %v907_v16  ;;  %v843_v22 = vld [vmem:[%s1133_s28 + $0x18] sm:$0xf0]  ;;  %v915_v24 = vld [vmem:[%s1133_s28 + $0xa8] sm:$0xf0]  ;;  %v833_v27 = vld [vmem:[%s1133_s28] sm:$0xf] }
  0x12   : > { %585 = vmatpush.bf16.msra.mxu1 %v488_v8  ;;  %1063 = vmatpush.bf16.msra.mxu3 %v488_v8  ;;  %v846_v25 = vor.u32 %v1016_v21, %v843_v22  ;;  %v1015_v28 = vld [vmem:[%s1133_s28 + $0x4] sm:$0xf0]  ;;  %v897_v29 = vld [vmem:[%s1133_s28 + $0x80] sm:$0xf]  ;;  %v918_v31 = vor.u32 %v1034_v23, %v915_v24  ;;  %v1018_v34 = vld [vmem:[%s1133_s28 + $0x24] sm:$0xf] }
  0x13   : > { %v1031_v30 = vld [vmem:[%s1133_s28 + $0x84] sm:$0xf0]  ;;  %v834_v32 = vor.u32 %v1015_v28, %v833_v27  ;;  %v851_v35 = vld [vmem:[%s1133_s28 + $0x28] sm:$0xf0]  ;;  %v1036_v36 = vld [vmem:[%s1133_s28 + $0xb4] sm:$0xf] }
  0x14   : > { %492 = vmatpush.bf16.msra.mxu0 %v1051_v9  ;;  %1057 = vmatpush.bf16.msra.mxu2 %v1051_v9  ;;  %v898_v33 = vor.u32 %v1031_v30, %v897_v29  ;;  %v923_v37 = vld [vmem:[%s1133_s28 + $0xb8] sm:$0xf0]  ;;  %v854_v38 = vor.u32 %v1018_v34, %v851_v35  ;;  %v841_v39 = vld [vmem:[%s1133_s28 + $0x10] sm:$0xf]  ;;  %v1017_v40 = vld [vmem:[%s1133_s28 + $0x14] sm:$0xf0] }
  0x15   : > { %v905_v41 = vld [vmem:[%s1133_s28 + $0x90] sm:$0xf]  ;;  %v1033_v42 = vld [vmem:[%s1133_s28 + $0x94] sm:$0xf0]  ;;  %v926_v43 = vor.u32 %v1036_v36, %v923_v37  ;;  %v842_v44 = vor.u32 %v1017_v40, %v841_v39  ;;  %v1020_v46 = vld [vmem:[%s1133_s28 + $0x34] sm:$0xf] }
  0x16   : > { %586 = vmatpush.bf16.msra.mxu1 %v1054_v10  ;;  %1064 = vmatpush.bf16.msra.mxu3 %v1054_v10  ;;  %v906_v45 = vor.u32 %v1033_v42, %v905_v41  ;;  %v859_v47 = vld [vmem:[%s1133_s28 + $0x38] sm:$0xf0]  ;;  %v1038_v48 = vld [vmem:[%s1133_s28 + $0xc4] sm:$0xf]  ;;  %v931_v49 = vld [vmem:[%s1133_s28 + $0xc8] sm:$0xf0] }
  0x17   : > { %v862_v50 = vor.u32 %v1020_v46, %v859_v47  ;;  %v849_v51 = vld [vmem:[%s1133_s28 + $0x20] sm:$0xf]  ;;  %v1019_v52 = vld [vmem:[%s1133_s28 + $0x24] sm:$0xf0]  ;;  %v934_v55 = vor.u32 %v1038_v48, %v931_v49  ;;  %v1022_v58 = vld [vmem:[%s1133_s28 + $0x44] sm:$0xf] }
  0x18   : > { %493 = vmatpush.bf16.msra.mxu0 %v1050_v14  ;;  %1058 = vmatpush.bf16.msra.mxu2 %v1050_v14  ;;  %v913_v53 = vld [vmem:[%s1133_s28 + $0xa0] sm:$0xf]  ;;  %v1035_v54 = vld [vmem:[%s1133_s28 + $0xa4] sm:$0xf0]  ;;  %v850_v56 = vor.u32 %v1019_v52, %v849_v51  ;;  %v867_v59 = vld [vmem:[%s1133_s28 + $0x48] sm:$0xf0] }
  0x19   : > { %995 = vmatmul.msk.bf16.vlgmr.msra.gmra.mxu1 %vm434_vm2, %v838_v13  ;;  %1004 = vmatmul.msk.bf16.vlgmr.msra.gmra.mxu3 %vm434_vm2, %v910_v17  ;;  %v914_v57 = vor.u32 %v1035_v54, %v913_v53  ;;  %v1040_v60 = vld [vmem:[%s1133_s28 + $0xd4] sm:$0xf]  ;;  %v939_v61 = vld [vmem:[%s1133_s28 + $0xd8] sm:$0xf0]  ;;  %v870_v62 = vor.u32 %v1022_v58, %v867_v59  ;;  %v857_v63 = vld [vmem:[%s1133_s28 + $0x30] sm:$0xf] }
  0x1a   : > { %v1021_v0 = vld [vmem:[%s1133_s28 + $0x34] sm:$0xf0]  ;;  %v921_v1 = vld [vmem:[%s1133_s28 + $0xb0] sm:$0xf]  ;;  %v942_v3 = vor.u32 %v1040_v60, %v939_v61  ;;  %v1024_v6 = vld [vmem:[%s1133_s28 + $0x54] sm:$0xf] }
  0x1b   : > { %v1037_v2 = vld [vmem:[%s1133_s28 + $0xb4] sm:$0xf0]  ;;  %v858_v4 = vor.u32 %v1021_v0, %v857_v63  ;;  %v875_v7 = vld [vmem:[%s1133_s28 + $0x58] sm:$0xf0]  ;;  %v1042_v8 = vld [vmem:[%s1133_s28 + $0xe4] sm:$0xf] }
  0x1c   : > { %494 = vmatpush.bf16.msra.mxu0 %v1049_v18  ;;  %1059 = vmatpush.bf16.msra.mxu2 %v1049_v18  ;;  %v922_v5 = vor.u32 %v1037_v2, %v921_v1  ;;  %v947_v9 = vld [vmem:[%s1133_s28 + $0xe8] sm:$0xf0]  ;;  %v878_v10 = vor.u32 %v1024_v6, %v875_v7  ;;  %v865_v11 = vld [vmem:[%s1133_s28 + $0x40] sm:$0xf]  ;;  %v1023_v12 = vld [vmem:[%s1133_s28 + $0x44] sm:$0xf0] }
  0x1d   : > { %v929_v13 = vld [vmem:[%s1133_s28 + $0xc0] sm:$0xf]  ;;  %v1039_v14 = vld [vmem:[%s1133_s28 + $0xc4] sm:$0xf0]  ;;  %v950_v15 = vor.u32 %v1042_v8, %v947_v9  ;;  %v866_v16 = vor.u32 %v1023_v12, %v865_v11  ;;  %v1026_v18 = vld [vmem:[%s1133_s28 + $0x64] sm:$0xf] }
  0x1e   : > { %v930_v17 = vor.u32 %v1039_v14, %v929_v13  ;;  %v955_v21 = vld [vmem:[%s1133_s28 + $0xf8] sm:$0xf0]  ;;  %v873_v23 = vld [vmem:[%s1133_s28 + $0x50] sm:$0xf]  ;;  %v1025_v24 = vld [vmem:[%s1133_s28 + $0x54] sm:$0xf0] }
  0x1f   : > { %v874_v28 = vor.u32 %v1025_v24, %v873_v23  ;;  %v1028_v30 = vld [vmem:[%s1133_s28 + $0x74] sm:$0xf]  ;;  %v1027_v34 = vld [vmem:[%s1133_s28 + $0x64] sm:$0xf0]  ;;  %v945_v35 = vld [vmem:[%s1133_s28 + $0xe0] sm:$0xf] }
  0x20   : > { %495 = vmatpush.bf16.msra.mxu0 %v1048_v19  ;;  %1060 = vmatpush.bf16.msra.mxu2 %v1048_v19  ;;  %v883_v19 = vld [vmem:[%s1133_s28 + $0x68] sm:$0xf0]  ;;  %v1043_v36 = vld [vmem:[%s1133_s28 + $0xe4] sm:$0xf0]  ;;  %v1030_v39 = vld [vmem:[%s1133_s28 + $0x84] sm:$0xf] }
  0x21   : > { %v886_v22 = vor.u32 %v1026_v18, %v883_v19  ;;  %v899_v40 = vld [vmem:[%s1133_s28 + $0x88] sm:$0xf0]  ;;  %v889_v42 = vld [vmem:[%s1133_s28 + $0x70] sm:$0xf]  ;;  %v1045_v46 = vld [vmem:[%s1133_s28 + $0xf4] sm:$0xf0] }
  0x22   : > { %v902_v41 = vor.u32 %v1030_v39, %v899_v40  ;;  %v1233_v51 = vld [vmem:[%s1348_s2] ss:$0 sm:$0xff] }
  0x24   : > { %496 = vmatpush.bf16.msra.mxu0 %v1047_v20  ;;  %1061 = vmatpush.bf16.msra.mxu2 %v1047_v20  ;;  %v1044_v20 = vld [vmem:[%s1133_s28 + $0xf4] sm:$0xf] }
  0x25   : > { %v958_v27 = vor.u32 %v1044_v20, %v955_v21 }
  0x28   : > { %497 = vmatpush.bf16.msra.mxu0 %v1046_v26  ;;  %1062 = vmatpush.bf16.msra.mxu2 %v1046_v26  ;;  %v1041_v26 = vld [vmem:[%s1133_s28 + $0xd4] sm:$0xf0] }
  0x29   : > { %996 = vmatmul.msk.bf16.gmra.mxu1 %vm434_vm2, %v846_v25  ;;  %1005 = vmatmul.msk.bf16.gmra.mxu3 %vm434_vm2, %v918_v31  ;;  %v937_v25 = vld [vmem:[%s1133_s28 + $0xd0] sm:$0xf]  ;;  %v891_v31 = vld [vmem:[%s1133_s28 + $0x78] sm:$0xf0] }
  0x2a   : > { %v938_v29 = vor.u32 %v1041_v26, %v937_v25 }
  0x2b   : > { %498 = vmatmul.bf16.vlgmr.msra.gmra.mxu0 %v834_v32  ;;  %538 = vmatmul.bf16.vlgmr.msra.gmra.mxu2 %v898_v33  ;;  %v894_v32 = vor.u32 %v1028_v30, %v891_v31  ;;  %v881_v33 = vld [vmem:[%s1133_s28 + $0x60] sm:$0xf] }
  0x2c   : > { %v882_v37 = vor.u32 %v1027_v34, %v881_v33 }
  0x39   : > { %997 = vmatmul.msk.bf16.gmra.mxu1 %vm434_vm2, %v854_v38  ;;  %1006 = vmatmul.msk.bf16.gmra.mxu3 %vm434_vm2, %v926_v43  ;;  %v946_v38 = vor.u32 %v1043_v36, %v945_v35  ;;  %v1029_v43 = vld [vmem:[%s1133_s28 + $0x74] sm:$0xf0] }
  0x3a   : > { %v890_v47 = vor.u32 %v1029_v43, %v889_v42 }
  0x3b   : > { %503 = vmatmul.bf16.gmra.mxu0 %v842_v44  ;;  %543 = vmatmul.bf16.gmra.mxu2 %v906_v45  ;;  %v953_v45 = vld [vmem:[%s1133_s28 + $0xf0] sm:$0xf] }
  0x3c   : > { %v954_v48 = vor.u32 %v1045_v46, %v953_v45 }
  0x49   : > { %998 = vmatmul.msk.bf16.gmra.mxu1 %vm434_vm2, %v862_v50  ;;  %1007 = vmatmul.msk.bf16.gmra.mxu3 %vm434_vm2, %v934_v55 }
  0x4b   : > { %508 = vmatmul.bf16.gmra.mxu0 %v850_v56  ;;  %548 = vmatmul.bf16.gmra.mxu2 %v914_v57 }
  0x59   : > { %999 = vmatmul.msk.bf16.gmra.mxu1 %vm434_vm2, %v870_v62  ;;  %1008 = vmatmul.msk.bf16.gmra.mxu3 %vm434_vm2, %v942_v3 }
  0x5b   : > { %513 = vmatmul.bf16.gmra.mxu0 %v858_v4  ;;  %553 = vmatmul.bf16.gmra.mxu2 %v922_v5 }
  0x69   : > { %1000 = vmatmul.msk.bf16.gmra.mxu1 %vm434_vm2, %v878_v10  ;;  %1009 = vmatmul.msk.bf16.gmra.mxu3 %vm434_vm2, %v950_v15 }
  0x6b   : > { %518 = vmatmul.bf16.gmra.mxu0 %v866_v16  ;;  %558 = vmatmul.bf16.gmra.mxu2 %v930_v17 }
  0x79   : > { %1001 = vmatmul.msk.bf16.gmra.mxu1 %vm434_vm2, %v886_v22  ;;  %1010 = vmatmul.msk.bf16.gmra.mxu3 %vm434_vm2, %v958_v27 }
  0x7b   : > { %523 = vmatmul.bf16.gmra.mxu0 %v874_v28  ;;  %563 = vmatmul.bf16.gmra.mxu2 %v938_v29 }
  0x89   : > { %1002 = vmatmul.msk.bf16.gmra.mxu1 %vm434_vm2, %v894_v32 }
  0x8b   : > { %528 = vmatmul.bf16.gmra.mxu0 %v882_v37  ;;  %568 = vmatmul.bf16.gmra.mxu2 %v946_v38 }
  0x96   : > { %v588_v44 = vpop.f32.mrf.mxu1 }
  0x99   : > { %1003 = vmatmul.msk.bf16.gmra.mxu1 %vm434_vm2, %v902_v41 }
  0x9b   : > { %533 = vmatmul.bf16.gmra.mxu0 %v890_v47  ;;  %573 = vmatmul.bf16.gmra.mxu2 %v954_v48 }
  0x9c   : > { %v633_v52 = vpop.f32.mrf.mxu3 }
  0x9e   : > { %v590_v49 = vpop.f32.mrf.mxu1 }
  0xa4   : > { %v635_v62 = vpop.f32.mrf.mxu3 }
  0xa6   : > { %v593_v50 = vpop.f32.mrf.mxu1 }
  0xa8   : > { %v499_v53 = vpop.f32.mrf.mxu0 }
  0xa9   : > { %v500_v54 = vadd.f32 %v1233_v51, %v499_v53 }
  0xab   : > { %v589_v55 = vadd.f32 %v588_v44, %v500_v54 }
  0xac   : > { %v638_v7 = vpop.f32.mrf.mxu3 }
  0xad   : > { %v668_v56 = vmax.f32 %v589_v55, 0.0 }
  0xae   : > { %v595_v57 = vpop.f32.mrf.mxu1  ;;  %v1242_v59 = vpop.f32.mrf.mxu2 }
  0xaf   : > { %v700_v58 = vpack.c.bf16 %v668_v56, %v668_v56 }
  0xb0   : > { %v501_v60 = vpop.f32.mrf.mxu0 }
  0xb1   : > { %733 = vst.msk [vmem:[%s1240_s19] sm:$0xf] %vm732_vm3, %v700_v58  ;;  %v502_v61 = vadd.f32 %v1233_v51, %v501_v60 }
  0xb3   : > { %v591_v63 = vadd.f32 %v590_v49, %v502_v61 }
  0xb4   : > { %v640_v20 = vpop.f32.mrf.mxu3 }
  0xb5   : > { %v669_v0 = vmax.f32 %v591_v63, 0.0 }
  0xb6   : > { %v598_v1 = vpop.f32.mrf.mxu1  ;;  %v1247_v3 = vpop.f32.mrf.mxu2 }
  0xb7   : > { %v701_v2 = vpack.c.bf16 %v669_v0, %v669_v0 }
  0xb8   : > { %v504_v4 = vpop.f32.mrf.mxu0 }
  0xb9   : > { %734 = vst.msk [vmem:[%s1240_s19 + $0x4] sm:$0xf] %vm732_vm3, %v701_v2  ;;  %v505_v5 = vadd.f32 %v1233_v51, %v504_v4 }
  0xbb   : > { %v594_v6 = vadd.f32 %v593_v50, %v505_v5 }
  0xbc   : > { %v643_v35 = vpop.f32.mrf.mxu3 }
  0xbd   : > { %v670_v8 = vmax.f32 %v594_v6, 0.0 }
  0xbe   : > { %v600_v9 = vpop.f32.mrf.mxu1  ;;  %v544_v11 = vpop.f32.mrf.mxu2 }
  0xbf   : > { %v702_v10 = vpack.c.bf16 %v670_v8, %v670_v8  ;;  %v545_v12 = vadd.f32 %v1233_v51, %v544_v11 }
  0xc0   : > { %v506_v13 = vpop.f32.mrf.mxu0 }
  0xc1   : > { %735 = vst.msk [vmem:[%s1240_s19 + $0x8] sm:$0xf] %vm732_vm3, %v702_v10  ;;  %v507_v14 = vadd.f32 %v1233_v51, %v506_v13  ;;  %v634_v15 = vadd.f32 %v633_v52, %v545_v12 }
  0xc3   : > { %v596_v16 = vadd.f32 %v595_v57, %v507_v14  ;;  %v686_v17 = vmax.f32 %v634_v15, 0.0 }
  0xc4   : > { %v645_v50 = vpop.f32.mrf.mxu3 }
  0xc5   : > { %v671_v18 = vmax.f32 %v596_v16, 0.0  ;;  %v718_v21 = vpack.c.bf16 %v686_v17, %v686_v17 }
  0xc6   : > { %v603_v19 = vpop.f32.mrf.mxu1  ;;  %v546_v23 = vpop.f32.mrf.mxu2 }
  0xc7   : > { %v703_v22 = vpack.c.bf16 %v671_v18, %v671_v18  ;;  %751 = vst.msk [vmem:[%s1240_s19 + $0x48] sm:$0xf] %vm732_vm3, %v718_v21  ;;  %v547_v24 = vadd.f32 %v1233_v51, %v546_v23 }
  0xc8   : > { %v509_v25 = vpop.f32.mrf.mxu0 }
  0xc9   : > { %736 = vst.msk [vmem:[%s1240_s19 + $0xc] sm:$0xf] %vm732_vm3, %v703_v22  ;;  %v510_v26 = vadd.f32 %v1233_v51, %v509_v25  ;;  %v636_v27 = vadd.f32 %v635_v62, %v547_v24 }
  0xcb   : > { %v599_v28 = vadd.f32 %v598_v1, %v510_v26  ;;  %v687_v29 = vmax.f32 %v636_v27, 0.0 }
  0xcc   : > { %v648_v2 = vpop.f32.mrf.mxu3 }
  0xcd   : > { %v672_v30 = vmax.f32 %v599_v28, 0.0  ;;  %v719_v32 = vpack.c.bf16 %v687_v29, %v687_v29 }
  0xce   : > { %v605_v31 = vpop.f32.mrf.mxu1  ;;  %v549_v34 = vpop.f32.mrf.mxu2 }
  0xcf   : > { %v704_v33 = vpack.c.bf16 %v672_v30, %v672_v30  ;;  %752 = vst.msk [vmem:[%s1240_s19 + $0x4c] sm:$0xf] %vm732_vm3, %v719_v32  ;;  %v550_v36 = vadd.f32 %v1233_v51, %v549_v34 }
  0xd0   : > { %v511_v37 = vpop.f32.mrf.mxu0 }
  0xd1   : > { %737 = vst.msk [vmem:[%s1240_s19 + $0x10] sm:$0xf] %vm732_vm3, %v704_v33  ;;  %v512_v38 = vadd.f32 %v1233_v51, %v511_v37  ;;  %v639_v39 = vadd.f32 %v638_v7, %v550_v36 }
  0xd3   : > { %v601_v40 = vadd.f32 %v600_v9, %v512_v38  ;;  %v688_v41 = vmax.f32 %v639_v39, 0.0 }
  0xd4   : > { %v650_v18 = vpop.f32.mrf.mxu3 }
  0xd5   : > { %v673_v42 = vmax.f32 %v601_v40, 0.0  ;;  %v720_v44 = vpack.c.bf16 %v688_v41, %v688_v41 }
  0xd6   : > { %v608_v43 = vpop.f32.mrf.mxu1  ;;  %v551_v46 = vpop.f32.mrf.mxu2 }
  0xd7   : > { %v705_v45 = vpack.c.bf16 %v673_v42, %v673_v42  ;;  %753 = vst.msk [vmem:[%s1240_s19 + $0x50] sm:$0xf] %vm732_vm3, %v720_v44  ;;  %v552_v47 = vadd.f32 %v1233_v51, %v551_v46 }
  0xd8   : > { %v514_v48 = vpop.f32.mrf.mxu0 }
  0xd9   : > { %738 = vst.msk [vmem:[%s1240_s19 + $0x14] sm:$0xf] %vm732_vm3, %v705_v45  ;;  %v515_v49 = vadd.f32 %v1233_v51, %v514_v48  ;;  %v641_v52 = vadd.f32 %v640_v20, %v552_v47 }
  0xdb   : > { %v604_v53 = vadd.f32 %v603_v19, %v515_v49  ;;  %v689_v54 = vmax.f32 %v641_v52, 0.0 }
  0xdc   : > { %v653_v33 = vpop.f32.mrf.mxu3 }
  0xdd   : > { %v674_v55 = vmax.f32 %v604_v53, 0.0  ;;  %v721_v57 = vpack.c.bf16 %v689_v54, %v689_v54 }
  0xde   : > { %v610_v56 = vpop.f32.mrf.mxu1  ;;  %v554_v60 = vpop.f32.mrf.mxu2 }
  0xdf   : > { %v706_v58 = vpack.c.bf16 %v674_v55, %v674_v55  ;;  %754 = vst.msk [vmem:[%s1240_s19 + $0x54] sm:$0xf] %vm732_vm3, %v721_v57  ;;  %v555_v61 = vadd.f32 %v1233_v51, %v554_v60 }
  0xe0   : > { %v516_v62 = vpop.f32.mrf.mxu0 }
  0xe1   : > { %739 = vst.msk [vmem:[%s1240_s19 + $0x18] sm:$0xf] %vm732_vm3, %v706_v58  ;;  %v517_v63 = vadd.f32 %v1233_v51, %v516_v62  ;;  %v644_v0 = vadd.f32 %v643_v35, %v555_v61 }
  0xe3   : > { %v606_v1 = vadd.f32 %v605_v31, %v517_v63  ;;  %v690_v4 = vmax.f32 %v644_v0, 0.0 }
  0xe4   : > { %v655_v48 = vpop.f32.mrf.mxu3 }
  0xe5   : > { %v675_v5 = vmax.f32 %v606_v1, 0.0  ;;  %v722_v7 = vpack.c.bf16 %v690_v4, %v690_v4 }
  0xe6   : > { %v613_v6 = vpop.f32.mrf.mxu1  ;;  %v556_v9 = vpop.f32.mrf.mxu2 }
  0xe7   : > { %v707_v8 = vpack.c.bf16 %v675_v5, %v675_v5  ;;  %755 = vst.msk [vmem:[%s1240_s19 + $0x58] sm:$0xf] %vm732_vm3, %v722_v7  ;;  %v557_v10 = vadd.f32 %v1233_v51, %v556_v9 }
  0xe8   : > { %v519_v11 = vpop.f32.mrf.mxu0 }
  0xe9   : > { %740 = vst.msk [vmem:[%s1240_s19 + $0x1c] sm:$0xf] %vm732_vm3, %v707_v8  ;;  %v520_v12 = vadd.f32 %v1233_v51, %v519_v11  ;;  %v646_v13 = vadd.f32 %v645_v50, %v557_v10 }
  0xeb   : > { %v609_v14 = vadd.f32 %v608_v43, %v520_v12  ;;  %v691_v15 = vmax.f32 %v646_v13, 0.0  ;;  %v540_v13 = vadd.f32 %v1233_v51, %v1242_v59 }
  0xec   : > { %v658_v0 = vpop.f32.mrf.mxu3 }
  0xed   : > { %v676_v16 = vmax.f32 %v609_v14, 0.0  ;;  %v723_v19 = vpack.c.bf16 %v691_v15, %v691_v15 }
  0xee   : > { %v615_v17 = vpop.f32.mrf.mxu1  ;;  %v559_v21 = vpop.f32.mrf.mxu2 }
  0xef   : > { %v708_v20 = vpack.c.bf16 %v676_v16, %v676_v16  ;;  %756 = vst.msk [vmem:[%s1240_s19 + $0x5c] sm:$0xf] %vm732_vm3, %v723_v19  ;;  %v560_v22 = vadd.f32 %v1233_v51, %v559_v21 }
  0xf0   : > { %v521_v23 = vpop.f32.mrf.mxu0 }
  0xf1   : > { %741 = vst.msk [vmem:[%s1240_s19 + $0x20] sm:$0xf] %vm732_vm3, %v708_v20  ;;  %v522_v24 = vadd.f32 %v1233_v51, %v521_v23  ;;  %v649_v25 = vadd.f32 %v648_v2, %v560_v22 }
  0xf3   : > { %v611_v26 = vadd.f32 %v610_v56, %v522_v24  ;;  %v692_v27 = vmax.f32 %v649_v25, 0.0 }
  0xf4   : > { %v660_v16 = vpop.f32.mrf.mxu3 }
  0xf5   : > { %v677_v28 = vmax.f32 %v611_v26, 0.0  ;;  %v724_v30 = vpack.c.bf16 %v692_v27, %v692_v27 }
  0xf6   : > { %v618_v29 = vpop.f32.mrf.mxu1  ;;  %v561_v32 = vpop.f32.mrf.mxu2 }
  0xf7   : > { %v709_v31 = vpack.c.bf16 %v677_v28, %v677_v28  ;;  %757 = vst.msk [vmem:[%s1240_s19 + $0x60] sm:$0xf] %vm732_vm3, %v724_v30  ;;  %v562_v34 = vadd.f32 %v1233_v51, %v561_v32  ;;  %v542_v28 = vadd.f32 %v1233_v51, %v1247_v3 }
  0xf8   : > { %v524_v35 = vpop.f32.mrf.mxu0 }
  0xf9   : > { %742 = vst.msk [vmem:[%s1240_s19 + $0x24] sm:$0xf] %vm732_vm3, %v709_v31  ;;  %v525_v36 = vadd.f32 %v1233_v51, %v524_v35  ;;  %v651_v37 = vadd.f32 %v650_v18, %v562_v34 }
  0xfb   : > { %v614_v38 = vadd.f32 %v613_v6, %v525_v36  ;;  %v693_v39 = vmax.f32 %v651_v37, 0.0 }
  0xfc   : > { %v663_v35 = vpop.f32.mrf.mxu3 }
  0xfd   : > { %v678_v40 = vmax.f32 %v614_v38, 0.0  ;;  %v725_v42 = vpack.c.bf16 %v693_v39, %v693_v39 }
  0xfe   : > { %v620_v41 = vpop.f32.mrf.mxu1  ;;  %v564_v44 = vpop.f32.mrf.mxu2 }
  0xff   : > { %v710_v43 = vpack.c.bf16 %v678_v40, %v678_v40  ;;  %758 = vst.msk [vmem:[%s1240_s19 + $0x64] sm:$0xf] %vm732_vm3, %v725_v42  ;;  %v565_v45 = vadd.f32 %v1233_v51, %v564_v44 }
 0x100   : > { %v526_v46 = vpop.f32.mrf.mxu0 }
 0x101   : > { %743 = vst.msk [vmem:[%s1240_s19 + $0x28] sm:$0xf] %vm732_vm3, %v710_v43  ;;  %v527_v47 = vadd.f32 %v1233_v51, %v526_v46  ;;  %v654_v49 = vadd.f32 %v653_v33, %v565_v45 }
 0x103   : > { %v616_v50 = vadd.f32 %v615_v17, %v527_v47  ;;  %v694_v52 = vmax.f32 %v654_v49, 0.0 }
 0x104   : > { %v665_v49 = vpop.f32.mrf.mxu3 }
 0x105   : > { %v679_v53 = vmax.f32 %v616_v50, 0.0  ;;  %v726_v55 = vpack.c.bf16 %v694_v52, %v694_v52 }
 0x106   : > { %v623_v54 = vpop.f32.mrf.mxu1  ;;  %v566_v57 = vpop.f32.mrf.mxu2 }
 0x107   : > { %v711_v56 = vpack.c.bf16 %v679_v53, %v679_v53  ;;  %759 = vst.msk [vmem:[%s1240_s19 + $0x68] sm:$0xf] %vm732_vm3, %v726_v55  ;;  %v567_v58 = vadd.f32 %v1233_v51, %v566_v57 }
 0x108   : > { %v529_v60 = vpop.f32.mrf.mxu0 }
 0x109   : > { %744 = vst.msk [vmem:[%s1240_s19 + $0x2c] sm:$0xf] %vm732_vm3, %v711_v56  ;;  %v530_v61 = vadd.f32 %v1233_v51, %v529_v60  ;;  %v656_v62 = vadd.f32 %v655_v48, %v567_v58 }
 0x10b   : > { %v619_v63 = vadd.f32 %v618_v29, %v530_v61  ;;  %v695_v1 = vmax.f32 %v656_v62, 0.0 }
 0x10d   : > { %v680_v2 = vmax.f32 %v619_v63, 0.0  ;;  %v727_v5 = vpack.c.bf16 %v695_v1, %v695_v1 }
 0x10e   : > { %v625_v4 = vpop.f32.mrf.mxu1  ;;  %v569_v7 = vpop.f32.mrf.mxu2 }
 0x10f   : > { %v712_v6 = vpack.c.bf16 %v680_v2, %v680_v2  ;;  %760 = vst.msk [vmem:[%s1240_s19 + $0x6c] sm:$0xf] %vm732_vm3, %v727_v5  ;;  %v570_v8 = vadd.f32 %v1233_v51, %v569_v7 }
 0x110   : > { %v531_v9 = vpop.f32.mrf.mxu0 }
 0x111   : > { %745 = vst.msk [vmem:[%s1240_s19 + $0x30] sm:$0xf] %vm732_vm3, %v712_v6  ;;  %v532_v10 = vadd.f32 %v1233_v51, %v531_v9  ;;  %v659_v11 = vadd.f32 %v658_v0, %v570_v8 }
 0x113   : > { %v621_v12 = vadd.f32 %v620_v41, %v532_v10  ;;  %v696_v14 = vmax.f32 %v659_v11, 0.0 }
 0x115   : > { %v681_v15 = vmax.f32 %v621_v12, 0.0  ;;  %v728_v18 = vpack.c.bf16 %v696_v14, %v696_v14 }
 0x116   : > { %v628_v17 = vpop.f32.mrf.mxu1  ;;  %v571_v21 = vpop.f32.mrf.mxu2 }
 0x117   : > { %v629_v19 = vadd.f32 %v628_v17, %v540_v13  ;;  %v713_v20 = vpack.c.bf16 %v681_v15, %v681_v15  ;;  %761 = vst.msk [vmem:[%s1240_s19 + $0x70] sm:$0xf] %vm732_vm3, %v728_v18  ;;  %v572_v23 = vadd.f32 %v1233_v51, %v571_v21 }
 0x118   : > { %v534_v24 = vpop.f32.mrf.mxu0 }
 0x119   : > { %v684_v22 = vmax.f32 %v629_v19, 0.0  ;;  %746 = vst.msk [vmem:[%s1240_s19 + $0x34] sm:$0xf] %vm732_vm3, %v713_v20  ;;  %v535_v59 = vadd.f32 %v1233_v51, %v534_v24  ;;  %v661_v26 = vadd.f32 %v660_v16, %v572_v23 }
 0x11b   : > { %v716_v25 = vpack.c.bf16 %v684_v22, %v684_v22  ;;  %v624_v27 = vadd.f32 %v623_v54, %v535_v59  ;;  %v697_v29 = vmax.f32 %v661_v26, 0.0 }
 0x11d   : > { %749 = vst.msk [vmem:[%s1240_s19 + $0x40] sm:$0xf] %vm732_vm3, %v716_v25  ;;  %v682_v30 = vmax.f32 %v624_v27, 0.0  ;;  %v729_v32 = vpack.c.bf16 %v697_v29, %v697_v29 }
 0x11e   : > { %v630_v31 = vpop.f32.mrf.mxu1  ;;  %v574_v36 = vpop.f32.mrf.mxu2 }
 0x11f   : > { %v631_v33 = vadd.f32 %v630_v31, %v542_v28  ;;  %v714_v34 = vpack.c.bf16 %v682_v30, %v682_v30  ;;  %762 = vst.msk [vmem:[%s1240_s19 + $0x74] sm:$0xf] %vm732_vm3, %v729_v32  ;;  %v575_v38 = vadd.f32 %v1233_v51, %v574_v36 }
 0x120   : > { %v536_v39 = vpop.f32.mrf.mxu0 }
 0x121   : > { %v685_v37 = vmax.f32 %v631_v33, 0.0  ;;  %747 = vst.msk [vmem:[%s1240_s19 + $0x38] sm:$0xf] %vm732_vm3, %v714_v34  ;;  %v537_v3 = vadd.f32 %v1233_v51, %v536_v39  ;;  %v664_v41 = vadd.f32 %v663_v35, %v575_v38 }
 0x123   : > { %v717_v40 = vpack.c.bf16 %v685_v37, %v685_v37  ;;  %v626_v42 = vadd.f32 %v625_v4, %v537_v3  ;;  %v698_v43 = vmax.f32 %v664_v41, 0.0 }
 0x125   : > { %750 = vst.msk [vmem:[%s1240_s19 + $0x44] sm:$0xf] %vm732_vm3, %v717_v40  ;;  %v683_v44 = vmax.f32 %v626_v42, 0.0  ;;  %v730_v45 = vpack.c.bf16 %v698_v43, %v698_v43 }
 0x126   : > { %v576_v47 = vpop.f32.mrf.mxu2 }
 0x127   : > { %v715_v46 = vpack.c.bf16 %v683_v44, %v683_v44  ;;  %763 = vst.msk [vmem:[%s1240_s19 + $0x78] sm:$0xf] %vm732_vm3, %v730_v45  ;;  %v577_v48 = vadd.f32 %v1233_v51, %v576_v47 }
 0x129   : > { %748 = vst.msk [vmem:[%s1240_s19 + $0x3c] sm:$0xf] %vm732_vm3, %v715_v46  ;;  %v666_v50 = vadd.f32 %v665_v49, %v577_v48 }
 0x12b   : > { %v699_v52 = vmax.f32 %v666_v50, 0.0 }
 0x12d   : > { %v731_v53 = vpack.c.bf16 %v699_v52, %v699_v52 }
 0x12f   : > { %764 = vst.msk [vmem:[%s1240_s19 + $0x7c] sm:$0xf] %vm732_vm3, %v731_v53 }
 0x130 PF: > { %s13_s12 = sadd.s32 1, %s1081_s12  }
 0x131   : > { %p10_p4 = scmp.ge.s32.totalorder %s13_s12, 4  }
 0x133   :  { %12 = sbr.rel (!%p10_p4) target bundleno = 1 (0x1), region = 62 }

// kernel: resnext_forward.16
= control target key start
LH: loop header
LB: loop body
LE: loop exit
PB: predicated region body
PF: predicated region fallthrough
CT: control target
= control target key end

     0   :  { %s172_s0 = inlined_call_operand.vmem [shape: bf16[40,128], index: 0, kind: input, shape index: {}]   ;;  %s173_s1 = inlined_call_operand.vmem [shape: bf16[40,128], index: 1, kind: input, shape index: {}]   ;;  %s174_s2 = inlined_call_operand.vmem [shape: bf16[40,128], index: 2, kind: input, shape index: {}]   ;;  %s175_s3 = inlined_call_operand.vmem [shape: bf16[40,128], index: 3, kind: output, shape index: {}]  }
   0x1   :  { %v79_v0 = vld [vmem:[%s172_s0] sm:$0xff]   ;;  %v112_v7 = vld [vmem:[%s172_s0 + $0x8] sm:$0xff]   ;;  %v18_v14 = vld [vmem:[%s172_s0 + $0x10] sm:$0xf] }
   0x2   :  { %v87_v1 = vld [vmem:[%s173_s1] sm:$0xff]   ;;  %v80_v3 = vunpack.c.l.bf16 %v79_v0  ;;  %v81_v4 = vunpack.c.h.bf16 %v79_v0  ;;  %v113_v8 = vld [vmem:[%s173_s1 + $0x8] sm:$0xff]   ;;  %v84_v12 = vunpack.c.l.bf16 %v112_v7  ;;  %v85_v13 = vunpack.c.h.bf16 %v112_v7  ;;  %v23_v15 = vld [vmem:[%s173_s1 + $0x10] sm:$0xf] }
   0x3   :  { %v95_v2 = vld [vmem:[%s174_s2] sm:$0xff]   ;;  %v88_v5 = vunpack.c.l.bf16 %v87_v1  ;;  %v89_v6 = vunpack.c.h.bf16 %v87_v1  ;;  %v114_v9 = vld [vmem:[%s174_s2 + $0x8] sm:$0xff]   ;;  %v92_v18 = vunpack.c.l.bf16 %v113_v8  ;;  %v93_v19 = vunpack.c.h.bf16 %v113_v8  ;;  %v48_v20 = vld [vmem:[%s174_s2 + $0x10] sm:$0xf] }
   0x4   :  { %v96_v10 = vunpack.c.l.bf16 %v95_v2  ;;  %v97_v11 = vunpack.c.h.bf16 %v95_v2  ;;  %v100_v21 = vunpack.c.l.bf16 %v114_v9  ;;  %v101_v22 = vunpack.c.h.bf16 %v114_v9 }
   0x5   :  { %v34_v16 = vmax.f32 %v80_v3, %v88_v5  ;;  %v35_v17 = vmax.f32 %v81_v4, %v89_v6  ;;  %v28_v23 = vunpack.c.l.bf16 %v18_v14  ;;  %v33_v24 = vunpack.c.l.bf16 %v23_v15 }
   0x6   :  { %v36_v27 = vmax.f32 %v84_v12, %v92_v18  ;;  %v37_v28 = vmax.f32 %v85_v13, %v93_v19  ;;  %v58_v30 = vunpack.c.l.bf16 %v48_v20 }
   0x7   :  { %v59_v25 = vmax.f32 %v34_v16, %v96_v10  ;;  %v60_v26 = vmax.f32 %v35_v17, %v97_v11  ;;  %v38_v29 = vmax.f32 %v28_v23, %v33_v24 }
   0x8   :  { %v61_v32 = vmax.f32 %v36_v27, %v100_v21  ;;  %v62_v33 = vmax.f32 %v37_v28, %v101_v22 }
   0x9   :  { %v105_v31 = vpack.c.bf16 %v60_v26, %v59_v25  ;;  %v63_v34 = vmax.f32 %v38_v29, %v58_v30 }
   0xa   :  { %v110_v35 = vpack.c.bf16 %v62_v33, %v61_v32 }
   0xb   :  { %106 = vst [vmem:[%s175_s3] sm:$0xff] %v105_v31   ;;  %v68_v36 = vpack.c.bf16 %v63_v34, %v63_v34 }
   0xc   :  { %115 = vst [vmem:[%s175_s3 + $0x8] sm:$0xff] %v110_v35  }
   0xd   :  { %73 = vst [vmem:[%s175_s3 + $0x10] sm:$0xf] %v68_v36 }

// kernel: resnext_forward.17
= control target key start
LH: loop header
LB: loop body
LE: loop exit
PB: predicated region body
PF: predicated region fallthrough
CT: control target
= control target key end

     0   :  { %s91_s0 = inlined_call_operand.vmem [shape: bf16[16,128], index: 0, kind: input, shape index: {}]   ;;  %s92_s1 = inlined_call_operand.vmem [shape: bf16[16,128], index: 1, kind: input, shape index: {}]   ;;  %s93_s2 = inlined_call_operand.vmem [shape: bf16[16,128], index: 2, kind: input, shape index: {}]   ;;  %s94_s3 = inlined_call_operand.vmem [shape: bf16[16,128], index: 3, kind: output, shape index: {}]  }
   0x1   :  { %v43_v0 = vld [vmem:[%s91_s0] sm:$0xff]  }
   0x2   :  { %v47_v1 = vld [vmem:[%s92_s1] sm:$0xff]   ;;  %v44_v3 = vunpack.c.l.bf16 %v43_v0  ;;  %v45_v4 = vunpack.c.h.bf16 %v43_v0 }
   0x3   :  { %v51_v2 = vld [vmem:[%s93_s2] sm:$0xff]   ;;  %v48_v5 = vunpack.c.l.bf16 %v47_v1  ;;  %v49_v6 = vunpack.c.h.bf16 %v47_v1 }
   0x4   :  { %v52_v7 = vunpack.c.l.bf16 %v51_v2  ;;  %v53_v8 = vunpack.c.h.bf16 %v51_v2 }
   0x5   :  { %v22_v9 = vmax.f32 %v44_v3, %v48_v5  ;;  %v23_v10 = vmax.f32 %v45_v4, %v49_v6 }
   0x7   :  { %v32_v11 = vmax.f32 %v22_v9, %v52_v7  ;;  %v33_v12 = vmax.f32 %v23_v10, %v53_v8 }
   0x9   :  { %v57_v13 = vpack.c.bf16 %v33_v12, %v32_v11 }
   0xb   :  { %58 = vst [vmem:[%s94_s3] sm:$0xff] %v57_v13  }

// kernel: resnext_forward.18
= control target key start
LH: loop header
LB: loop body
LE: loop exit
PB: predicated region body
PF: predicated region fallthrough
CT: control target
= control target key end

     0   :  { %vm83_vm0 = vcmask 130048   ;;  %vm189_vm1 = vcmask 257024   ;;  %s407_s1 = inlined_call_operand.vmem [shape: bf16[16,32], index: 1, kind: input, shape index: {}]   ;;  %s408_s0 = inlined_call_operand.vmem [shape: bf16[128,16], index: 0, kind: input, shape index: {}]   ;;  %s409_s2 = inlined_call_operand.vmem [shape: f32[1,32], index: 2, kind: input, shape index: {}]   ;;  %s410_s3 = inlined_call_operand.vmem [shape: bf16[128,32], index: 3, kind: output, shape index: {}]  }
   0x1   :  { %v262_v0 = vld [vmem:[%s407_s1] sm:$0xff]  ;;  %v256_v2 = vld [vmem:[%s408_s0 + $0x10] sm:$0xff]  ;;  %v255_v5 = vld [vmem:[%s408_s0 + $0x8] sm:$0xff] }
   0x2   :  { %v254_v1 = vld [vmem:[%s408_s0] sm:$0xff]  ;;  %115 = vmatpush.bf16.msra.mxu0 %v262_v0  ;;  %263 = vmatpush.bf16.msra.mxu1 %v262_v0  ;;  %v260_v4 = vld [vmem:[%s408_s0 + $0x30] sm:$0xff]  ;;  %v257_v6 = vld [vmem:[%s408_s0 + $0x18] sm:$0xff] }
   0x3   :  { %v258_v3 = vld [vmem:[%s408_s0 + $0x20] sm:$0xff]  ;;  %264 = vmatpush.bf16.msra.mxu2 %v262_v0  ;;  %265 = vmatpush.bf16.msra.mxu3 %v262_v0  ;;  %v259_v7 = vld [vmem:[%s408_s0 + $0x28] sm:$0xff]  ;;  %v261_v8 = vld [vmem:[%s408_s0 + $0x38] sm:$0xff] }
   0x4   :  { %v325_v9 = vld [vmem:[%s409_s2] ss:$0 sm:$0xff] }
   0x5   :  { %246 = vmatmul.msk.bf16.vlgmr.msra.gmra.mxu0 %vm83_vm0, %v254_v1  ;;  %248 = vmatmul.msk.bf16.vlgmr.msra.gmra.mxu1 %vm83_vm0, %v256_v2 }
   0x6   :  { %250 = vmatmul.msk.bf16.vlgmr.msra.gmra.mxu2 %vm83_vm0, %v258_v3  ;;  %252 = vmatmul.msk.bf16.vlgmr.msra.gmra.mxu3 %vm83_vm0, %v260_v4 }
  0x15   :  { %247 = vmatmul.msk.bf16.gmra.mxu0 %vm83_vm0, %v255_v5  ;;  %249 = vmatmul.msk.bf16.gmra.mxu1 %vm83_vm0, %v257_v6 }
  0x16   :  { %251 = vmatmul.msk.bf16.gmra.mxu2 %vm83_vm0, %v259_v7  ;;  %253 = vmatmul.msk.bf16.gmra.mxu3 %vm83_vm0, %v261_v8 }
  0x82   :  { %v117_v10 = vpop.f32.mrf.mxu0  ;;  %v127_v11 = vpop.f32.mrf.mxu1 }
  0x83   :  { %v118_v12 = vadd.f32 %v325_v9, %v117_v10  ;;  %v128_v13 = vadd.f32 %v325_v9, %v127_v11 }
  0x85   :  { %v157_v14 = vmax.f32 %v118_v12, 0.0  ;;  %v161_v15 = vmax.f32 %v128_v13, 0.0 }
  0x87   :  { %v173_v16 = vpack.c.bf16 %v157_v14, %v157_v14  ;;  %v177_v17 = vpack.c.bf16 %v161_v15, %v161_v15 }
  0x89   :  { %190 = vst.msk [vmem:[%s410_s3] sm:$0xf] %vm189_vm1, %v173_v16  ;;  %v137_v18 = vpop.f32.mrf.mxu2  ;;  %v147_v19 = vpop.f32.mrf.mxu3 }
  0x8a   :  { %194 = vst.msk [vmem:[%s410_s3 + $0x10] sm:$0xf] %vm189_vm1, %v177_v17  ;;  %v138_v20 = vadd.f32 %v325_v9, %v137_v18  ;;  %v148_v21 = vadd.f32 %v325_v9, %v147_v19  ;;  %v119_v22 = vpop.f32.mrf.mxu0  ;;  %v129_v23 = vpop.f32.mrf.mxu1 }
  0x8b   :  { %v120_v24 = vadd.f32 %v325_v9, %v119_v22  ;;  %v130_v25 = vadd.f32 %v325_v9, %v129_v23 }
  0x8c   :  { %v165_v26 = vmax.f32 %v138_v20, 0.0  ;;  %v169_v27 = vmax.f32 %v148_v21, 0.0 }
  0x8d   :  { %v158_v28 = vmax.f32 %v120_v24, 0.0  ;;  %v162_v29 = vmax.f32 %v130_v25, 0.0 }
  0x8e   :  { %v181_v30 = vpack.c.bf16 %v165_v26, %v165_v26  ;;  %v185_v31 = vpack.c.bf16 %v169_v27, %v169_v27 }
  0x8f   :  { %v174_v32 = vpack.c.bf16 %v158_v28, %v158_v28  ;;  %v178_v33 = vpack.c.bf16 %v162_v29, %v162_v29 }
  0x90   :  { %198 = vst.msk [vmem:[%s410_s3 + $0x20] sm:$0xf] %vm189_vm1, %v181_v30 }
  0x91   :  { %202 = vst.msk [vmem:[%s410_s3 + $0x30] sm:$0xf] %vm189_vm1, %v185_v31  ;;  %v139_v34 = vpop.f32.mrf.mxu2  ;;  %v149_v35 = vpop.f32.mrf.mxu3 }
  0x92   :  { %191 = vst.msk [vmem:[%s410_s3 + $0x4] sm:$0xf] %vm189_vm1, %v174_v32  ;;  %v140_v36 = vadd.f32 %v325_v9, %v139_v34  ;;  %v150_v37 = vadd.f32 %v325_v9, %v149_v35  ;;  %v122_v38 = vpop.f32.mrf.mxu0  ;;  %v132_v39 = vpop.f32.mrf.mxu1 }
  0x93   :  { %195 = vst.msk [vmem:[%s410_s3 + $0x14] sm:$0xf] %vm189_vm1, %v178_v33  ;;  %v123_v40 = vadd.f32 %v325_v9, %v122_v38  ;;  %v133_v41 = vadd.f32 %v325_v9, %v132_v39 }
  0x94   :  { %v166_v42 = vmax.f32 %v140_v36, 0.0  ;;  %v170_v43 = vmax.f32 %v150_v37, 0.0 }
  0x95   :  { %v159_v44 = vmax.f32 %v123_v40, 0.0  ;;  %v163_v45 = vmax.f32 %v133_v41, 0.0 }
  0x96   :  { %v182_v46 = vpack.c.bf16 %v166_v42, %v166_v42  ;;  %v186_v47 = vpack.c.bf16 %v170_v43, %v170_v43 }
  0x97   :  { %v175_v48 = vpack.c.bf16 %v159_v44, %v159_v44  ;;  %v179_v49 = vpack.c.bf16 %v163_v45, %v163_v45 }
  0x98   :  { %199 = vst.msk [vmem:[%s410_s3 + $0x24] sm:$0xf] %vm189_vm1, %v182_v46 }
  0x99   :  { %203 = vst.msk [vmem:[%s410_s3 + $0x34] sm:$0xf] %vm189_vm1, %v186_v47  ;;  %v142_v50 = vpop.f32.mrf.mxu2  ;;  %v152_v51 = vpop.f32.mrf.mxu3 }
  0x9a   :  { %192 = vst.msk [vmem:[%s410_s3 + $0x8] sm:$0xf] %vm189_vm1, %v175_v48  ;;  %v143_v52 = vadd.f32 %v325_v9, %v142_v50  ;;  %v153_v53 = vadd.f32 %v325_v9, %v152_v51  ;;  %v124_v54 = vpop.f32.mrf.mxu0  ;;  %v134_v55 = vpop.f32.mrf.mxu1 }
  0x9b   :  { %196 = vst.msk [vmem:[%s410_s3 + $0x18] sm:$0xf] %vm189_vm1, %v179_v49  ;;  %v125_v56 = vadd.f32 %v325_v9, %v124_v54  ;;  %v135_v57 = vadd.f32 %v325_v9, %v134_v55 }
  0x9c   :  { %v167_v58 = vmax.f32 %v143_v52, 0.0  ;;  %v171_v59 = vmax.f32 %v153_v53, 0.0 }
  0x9d   :  { %v160_v60 = vmax.f32 %v125_v56, 0.0  ;;  %v164_v61 = vmax.f32 %v135_v57, 0.0 }
  0x9e   :  { %v183_v62 = vpack.c.bf16 %v167_v58, %v167_v58  ;;  %v187_v63 = vpack.c.bf16 %v171_v59, %v171_v59 }
  0x9f   :  { %v176_v0 = vpack.c.bf16 %v160_v60, %v160_v60  ;;  %v180_v1 = vpack.c.bf16 %v164_v61, %v164_v61 }
  0xa0   :  { %200 = vst.msk [vmem:[%s410_s3 + $0x28] sm:$0xf] %vm189_vm1, %v183_v62 }
  0xa1   :  { %204 = vst.msk [vmem:[%s410_s3 + $0x38] sm:$0xf] %vm189_vm1, %v187_v63  ;;  %v144_v2 = vpop.f32.mrf.mxu2  ;;  %v154_v3 = vpop.f32.mrf.mxu3 }
  0xa2   :  { %193 = vst.msk [vmem:[%s410_s3 + $0xc] sm:$0xf] %vm189_vm1, %v176_v0  ;;  %v145_v4 = vadd.f32 %v325_v9, %v144_v2  ;;  %v155_v5 = vadd.f32 %v325_v9, %v154_v3 }
  0xa3   :  { %197 = vst.msk [vmem:[%s410_s3 + $0x1c] sm:$0xf] %vm189_vm1, %v180_v1 }
  0xa4   :  { %v168_v6 = vmax.f32 %v145_v4, 0.0  ;;  %v172_v7 = vmax.f32 %v155_v5, 0.0 }
  0xa6   :  { %v184_v8 = vpack.c.bf16 %v168_v6, %v168_v6  ;;  %v188_v10 = vpack.c.bf16 %v172_v7, %v172_v7 }
  0xa8   :  { %201 = vst.msk [vmem:[%s410_s3 + $0x2c] sm:$0xf] %vm189_vm1, %v184_v8 }
  0xa9   :  { %205 = vst.msk [vmem:[%s410_s3 + $0x3c] sm:$0xf] %vm189_vm1, %v188_v10 }

// kernel: resnext_forward.20
= control target key start
LH: loop header
LB: loop body
LE: loop exit
PB: predicated region body
PF: predicated region fallthrough
CT: control target
= control target key end

     0   :  { %vm83_vm0 = vcmask 130048   ;;  %vm173_vm1 = vcmask 257024   ;;  %s373_s1 = inlined_call_operand.vmem [shape: bf16[16,32], index: 1, kind: input, shape index: {}]   ;;  %s374_s0 = inlined_call_operand.vmem [shape: bf16[128,16], index: 0, kind: input, shape index: {}]   ;;  %s375_s2 = inlined_call_operand.vmem [shape: f32[1,32], index: 2, kind: input, shape index: {}]   ;;  %s376_s3 = inlined_call_operand.vmem [shape: bf16[128,32], index: 3, kind: output, shape index: {}]  }
   0x1   :  { %v246_v0 = vld [vmem:[%s373_s1] sm:$0xff]  ;;  %v240_v2 = vld [vmem:[%s374_s0 + $0x10] sm:$0xff]  ;;  %v239_v5 = vld [vmem:[%s374_s0 + $0x8] sm:$0xff] }
   0x2   :  { %v238_v1 = vld [vmem:[%s374_s0] sm:$0xff]  ;;  %115 = vmatpush.bf16.msra.mxu0 %v246_v0  ;;  %247 = vmatpush.bf16.msra.mxu1 %v246_v0  ;;  %v244_v4 = vld [vmem:[%s374_s0 + $0x30] sm:$0xff]  ;;  %v241_v6 = vld [vmem:[%s374_s0 + $0x18] sm:$0xff] }
   0x3   :  { %v242_v3 = vld [vmem:[%s374_s0 + $0x20] sm:$0xff]  ;;  %248 = vmatpush.bf16.msra.mxu2 %v246_v0  ;;  %249 = vmatpush.bf16.msra.mxu3 %v246_v0  ;;  %v243_v7 = vld [vmem:[%s374_s0 + $0x28] sm:$0xff]  ;;  %v245_v8 = vld [vmem:[%s374_s0 + $0x38] sm:$0xff] }
   0x4   :  { %v250_v9 = vld [vmem:[%s375_s2] ss:$0 sm:$0xff] }
   0x5   :  { %230 = vmatmul.msk.bf16.vlgmr.msra.gmra.mxu0 %vm83_vm0, %v238_v1  ;;  %232 = vmatmul.msk.bf16.vlgmr.msra.gmra.mxu1 %vm83_vm0, %v240_v2 }
   0x6   :  { %234 = vmatmul.msk.bf16.vlgmr.msra.gmra.mxu2 %vm83_vm0, %v242_v3  ;;  %236 = vmatmul.msk.bf16.vlgmr.msra.gmra.mxu3 %vm83_vm0, %v244_v4 }
  0x15   :  { %231 = vmatmul.msk.bf16.gmra.mxu0 %vm83_vm0, %v239_v5  ;;  %233 = vmatmul.msk.bf16.gmra.mxu1 %vm83_vm0, %v241_v6 }
  0x16   :  { %235 = vmatmul.msk.bf16.gmra.mxu2 %vm83_vm0, %v243_v7  ;;  %237 = vmatmul.msk.bf16.gmra.mxu3 %vm83_vm0, %v245_v8 }
  0x82   :  { %v117_v10 = vpop.f32.mrf.mxu0  ;;  %v127_v11 = vpop.f32.mrf.mxu1 }
  0x83   :  { %v118_v12 = vadd.f32 %v250_v9, %v117_v10  ;;  %v128_v13 = vadd.f32 %v250_v9, %v127_v11 }
  0x85   :  { %v157_v14 = vpack.c.bf16 %v118_v12, %v118_v12  ;;  %v161_v15 = vpack.c.bf16 %v128_v13, %v128_v13 }
  0x87   :  { %174 = vst.msk [vmem:[%s376_s3] sm:$0xf] %vm173_vm1, %v157_v14 }
  0x88   :  { %178 = vst.msk [vmem:[%s376_s3 + $0x10] sm:$0xf] %vm173_vm1, %v161_v15 }
  0x89   :  { %v137_v16 = vpop.f32.mrf.mxu2  ;;  %v147_v17 = vpop.f32.mrf.mxu3 }
  0x8a   :  { %v138_v18 = vadd.f32 %v250_v9, %v137_v16  ;;  %v148_v19 = vadd.f32 %v250_v9, %v147_v17  ;;  %v119_v20 = vpop.f32.mrf.mxu0  ;;  %v129_v21 = vpop.f32.mrf.mxu1 }
  0x8b   :  { %v120_v22 = vadd.f32 %v250_v9, %v119_v20  ;;  %v130_v23 = vadd.f32 %v250_v9, %v129_v21 }
  0x8c   :  { %v165_v24 = vpack.c.bf16 %v138_v18, %v138_v18  ;;  %v169_v25 = vpack.c.bf16 %v148_v19, %v148_v19 }
  0x8d   :  { %v158_v26 = vpack.c.bf16 %v120_v22, %v120_v22  ;;  %v162_v27 = vpack.c.bf16 %v130_v23, %v130_v23 }
  0x8e   :  { %182 = vst.msk [vmem:[%s376_s3 + $0x20] sm:$0xf] %vm173_vm1, %v165_v24 }
  0x8f   :  { %186 = vst.msk [vmem:[%s376_s3 + $0x30] sm:$0xf] %vm173_vm1, %v169_v25 }
  0x90   :  { %175 = vst.msk [vmem:[%s376_s3 + $0x4] sm:$0xf] %vm173_vm1, %v158_v26 }
  0x91   :  { %179 = vst.msk [vmem:[%s376_s3 + $0x14] sm:$0xf] %vm173_vm1, %v162_v27  ;;  %v139_v28 = vpop.f32.mrf.mxu2  ;;  %v149_v29 = vpop.f32.mrf.mxu3 }
  0x92   :  { %v140_v30 = vadd.f32 %v250_v9, %v139_v28  ;;  %v150_v31 = vadd.f32 %v250_v9, %v149_v29  ;;  %v122_v32 = vpop.f32.mrf.mxu0  ;;  %v132_v33 = vpop.f32.mrf.mxu1 }
  0x93   :  { %v123_v34 = vadd.f32 %v250_v9, %v122_v32  ;;  %v133_v35 = vadd.f32 %v250_v9, %v132_v33 }
  0x94   :  { %v166_v36 = vpack.c.bf16 %v140_v30, %v140_v30  ;;  %v170_v37 = vpack.c.bf16 %v150_v31, %v150_v31 }
  0x95   :  { %v159_v38 = vpack.c.bf16 %v123_v34, %v123_v34  ;;  %v163_v39 = vpack.c.bf16 %v133_v35, %v133_v35 }
  0x96   :  { %183 = vst.msk [vmem:[%s376_s3 + $0x24] sm:$0xf] %vm173_vm1, %v166_v36 }
  0x97   :  { %187 = vst.msk [vmem:[%s376_s3 + $0x34] sm:$0xf] %vm173_vm1, %v170_v37 }
  0x98   :  { %176 = vst.msk [vmem:[%s376_s3 + $0x8] sm:$0xf] %vm173_vm1, %v159_v38 }
  0x99   :  { %180 = vst.msk [vmem:[%s376_s3 + $0x18] sm:$0xf] %vm173_vm1, %v163_v39  ;;  %v142_v40 = vpop.f32.mrf.mxu2  ;;  %v152_v41 = vpop.f32.mrf.mxu3 }
  0x9a   :  { %v143_v42 = vadd.f32 %v250_v9, %v142_v40  ;;  %v153_v43 = vadd.f32 %v250_v9, %v152_v41  ;;  %v124_v44 = vpop.f32.mrf.mxu0  ;;  %v134_v45 = vpop.f32.mrf.mxu1 }
  0x9b   :  { %v125_v46 = vadd.f32 %v250_v9, %v124_v44  ;;  %v135_v47 = vadd.f32 %v250_v9, %v134_v45 }
  0x9c   :  { %v167_v48 = vpack.c.bf16 %v143_v42, %v143_v42  ;;  %v171_v49 = vpack.c.bf16 %v153_v43, %v153_v43 }
  0x9d   :  { %v160_v50 = vpack.c.bf16 %v125_v46, %v125_v46  ;;  %v164_v51 = vpack.c.bf16 %v135_v47, %v135_v47 }
  0x9e   :  { %184 = vst.msk [vmem:[%s376_s3 + $0x28] sm:$0xf] %vm173_vm1, %v167_v48 }
  0x9f   :  { %188 = vst.msk [vmem:[%s376_s3 + $0x38] sm:$0xf] %vm173_vm1, %v171_v49 }
  0xa0   :  { %177 = vst.msk [vmem:[%s376_s3 + $0xc] sm:$0xf] %vm173_vm1, %v160_v50 }
  0xa1   :  { %181 = vst.msk [vmem:[%s376_s3 + $0x1c] sm:$0xf] %vm173_vm1, %v164_v51  ;;  %v144_v52 = vpop.f32.mrf.mxu2  ;;  %v154_v53 = vpop.f32.mrf.mxu3 }
  0xa2   :  { %v145_v54 = vadd.f32 %v250_v9, %v144_v52  ;;  %v155_v55 = vadd.f32 %v250_v9, %v154_v53 }
  0xa4   :  { %v168_v56 = vpack.c.bf16 %v145_v54, %v145_v54  ;;  %v172_v57 = vpack.c.bf16 %v155_v55, %v155_v55 }
  0xa6   :  { %185 = vst.msk [vmem:[%s376_s3 + $0x2c] sm:$0xf] %vm173_vm1, %v168_v56 }
  0xa7   :  { %189 = vst.msk [vmem:[%s376_s3 + $0x3c] sm:$0xf] %vm173_vm1, %v172_v57 }

// kernel: resnext_forward.22
= control target key start
LH: loop header
LB: loop body
LE: loop exit
PB: predicated region body
PF: predicated region fallthrough
CT: control target
= control target key end

     0   :  { %vm91_vm0 = vcmask 261120   ;;  %vm197_vm1 = vcmask 257024   ;;  %s426_s1 = inlined_call_operand.vmem [shape: bf16[32,32], index: 1, kind: input, shape index: {}]   ;;  %s427_s0 = inlined_call_operand.vmem [shape: bf16[128,32], index: 0, kind: input, shape index: {}]   ;;  %s428_s2 = inlined_call_operand.vmem [shape: f32[1,32], index: 2, kind: input, shape index: {}]   ;;  %s429_s3 = inlined_call_operand.vmem [shape: bf16[128,32], index: 3, kind: output, shape index: {}]  }
   0x1   :  { %v275_v0 = vld [vmem:[%s426_s1 + $0x8] sm:$0xff]  ;;  %v274_v1 = vld [vmem:[%s426_s1] sm:$0xff]  ;;  %v268_v3 = vld [vmem:[%s427_s0 + $0x10] sm:$0xff] }
   0x2   :  { %122 = vmatpush.bf16.msra.mxu0 %v275_v0  ;;  %276 = vmatpush.bf16.msra.mxu1 %v275_v0  ;;  %v266_v2 = vld [vmem:[%s427_s0] sm:$0xff]  ;;  %v272_v5 = vld [vmem:[%s427_s0 + $0x30] sm:$0xff]  ;;  %v267_v6 = vld [vmem:[%s427_s0 + $0x8] sm:$0xff] }
   0x3   :  { %277 = vmatpush.bf16.msra.mxu2 %v275_v0  ;;  %278 = vmatpush.bf16.msra.mxu3 %v275_v0  ;;  %v270_v4 = vld [vmem:[%s427_s0 + $0x20] sm:$0xff]  ;;  %v269_v7 = vld [vmem:[%s427_s0 + $0x18] sm:$0xff]  ;;  %v271_v8 = vld [vmem:[%s427_s0 + $0x28] sm:$0xff] }
   0x4   :  { %v273_v9 = vld [vmem:[%s427_s0 + $0x38] sm:$0xff]  ;;  %v344_v10 = vld [vmem:[%s428_s2] ss:$0 sm:$0xff] }
   0x6   :  { %123 = vmatpush.bf16.msra.mxu0 %v274_v1  ;;  %279 = vmatpush.bf16.msra.mxu1 %v274_v1 }
   0x7   :  { %280 = vmatpush.bf16.msra.mxu2 %v274_v1  ;;  %281 = vmatpush.bf16.msra.mxu3 %v274_v1 }
   0x9   :  { %258 = vmatmul.msk.bf16.vlgmr.msra.gmra.mxu0 %vm91_vm0, %v266_v2  ;;  %260 = vmatmul.msk.bf16.vlgmr.msra.gmra.mxu1 %vm91_vm0, %v268_v3 }
   0xa   :  { %262 = vmatmul.msk.bf16.vlgmr.msra.gmra.mxu2 %vm91_vm0, %v270_v4  ;;  %264 = vmatmul.msk.bf16.vlgmr.msra.gmra.mxu3 %vm91_vm0, %v272_v5 }
  0x19   :  { %259 = vmatmul.msk.bf16.gmra.mxu0 %vm91_vm0, %v267_v6  ;;  %261 = vmatmul.msk.bf16.gmra.mxu1 %vm91_vm0, %v269_v7 }
  0x1a   :  { %263 = vmatmul.msk.bf16.gmra.mxu2 %vm91_vm0, %v271_v8  ;;  %265 = vmatmul.msk.bf16.gmra.mxu3 %vm91_vm0, %v273_v9 }
  0x86   :  { %v125_v11 = vpop.f32.mrf.mxu0  ;;  %v135_v12 = vpop.f32.mrf.mxu1 }
  0x87   :  { %v126_v13 = vadd.f32 %v344_v10, %v125_v11  ;;  %v136_v14 = vadd.f32 %v344_v10, %v135_v12 }
  0x89   :  { %v165_v15 = vmax.f32 %v126_v13, 0.0  ;;  %v169_v16 = vmax.f32 %v136_v14, 0.0 }
  0x8b   :  { %v181_v17 = vpack.c.bf16 %v165_v15, %v165_v15  ;;  %v185_v18 = vpack.c.bf16 %v169_v16, %v169_v16 }
  0x8d   :  { %198 = vst.msk [vmem:[%s429_s3] sm:$0xf] %vm197_vm1, %v181_v17  ;;  %v145_v19 = vpop.f32.mrf.mxu2  ;;  %v155_v20 = vpop.f32.mrf.mxu3 }
  0x8e   :  { %202 = vst.msk [vmem:[%s429_s3 + $0x10] sm:$0xf] %vm197_vm1, %v185_v18  ;;  %v146_v21 = vadd.f32 %v344_v10, %v145_v19  ;;  %v156_v22 = vadd.f32 %v344_v10, %v155_v20  ;;  %v127_v23 = vpop.f32.mrf.mxu0  ;;  %v137_v24 = vpop.f32.mrf.mxu1 }
  0x8f   :  { %v128_v25 = vadd.f32 %v344_v10, %v127_v23  ;;  %v138_v26 = vadd.f32 %v344_v10, %v137_v24 }
  0x90   :  { %v173_v27 = vmax.f32 %v146_v21, 0.0  ;;  %v177_v28 = vmax.f32 %v156_v22, 0.0 }
  0x91   :  { %v166_v29 = vmax.f32 %v128_v25, 0.0  ;;  %v170_v30 = vmax.f32 %v138_v26, 0.0 }
  0x92   :  { %v189_v31 = vpack.c.bf16 %v173_v27, %v173_v27  ;;  %v193_v32 = vpack.c.bf16 %v177_v28, %v177_v28 }
  0x93   :  { %v182_v33 = vpack.c.bf16 %v166_v29, %v166_v29  ;;  %v186_v34 = vpack.c.bf16 %v170_v30, %v170_v30 }
  0x94   :  { %206 = vst.msk [vmem:[%s429_s3 + $0x20] sm:$0xf] %vm197_vm1, %v189_v31 }
  0x95   :  { %210 = vst.msk [vmem:[%s429_s3 + $0x30] sm:$0xf] %vm197_vm1, %v193_v32  ;;  %v147_v35 = vpop.f32.mrf.mxu2  ;;  %v157_v36 = vpop.f32.mrf.mxu3 }
  0x96   :  { %199 = vst.msk [vmem:[%s429_s3 + $0x4] sm:$0xf] %vm197_vm1, %v182_v33  ;;  %v148_v37 = vadd.f32 %v344_v10, %v147_v35  ;;  %v158_v38 = vadd.f32 %v344_v10, %v157_v36  ;;  %v130_v39 = vpop.f32.mrf.mxu0  ;;  %v140_v40 = vpop.f32.mrf.mxu1 }
  0x97   :  { %203 = vst.msk [vmem:[%s429_s3 + $0x14] sm:$0xf] %vm197_vm1, %v186_v34  ;;  %v131_v41 = vadd.f32 %v344_v10, %v130_v39  ;;  %v141_v42 = vadd.f32 %v344_v10, %v140_v40 }
  0x98   :  { %v174_v43 = vmax.f32 %v148_v37, 0.0  ;;  %v178_v44 = vmax.f32 %v158_v38, 0.0 }
  0x99   :  { %v167_v45 = vmax.f32 %v131_v41, 0.0  ;;  %v171_v46 = vmax.f32 %v141_v42, 0.0 }
  0x9a   :  { %v190_v47 = vpack.c.bf16 %v174_v43, %v174_v43  ;;  %v194_v48 = vpack.c.bf16 %v178_v44, %v178_v44 }
  0x9b   :  { %v183_v49 = vpack.c.bf16 %v167_v45, %v167_v45  ;;  %v187_v50 = vpack.c.bf16 %v171_v46, %v171_v46 }
  0x9c   :  { %207 = vst.msk [vmem:[%s429_s3 + $0x24] sm:$0xf] %vm197_vm1, %v190_v47 }
  0x9d   :  { %211 = vst.msk [vmem:[%s429_s3 + $0x34] sm:$0xf] %vm197_vm1, %v194_v48  ;;  %v150_v51 = vpop.f32.mrf.mxu2  ;;  %v160_v52 = vpop.f32.mrf.mxu3 }
  0x9e   :  { %200 = vst.msk [vmem:[%s429_s3 + $0x8] sm:$0xf] %vm197_vm1, %v183_v49  ;;  %v151_v53 = vadd.f32 %v344_v10, %v150_v51  ;;  %v161_v54 = vadd.f32 %v344_v10, %v160_v52  ;;  %v132_v55 = vpop.f32.mrf.mxu0  ;;  %v142_v56 = vpop.f32.mrf.mxu1 }
  0x9f   :  { %204 = vst.msk [vmem:[%s429_s3 + $0x18] sm:$0xf] %vm197_vm1, %v187_v50  ;;  %v133_v57 = vadd.f32 %v344_v10, %v132_v55  ;;  %v143_v58 = vadd.f32 %v344_v10, %v142_v56 }
  0xa0   :  { %v175_v59 = vmax.f32 %v151_v53, 0.0  ;;  %v179_v60 = vmax.f32 %v161_v54, 0.0 }
  0xa1   :  { %v168_v61 = vmax.f32 %v133_v57, 0.0  ;;  %v172_v62 = vmax.f32 %v143_v58, 0.0 }
  0xa2   :  { %v191_v63 = vpack.c.bf16 %v175_v59, %v175_v59  ;;  %v195_v0 = vpack.c.bf16 %v179_v60, %v179_v60 }
  0xa3   :  { %v184_v1 = vpack.c.bf16 %v168_v61, %v168_v61  ;;  %v188_v2 = vpack.c.bf16 %v172_v62, %v172_v62 }
  0xa4   :  { %208 = vst.msk [vmem:[%s429_s3 + $0x28] sm:$0xf] %vm197_vm1, %v191_v63 }
  0xa5   :  { %212 = vst.msk [vmem:[%s429_s3 + $0x38] sm:$0xf] %vm197_vm1, %v195_v0  ;;  %v152_v3 = vpop.f32.mrf.mxu2  ;;  %v162_v4 = vpop.f32.mrf.mxu3 }
  0xa6   :  { %201 = vst.msk [vmem:[%s429_s3 + $0xc] sm:$0xf] %vm197_vm1, %v184_v1  ;;  %v153_v5 = vadd.f32 %v344_v10, %v152_v3  ;;  %v163_v6 = vadd.f32 %v344_v10, %v162_v4 }
  0xa7   :  { %205 = vst.msk [vmem:[%s429_s3 + $0x1c] sm:$0xf] %vm197_vm1, %v188_v2 }
  0xa8   :  { %v176_v7 = vmax.f32 %v153_v5, 0.0  ;;  %v180_v8 = vmax.f32 %v163_v6, 0.0 }
  0xaa   :  { %v192_v9 = vpack.c.bf16 %v176_v7, %v176_v7  ;;  %v196_v11 = vpack.c.bf16 %v180_v8, %v180_v8 }
  0xac   :  { %209 = vst.msk [vmem:[%s429_s3 + $0x2c] sm:$0xf] %vm197_vm1, %v192_v9 }
  0xad   :  { %213 = vst.msk [vmem:[%s429_s3 + $0x3c] sm:$0xf] %vm197_vm1, %v196_v11 }

// kernel: resnext_forward.21
= control target key start
LH: loop header
LB: loop body
LE: loop exit
PB: predicated region body
PF: predicated region fallthrough
CT: control target
= control target key end

     0   :  { %vm94_vm0 = vcmask 261120   ;;  %vm248_vm1 = vcmask 257024   ;;  %s545_s1 = inlined_call_operand.vmem [shape: bf16[32,32], index: 1, kind: input, shape index: {}]   ;;  %s546_s0 = inlined_call_operand.vmem [shape: bf16[128,32], index: 0, kind: input, shape index: {}]   ;;  %s547_s2 = inlined_call_operand.vmem [shape: f32[1,32], index: 2, kind: input, shape index: {}]   ;;  %s548_s3 = inlined_call_operand.vmem [shape: bf16[128,32], index: 3, kind: input, shape index: {}]   ;;  %s549_s4 = inlined_call_operand.vmem [shape: bf16[128,32], index: 4, kind: output, shape index: {}]  }
   0x1   :  { %v326_v0 = vld [vmem:[%s545_s1 + $0x8] sm:$0xff]  ;;  %v325_v1 = vld [vmem:[%s545_s1] sm:$0xff]  ;;  %v319_v3 = vld [vmem:[%s546_s0 + $0x10] sm:$0xff] }
   0x2   :  { %125 = vmatpush.bf16.msra.mxu0 %v326_v0  ;;  %366 = vmatpush.bf16.msra.mxu1 %v326_v0  ;;  %v317_v2 = vld [vmem:[%s546_s0] sm:$0xff]  ;;  %v323_v5 = vld [vmem:[%s546_s0 + $0x30] sm:$0xff]  ;;  %v318_v6 = vld [vmem:[%s546_s0 + $0x8] sm:$0xff] }
   0x3   :  { %367 = vmatpush.bf16.msra.mxu2 %v326_v0  ;;  %368 = vmatpush.bf16.msra.mxu3 %v326_v0  ;;  %v321_v4 = vld [vmem:[%s546_s0 + $0x20] sm:$0xff]  ;;  %v320_v7 = vld [vmem:[%s546_s0 + $0x18] sm:$0xff]  ;;  %v322_v8 = vld [vmem:[%s546_s0 + $0x28] sm:$0xff] }
   0x4   :  { %v324_v9 = vld [vmem:[%s546_s0 + $0x38] sm:$0xff]  ;;  %v328_v10 = vld [vmem:[%s548_s3] sm:$0xff]   ;;  %v360_v11 = vld [vmem:[%s548_s3 + $0x10] sm:$0xff]  }
   0x5   :  { %v445_v12 = vld [vmem:[%s547_s2] ss:$0 sm:$0xff]  ;;  %v329_v13 = vunpack.c.l.bf16 %v328_v10  ;;  %v337_v14 = vunpack.c.l.bf16 %v360_v11  ;;  %v364_v22 = vld [vmem:[%s548_s3 + $0x30] sm:$0xff]   ;;  %v330_v31 = vunpack.c.h.bf16 %v328_v10  ;;  %v338_v32 = vunpack.c.h.bf16 %v360_v11  ;;  %v359_v45 = vld [vmem:[%s548_s3 + $0x8] sm:$0xff]  }
   0x6   :  { %126 = vmatpush.bf16.msra.mxu0 %v325_v1  ;;  %369 = vmatpush.bf16.msra.mxu1 %v325_v1  ;;  %v362_v21 = vld [vmem:[%s548_s3 + $0x20] sm:$0xff]   ;;  %v353_v26 = vunpack.c.l.bf16 %v364_v22  ;;  %v361_v46 = vld [vmem:[%s548_s3 + $0x18] sm:$0xff]   ;;  %v354_v52 = vunpack.c.h.bf16 %v364_v22  ;;  %v333_v57 = vunpack.c.l.bf16 %v359_v45 }
   0x7   :  { %370 = vmatpush.bf16.msra.mxu2 %v325_v1  ;;  %371 = vmatpush.bf16.msra.mxu3 %v325_v1  ;;  %v345_v25 = vunpack.c.l.bf16 %v362_v21  ;;  %v346_v51 = vunpack.c.h.bf16 %v362_v21  ;;  %v341_v58 = vunpack.c.l.bf16 %v361_v46  ;;  %v342_v21 = vunpack.c.h.bf16 %v361_v46 }
   0x9   :  { %309 = vmatmul.msk.bf16.vlgmr.msra.gmra.mxu0 %vm94_vm0, %v317_v2  ;;  %311 = vmatmul.msk.bf16.vlgmr.msra.gmra.mxu1 %vm94_vm0, %v319_v3 }
   0xa   :  { %313 = vmatmul.msk.bf16.vlgmr.msra.gmra.mxu2 %vm94_vm0, %v321_v4  ;;  %315 = vmatmul.msk.bf16.vlgmr.msra.gmra.mxu3 %vm94_vm0, %v323_v5  ;;  %v363_v5 = vld [vmem:[%s548_s3 + $0x28] sm:$0xff]  }
  0x19   :  { %310 = vmatmul.msk.bf16.gmra.mxu0 %vm94_vm0, %v318_v6  ;;  %312 = vmatmul.msk.bf16.gmra.mxu1 %vm94_vm0, %v320_v7  ;;  %v365_v6 = vld [vmem:[%s548_s3 + $0x38] sm:$0xff]  }
  0x1a   :  { %314 = vmatmul.msk.bf16.gmra.mxu2 %vm94_vm0, %v322_v8  ;;  %316 = vmatmul.msk.bf16.gmra.mxu3 %vm94_vm0, %v324_v9 }
  0x86   :  { %v128_v15 = vpop.f32.mrf.mxu0  ;;  %v138_v16 = vpop.f32.mrf.mxu1 }
  0x87   :  { %v129_v17 = vadd.f32 %v445_v12, %v128_v15  ;;  %v139_v18 = vadd.f32 %v445_v12, %v138_v16  ;;  %v357_v15 = vunpack.c.l.bf16 %v365_v6 }
  0x89   :  { %v200_v19 = vadd.f32 %v329_v13, %v129_v17  ;;  %v204_v20 = vadd.f32 %v337_v14, %v139_v18  ;;  %v349_v14 = vunpack.c.l.bf16 %v363_v5 }
  0x8b   :  { %v216_v23 = vmax.f32 %v200_v19, 0.0  ;;  %v220_v24 = vmax.f32 %v204_v20, 0.0  ;;  %v334_v20 = vunpack.c.h.bf16 %v359_v45 }
  0x8d   :  { %v232_v27 = vpack.c.bf16 %v216_v23, %v216_v23  ;;  %v236_v28 = vpack.c.bf16 %v220_v24, %v220_v24  ;;  %v148_v29 = vpop.f32.mrf.mxu2  ;;  %v158_v30 = vpop.f32.mrf.mxu3 }
  0x8e   :  { %v149_v33 = vadd.f32 %v445_v12, %v148_v29  ;;  %v159_v34 = vadd.f32 %v445_v12, %v158_v30  ;;  %v130_v35 = vpop.f32.mrf.mxu0  ;;  %v140_v36 = vpop.f32.mrf.mxu1 }
  0x8f   :  { %249 = vst.msk [vmem:[%s549_s4] sm:$0xf] %vm248_vm1, %v232_v27  ;;  %v131_v37 = vadd.f32 %v445_v12, %v130_v35  ;;  %v141_v38 = vadd.f32 %v445_v12, %v140_v36 }
  0x90   :  { %253 = vst.msk [vmem:[%s549_s4 + $0x10] sm:$0xf] %vm248_vm1, %v236_v28  ;;  %v208_v39 = vadd.f32 %v345_v25, %v149_v33  ;;  %v212_v40 = vadd.f32 %v353_v26, %v159_v34 }
  0x91   :  { %v201_v41 = vadd.f32 %v330_v31, %v131_v37  ;;  %v205_v42 = vadd.f32 %v338_v32, %v141_v38  ;;  %v350_v38 = vunpack.c.h.bf16 %v363_v5 }
  0x92   :  { %v224_v43 = vmax.f32 %v208_v39, 0.0  ;;  %v228_v44 = vmax.f32 %v212_v40, 0.0  ;;  %v358_v39 = vunpack.c.h.bf16 %v365_v6 }
  0x93   :  { %v217_v47 = vmax.f32 %v201_v41, 0.0  ;;  %v221_v48 = vmax.f32 %v205_v42, 0.0 }
  0x94   :  { %v240_v49 = vpack.c.bf16 %v224_v43, %v224_v43  ;;  %v244_v50 = vpack.c.bf16 %v228_v44, %v228_v44 }
  0x95   :  { %v233_v53 = vpack.c.bf16 %v217_v47, %v217_v47  ;;  %v237_v54 = vpack.c.bf16 %v221_v48, %v221_v48  ;;  %v150_v55 = vpop.f32.mrf.mxu2  ;;  %v160_v56 = vpop.f32.mrf.mxu3 }
  0x96   :  { %257 = vst.msk [vmem:[%s549_s4 + $0x20] sm:$0xf] %vm248_vm1, %v240_v49  ;;  %v151_v59 = vadd.f32 %v445_v12, %v150_v55  ;;  %v161_v60 = vadd.f32 %v445_v12, %v160_v56  ;;  %v133_v61 = vpop.f32.mrf.mxu0  ;;  %v143_v62 = vpop.f32.mrf.mxu1 }
  0x97   :  { %261 = vst.msk [vmem:[%s549_s4 + $0x30] sm:$0xf] %vm248_vm1, %v244_v50  ;;  %v134_v63 = vadd.f32 %v445_v12, %v133_v61  ;;  %v144_v0 = vadd.f32 %v445_v12, %v143_v62 }
  0x98   :  { %250 = vst.msk [vmem:[%s549_s4 + $0x4] sm:$0xf] %vm248_vm1, %v233_v53  ;;  %v209_v1 = vadd.f32 %v346_v51, %v151_v59  ;;  %v213_v2 = vadd.f32 %v354_v52, %v161_v60 }
  0x99   :  { %254 = vst.msk [vmem:[%s549_s4 + $0x14] sm:$0xf] %vm248_vm1, %v237_v54  ;;  %v202_v3 = vadd.f32 %v333_v57, %v134_v63  ;;  %v206_v4 = vadd.f32 %v341_v58, %v144_v0 }
  0x9a   :  { %v225_v7 = vmax.f32 %v209_v1, 0.0  ;;  %v229_v8 = vmax.f32 %v213_v2, 0.0 }
  0x9b   :  { %v218_v9 = vmax.f32 %v202_v3, 0.0  ;;  %v222_v10 = vmax.f32 %v206_v4, 0.0 }
  0x9c   :  { %v241_v11 = vpack.c.bf16 %v225_v7, %v225_v7  ;;  %v245_v13 = vpack.c.bf16 %v229_v8, %v229_v8 }
  0x9d   :  { %v234_v16 = vpack.c.bf16 %v218_v9, %v218_v9  ;;  %v238_v17 = vpack.c.bf16 %v222_v10, %v222_v10  ;;  %v153_v18 = vpop.f32.mrf.mxu2  ;;  %v163_v19 = vpop.f32.mrf.mxu3 }
  0x9e   :  { %258 = vst.msk [vmem:[%s549_s4 + $0x24] sm:$0xf] %vm248_vm1, %v241_v11  ;;  %v154_v22 = vadd.f32 %v445_v12, %v153_v18  ;;  %v164_v23 = vadd.f32 %v445_v12, %v163_v19  ;;  %v135_v24 = vpop.f32.mrf.mxu0  ;;  %v145_v25 = vpop.f32.mrf.mxu1 }
  0x9f   :  { %262 = vst.msk [vmem:[%s549_s4 + $0x34] sm:$0xf] %vm248_vm1, %v245_v13  ;;  %v136_v26 = vadd.f32 %v445_v12, %v135_v24  ;;  %v146_v27 = vadd.f32 %v445_v12, %v145_v25 }
  0xa0   :  { %251 = vst.msk [vmem:[%s549_s4 + $0x8] sm:$0xf] %vm248_vm1, %v234_v16  ;;  %v210_v28 = vadd.f32 %v349_v14, %v154_v22  ;;  %v214_v29 = vadd.f32 %v357_v15, %v164_v23 }
  0xa1   :  { %255 = vst.msk [vmem:[%s549_s4 + $0x18] sm:$0xf] %vm248_vm1, %v238_v17  ;;  %v203_v30 = vadd.f32 %v334_v20, %v136_v26  ;;  %v207_v31 = vadd.f32 %v342_v21, %v146_v27 }
  0xa2   :  { %v226_v32 = vmax.f32 %v210_v28, 0.0  ;;  %v230_v33 = vmax.f32 %v214_v29, 0.0 }
  0xa3   :  { %v219_v34 = vmax.f32 %v203_v30, 0.0  ;;  %v223_v35 = vmax.f32 %v207_v31, 0.0 }
  0xa4   :  { %v242_v36 = vpack.c.bf16 %v226_v32, %v226_v32  ;;  %v246_v37 = vpack.c.bf16 %v230_v33, %v230_v33 }
  0xa5   :  { %v235_v40 = vpack.c.bf16 %v219_v34, %v219_v34  ;;  %v239_v41 = vpack.c.bf16 %v223_v35, %v223_v35  ;;  %v155_v42 = vpop.f32.mrf.mxu2  ;;  %v165_v43 = vpop.f32.mrf.mxu3 }
  0xa6   :  { %259 = vst.msk [vmem:[%s549_s4 + $0x28] sm:$0xf] %vm248_vm1, %v242_v36  ;;  %v156_v44 = vadd.f32 %v445_v12, %v155_v42  ;;  %v166_v45 = vadd.f32 %v445_v12, %v165_v43 }
  0xa7   :  { %263 = vst.msk [vmem:[%s549_s4 + $0x38] sm:$0xf] %vm248_vm1, %v246_v37 }
  0xa8   :  { %252 = vst.msk [vmem:[%s549_s4 + $0xc] sm:$0xf] %vm248_vm1, %v235_v40  ;;  %v211_v46 = vadd.f32 %v350_v38, %v156_v44  ;;  %v215_v47 = vadd.f32 %v358_v39, %v166_v45 }
  0xa9   :  { %256 = vst.msk [vmem:[%s549_s4 + $0x1c] sm:$0xf] %vm248_vm1, %v239_v41 }
  0xaa   :  { %v227_v48 = vmax.f32 %v211_v46, 0.0  ;;  %v231_v49 = vmax.f32 %v215_v47, 0.0 }
  0xac   :  { %v243_v12 = vpack.c.bf16 %v227_v48, %v227_v48  ;;  %v247_v50 = vpack.c.bf16 %v231_v49, %v231_v49 }
  0xae   :  { %260 = vst.msk [vmem:[%s549_s4 + $0x2c] sm:$0xf] %vm248_vm1, %v243_v12 }
  0xaf   :  { %264 = vst.msk [vmem:[%s549_s4 + $0x3c] sm:$0xf] %vm248_vm1, %v247_v50 }

// kernel: resnext_forward.25
= control target key start
LH: loop header
LB: loop body
LE: loop exit
PB: predicated region body
PF: predicated region fallthrough
CT: control target
= control target key end

     0   :  { %vm91_vm0 = vcmask 261120   ;;  %vm197_vm1 = vcmask 519168   ;;  %s426_s1 = inlined_call_operand.vmem [shape: bf16[32,64], index: 1, kind: input, shape index: {}]   ;;  %s427_s0 = inlined_call_operand.vmem [shape: bf16[128,32], index: 0, kind: input, shape index: {}]   ;;  %s428_s2 = inlined_call_operand.vmem [shape: f32[1,64], index: 2, kind: input, shape index: {}]   ;;  %s429_s3 = inlined_call_operand.vmem [shape: bf16[128,64], index: 3, kind: output, shape index: {}]  }
   0x1   :  { %v275_v0 = vld [vmem:[%s426_s1 + $0x8] sm:$0xff]  ;;  %v274_v1 = vld [vmem:[%s426_s1] sm:$0xff]  ;;  %v268_v3 = vld [vmem:[%s427_s0 + $0x10] sm:$0xff] }
   0x2   :  { %122 = vmatpush.bf16.msra.mxu0 %v275_v0  ;;  %276 = vmatpush.bf16.msra.mxu1 %v275_v0  ;;  %v266_v2 = vld [vmem:[%s427_s0] sm:$0xff]  ;;  %v272_v5 = vld [vmem:[%s427_s0 + $0x30] sm:$0xff]  ;;  %v267_v6 = vld [vmem:[%s427_s0 + $0x8] sm:$0xff] }
   0x3   :  { %277 = vmatpush.bf16.msra.mxu2 %v275_v0  ;;  %278 = vmatpush.bf16.msra.mxu3 %v275_v0  ;;  %v270_v4 = vld [vmem:[%s427_s0 + $0x20] sm:$0xff]  ;;  %v269_v7 = vld [vmem:[%s427_s0 + $0x18] sm:$0xff]  ;;  %v271_v8 = vld [vmem:[%s427_s0 + $0x28] sm:$0xff] }
   0x4   :  { %v273_v9 = vld [vmem:[%s427_s0 + $0x38] sm:$0xff]  ;;  %v344_v10 = vld [vmem:[%s428_s2] ss:$0 sm:$0xff] }
   0x6   :  { %123 = vmatpush.bf16.msra.mxu0 %v274_v1  ;;  %279 = vmatpush.bf16.msra.mxu1 %v274_v1 }
   0x7   :  { %280 = vmatpush.bf16.msra.mxu2 %v274_v1  ;;  %281 = vmatpush.bf16.msra.mxu3 %v274_v1 }
   0x9   :  { %258 = vmatmul.msk.bf16.vlgmr.msra.gmra.mxu0 %vm91_vm0, %v266_v2  ;;  %260 = vmatmul.msk.bf16.vlgmr.msra.gmra.mxu1 %vm91_vm0, %v268_v3 }
   0xa   :  { %262 = vmatmul.msk.bf16.vlgmr.msra.gmra.mxu2 %vm91_vm0, %v270_v4  ;;  %264 = vmatmul.msk.bf16.vlgmr.msra.gmra.mxu3 %vm91_vm0, %v272_v5 }
  0x19   :  { %259 = vmatmul.msk.bf16.gmra.mxu0 %vm91_vm0, %v267_v6  ;;  %261 = vmatmul.msk.bf16.gmra.mxu1 %vm91_vm0, %v269_v7 }
  0x1a   :  { %263 = vmatmul.msk.bf16.gmra.mxu2 %vm91_vm0, %v271_v8  ;;  %265 = vmatmul.msk.bf16.gmra.mxu3 %vm91_vm0, %v273_v9 }
  0x86   :  { %v125_v11 = vpop.f32.mrf.mxu0  ;;  %v135_v12 = vpop.f32.mrf.mxu1 }
  0x87   :  { %v126_v13 = vadd.f32 %v344_v10, %v125_v11  ;;  %v136_v14 = vadd.f32 %v344_v10, %v135_v12 }
  0x89   :  { %v165_v15 = vmax.f32 %v126_v13, 0.0  ;;  %v169_v16 = vmax.f32 %v136_v14, 0.0 }
  0x8b   :  { %v181_v17 = vpack.c.bf16 %v165_v15, %v165_v15  ;;  %v185_v18 = vpack.c.bf16 %v169_v16, %v169_v16 }
  0x8d   :  { %198 = vst.msk [vmem:[%s429_s3] sm:$0xf] %vm197_vm1, %v181_v17  ;;  %v145_v19 = vpop.f32.mrf.mxu2  ;;  %v155_v20 = vpop.f32.mrf.mxu3 }
  0x8e   :  { %202 = vst.msk [vmem:[%s429_s3 + $0x10] sm:$0xf] %vm197_vm1, %v185_v18  ;;  %v146_v21 = vadd.f32 %v344_v10, %v145_v19  ;;  %v156_v22 = vadd.f32 %v344_v10, %v155_v20  ;;  %v127_v23 = vpop.f32.mrf.mxu0  ;;  %v137_v24 = vpop.f32.mrf.mxu1 }
  0x8f   :  { %v128_v25 = vadd.f32 %v344_v10, %v127_v23  ;;  %v138_v26 = vadd.f32 %v344_v10, %v137_v24 }
  0x90   :  { %v173_v27 = vmax.f32 %v146_v21, 0.0  ;;  %v177_v28 = vmax.f32 %v156_v22, 0.0 }
  0x91   :  { %v166_v29 = vmax.f32 %v128_v25, 0.0  ;;  %v170_v30 = vmax.f32 %v138_v26, 0.0 }
  0x92   :  { %v189_v31 = vpack.c.bf16 %v173_v27, %v173_v27  ;;  %v193_v32 = vpack.c.bf16 %v177_v28, %v177_v28 }
  0x93   :  { %v182_v33 = vpack.c.bf16 %v166_v29, %v166_v29  ;;  %v186_v34 = vpack.c.bf16 %v170_v30, %v170_v30 }
  0x94   :  { %206 = vst.msk [vmem:[%s429_s3 + $0x20] sm:$0xf] %vm197_vm1, %v189_v31 }
  0x95   :  { %210 = vst.msk [vmem:[%s429_s3 + $0x30] sm:$0xf] %vm197_vm1, %v193_v32  ;;  %v147_v35 = vpop.f32.mrf.mxu2  ;;  %v157_v36 = vpop.f32.mrf.mxu3 }
  0x96   :  { %199 = vst.msk [vmem:[%s429_s3 + $0x4] sm:$0xf] %vm197_vm1, %v182_v33  ;;  %v148_v37 = vadd.f32 %v344_v10, %v147_v35  ;;  %v158_v38 = vadd.f32 %v344_v10, %v157_v36  ;;  %v130_v39 = vpop.f32.mrf.mxu0  ;;  %v140_v40 = vpop.f32.mrf.mxu1 }
  0x97   :  { %203 = vst.msk [vmem:[%s429_s3 + $0x14] sm:$0xf] %vm197_vm1, %v186_v34  ;;  %v131_v41 = vadd.f32 %v344_v10, %v130_v39  ;;  %v141_v42 = vadd.f32 %v344_v10, %v140_v40 }
  0x98   :  { %v174_v43 = vmax.f32 %v148_v37, 0.0  ;;  %v178_v44 = vmax.f32 %v158_v38, 0.0 }
  0x99   :  { %v167_v45 = vmax.f32 %v131_v41, 0.0  ;;  %v171_v46 = vmax.f32 %v141_v42, 0.0 }
  0x9a   :  { %v190_v47 = vpack.c.bf16 %v174_v43, %v174_v43  ;;  %v194_v48 = vpack.c.bf16 %v178_v44, %v178_v44 }
  0x9b   :  { %v183_v49 = vpack.c.bf16 %v167_v45, %v167_v45  ;;  %v187_v50 = vpack.c.bf16 %v171_v46, %v171_v46 }
  0x9c   :  { %207 = vst.msk [vmem:[%s429_s3 + $0x24] sm:$0xf] %vm197_vm1, %v190_v47 }
  0x9d   :  { %211 = vst.msk [vmem:[%s429_s3 + $0x34] sm:$0xf] %vm197_vm1, %v194_v48  ;;  %v150_v51 = vpop.f32.mrf.mxu2  ;;  %v160_v52 = vpop.f32.mrf.mxu3 }
  0x9e   :  { %200 = vst.msk [vmem:[%s429_s3 + $0x8] sm:$0xf] %vm197_vm1, %v183_v49  ;;  %v151_v53 = vadd.f32 %v344_v10, %v150_v51  ;;  %v161_v54 = vadd.f32 %v344_v10, %v160_v52  ;;  %v132_v55 = vpop.f32.mrf.mxu0  ;;  %v142_v56 = vpop.f32.mrf.mxu1 }
  0x9f   :  { %204 = vst.msk [vmem:[%s429_s3 + $0x18] sm:$0xf] %vm197_vm1, %v187_v50  ;;  %v133_v57 = vadd.f32 %v344_v10, %v132_v55  ;;  %v143_v58 = vadd.f32 %v344_v10, %v142_v56 }
  0xa0   :  { %v175_v59 = vmax.f32 %v151_v53, 0.0  ;;  %v179_v60 = vmax.f32 %v161_v54, 0.0 }
  0xa1   :  { %v168_v61 = vmax.f32 %v133_v57, 0.0  ;;  %v172_v62 = vmax.f32 %v143_v58, 0.0 }
  0xa2   :  { %v191_v63 = vpack.c.bf16 %v175_v59, %v175_v59  ;;  %v195_v0 = vpack.c.bf16 %v179_v60, %v179_v60 }
  0xa3   :  { %v184_v1 = vpack.c.bf16 %v168_v61, %v168_v61  ;;  %v188_v2 = vpack.c.bf16 %v172_v62, %v172_v62 }
  0xa4   :  { %208 = vst.msk [vmem:[%s429_s3 + $0x28] sm:$0xf] %vm197_vm1, %v191_v63 }
  0xa5   :  { %212 = vst.msk [vmem:[%s429_s3 + $0x38] sm:$0xf] %vm197_vm1, %v195_v0  ;;  %v152_v3 = vpop.f32.mrf.mxu2  ;;  %v162_v4 = vpop.f32.mrf.mxu3 }
  0xa6   :  { %201 = vst.msk [vmem:[%s429_s3 + $0xc] sm:$0xf] %vm197_vm1, %v184_v1  ;;  %v153_v5 = vadd.f32 %v344_v10, %v152_v3  ;;  %v163_v6 = vadd.f32 %v344_v10, %v162_v4 }
  0xa7   :  { %205 = vst.msk [vmem:[%s429_s3 + $0x1c] sm:$0xf] %vm197_vm1, %v188_v2 }
  0xa8   :  { %v176_v7 = vmax.f32 %v153_v5, 0.0  ;;  %v180_v8 = vmax.f32 %v163_v6, 0.0 }
  0xaa   :  { %v192_v9 = vpack.c.bf16 %v176_v7, %v176_v7  ;;  %v196_v11 = vpack.c.bf16 %v180_v8, %v180_v8 }
  0xac   :  { %209 = vst.msk [vmem:[%s429_s3 + $0x2c] sm:$0xf] %vm197_vm1, %v192_v9 }
  0xad   :  { %213 = vst.msk [vmem:[%s429_s3 + $0x3c] sm:$0xf] %vm197_vm1, %v196_v11 }

// kernel: resnext_forward.19
= control target key start
LH: loop header
LB: loop body
LE: loop exit
PB: predicated region body
PF: predicated region fallthrough
CT: control target
= control target key end

     0   :  { %s1838_s12 = smov 0   ;;  %s2302_s0 = inlined_call_operand.vmem [shape: bf16[2,128,32], index: 0, kind: input, shape index: {}]   ;;  %s2303_s1 = inlined_call_operand.vmem [shape: bf16[9,32,32], index: 1, kind: input, shape index: {}]   ;;  %s2304_s2 = inlined_call_operand.vmem [shape: f32[1,32], index: 2, kind: input, shape index: {}]   ;;  %s2305_s3 = inlined_call_operand.vmem [shape: bf16[2,104,32], index: 3, kind: output, shape index: {}]  }
   0x1 LB: > { %s1516_s13 = sadd.s32 4294967295, %s1816_s12   ;;  %p1520_p0 = scmp.ge.s32.totalorder %s1816_s12, 1  ;;  %s1816_s12 = sphi %s1838_s12, %s13_s12  }
   0x2   : > { %p137_p1 = scmp.lt.s32.totalorder %s1816_s12, 3 }
   0x4   : > { %p138_p2 = pnand %p1520_p0, %p137_p1 }
   0x5   : > { %p161_p3 = scmp.lt.s32.totalorder (!%p138_p2), %s1516_s13, 1 }
   0x6   : > { %141 = sbr.rel (%p138_p2) target bundleno = 409 (0x199), region = 32 }
   0xb   : > { %v1762_v0 = vld [vmem:[%s2303_s1 + $0x18] sm:$0xff]  ;;  %v1761_v1 = vld [vmem:[%s2303_s1 + $0x10] sm:$0xff]  ;;  %s2307_s13 = smov (!%p161_p3, %s1516_s13), 1  ;;  %v1760_v2 = vld [vmem:[%s2303_s1 + $0x8] sm:$0xff]  ;;  %vm230_vm0 = vsmask.f32 7424 }
   0xc   : > { %326 = vmatpush.bf16.msra.mxu0 %v1762_v0  ;;  %1794 = vmatpush.bf16.msra.mxu1 %v1762_v0  ;;  %s1753_s20 = sshll.u32 %s2307_s13, 6  ;;  %v1771_v3 = vld [vmem:[%s2303_s1 + $0x38] sm:$0xff]  ;;  %v1773_v4 = vld [vmem:[%s2303_s1 + $0x48] sm:$0xff]  ;;  %v1759_v6 = vld [vmem:[%s2303_s1] sm:$0xff]  ;;  %vm298_vm1 = vcmask 261120   ;;  %vm443_vm2 = vcmask 1046528  }
   0xd   : > { %1796 = vmatpush.bf16.msra.mxu3 %v1762_v0  ;;  %1795 = vmatpush.bf16.msra.mxu2 %v1762_v0  ;;  %s1864_s25 = scalar_lea.vmem %s2302_s0, %s1753_s20  ;;  %v1764_v5 = vld [vmem:[%s2303_s1 + $0x28] sm:$0xff]  ;;  %v1770_v10 = vld [vmem:[%s2303_s1 + $0x30] sm:$0xff]  ;;  %v1763_v26 = vld [vmem:[%s2303_s1 + $0x20] sm:$0xff]  ;;  %vm711_vm3 = vsmask.f32 6400  ;;  %vm872_vm4 = vcmask 1045504  }
   0xe   : > { %v1876_v7 = vld [vmem:[%s1864_s25] sm:$0xff]   ;;  %v1879_v8 = vld [vmem:[%s1864_s25 + $0x8] sm:$0xff]  ;;  %v1882_v9 = vld [vmem:[%s1864_s25 + $0x10] sm:$0xff]  ;;  %vm1301_vm5 = vcmask 1044480   ;;  %vm1140_vm6 = vsmask.f32 5376 }
   0xf   : > { %v232_v11 = vshrl.u32 %v1876_v7, 16  ;;  %v234_v12 = vshll.u32 %v1876_v7, 16  ;;  %v1890_v13 = vld [vmem:[%s1864_s25 + $0x18] sm:$0xff]  ;;  %v1893_v14 = vld [vmem:[%s1864_s25 + $0x28] sm:$0xff]  ;;  %v1896_v15 = vld [vmem:[%s1864_s25 + $0x30] sm:$0xff]   ;;  %v239_v16 = vshll.u32 %v1879_v8, 16 }
  0x10   : > { %327 = vmatpush.bf16.msra.mxu0 %v1761_v1  ;;  %1797 = vmatpush.bf16.msra.mxu1 %v1761_v1  ;;  %v247_v17 = vshll.u32 %v1882_v9, 16  ;;  %v251_v18 = vshrl.u32 %v1882_v9, 16  ;;  %v189_v19 = vld [vmem:[%s1864_s25 + $0x34] sm:$0x1]  ;;  %v1903_v20 = vunpack.c.l.b16 %v1896_v15  ;;  %v1906_v21 = vld [vmem:[%s1864_s25 + $0x20] sm:$0xff]  ;;  %v255_v23 = vshll.u32 %v1890_v13, 16 }
  0x11   : > { %1799 = vmatpush.bf16.msra.mxu3 %v1761_v1  ;;  %1798 = vmatpush.bf16.msra.mxu2 %v1761_v1  ;;  %v236_v22 = vrot.slane %v234_v12, 1  ;;  %v222_v24 = vunpack.c.l.b16 %v189_v19  ;;  %v271_v25 = vshll.u32 %v1893_v14, 16  ;;  %v1772_v27 = vld [vmem:[%s2303_s1 + $0x40] sm:$0xff]  ;;  %v241_v28 = vrot.slane %v239_v16, 1  ;;  %v1782_v44 = vld [vmem:[%s2303_s1 + $0x68] sm:$0xff]  ;;  %v1784_v48 = vld [vmem:[%s2303_s1 + $0x78] sm:$0xff] }
  0x12   : > { %v249_v29 = vrot.slane %v247_v17, 1  ;;  %v275_v30 = vshrl.u32 %v1893_v14, 16  ;;  %v263_v31 = vshll.u32 %v1906_v21, 16  ;;  %v257_v33 = vrot.slane %v255_v23, 1  ;;  %v1775_v49 = vld [vmem:[%s2303_s1 + $0x58] sm:$0xff]  ;;  %v1786_v53 = vld [vmem:[%s2303_s1 + $0x88] sm:$0xff] }
  0x13   : > { %v237_v32 = vor.u32 %v236_v22, %v232_v11  ;;  %v1919_v34 = vpack.c.b16 %v222_v24, %v1903_v20  ;;  %v273_v35 = vrot.slane %v271_v25, 1  ;;  %v267_v38 = vshrl.u32 %v1906_v21, 16  ;;  %v1791_v51 = vld [vmem:[%s1864_s25] sm:$0xf0]  ;;  %v1792_v52 = vld [vmem:[%s1864_s25] sm:$0xe] }
  0x14   : > { %397 = vmatpush.bf16.msrb.mxu1 %v1760_v2  ;;  %813 = vmatpush.bf16.msrb.mxu0 %v1773_v4  ;;  %v253_v36 = vor.u32 %v251_v18, %v249_v29  ;;  %v265_v37 = vrot.slane %v263_v31, 1  ;;  %v243_v50 = vshrl.u32 %v1879_v8, 16  ;;  %v259_v54 = vshrl.u32 %v1890_v13, 16  ;;  %v546_v55 = vld [vmem:[%s1864_s25 + $0x4] sm:$0xe]  ;;  %v1949_v56 = vld [vmem:[%s1864_s25 + $0x8] sm:$0xff]  }
  0x15   : > { %652 = vmatpush.bf16.msrb.mxu3 %v1771_v3  ;;  %496 = vmatpush.bf16.msrb.mxu2 %v1764_v5  ;;  %v242_v39 = vsel %vm230_vm0, %v237_v32, %v241_v28  ;;  %v277_v40 = vor.u32 %v275_v30, %v273_v35  ;;  %v279_v41 = vshll.u32 %v1919_v34, 16  ;;  %v1793_v57 = vor.u32 %v1792_v52, %v1791_v51  ;;  %v1956_v2 = vld [vmem:[%s1864_s25 + $0xc] sm:$0xff]  ;;  %s1800_s4 = smul.u32 52, %s2307_s13 }
  0x16   : > { %1556 = vmatmul.msk.bf16.vlgmr.msra.gmra.mxu0 %vm298_vm1, %v242_v39  ;;  %v258_v42 = vsel %vm230_vm0, %v253_v36, %v257_v33  ;;  %v269_v43 = vor.u32 %v267_v38, %v265_v37  ;;  %v245_v58 = vor.u32 %v243_v50, %v241_v28  ;;  %v579_v59 = vunpack.c.l.b16 %v546_v55 }
  0x17   : > { %1558 = vmatmul.msk.bf16.vlgmr.msra.gmra.mxu1 %vm298_vm1, %v258_v42  ;;  %v281_v45 = vrot.slane %v279_v41, 1  ;;  %v580_v60 = vunpack.c.l.b16 %v1949_v56  ;;  %v261_v61 = vor.u32 %v259_v54, %v257_v33  ;;  %v283_v62 = vshrl.u32 %v1919_v34, 16  ;;  %s2248_s7 = scalar_lea.vmem %s2305_s3, %s1800_s4 }
  0x18   : > { %398 = vmatpush.bf16.msrb.mxu1 %v1759_v6  ;;  %814 = vmatpush.bf16.msrb.mxu0 %v1772_v27  ;;  %v274_v46 = vsel %vm230_vm0, %v269_v43, %v273_v35  ;;  %v444_v63 = vrot.slane %v1793_v57, 1  ;;  %v445_v0 = vrot.slane %v1879_v8, 1  ;;  %v250_v1 = vsel %vm230_vm0, %v245_v58, %v249_v29  ;;  %v1972_v29 = vld [vmem:[%s1864_s25 + $0x14] sm:$0xff] }
  0x19   : > { %653 = vmatpush.bf16.msrb.mxu3 %v1770_v10  ;;  %497 = vmatpush.bf16.msrb.mxu2 %v1763_v26  ;;  %v282_v47 = vsel %vm230_vm0, %v277_v40, %v281_v45  ;;  %v593_v3 = vpack.c.b16 %v580_v60, %v579_v59  ;;  %v266_v4 = vsel %vm230_vm0, %v261_v61, %v265_v37  ;;  %v721_v12 = vshrl.u32 %v1956_v2, 16  ;;  %v1785_v59 = vld [vmem:[%s2303_s1 + $0x80] sm:$0xff] }
  0x1a   : > { %1560 = vmatmul.msk.bf16.vlgmr.msra.gmra.mxu2 %vm298_vm1, %v274_v46  ;;  %1561 = vmatmul.msk.bf16.vlgmr.msra.gmra.mxu3 %vm298_vm1, %v282_v47  ;;  %v285_v5 = vor.u32 %v283_v62, %v281_v45  ;;  %v446_v6 = vsel %vm443_vm2, %v444_v63, %v445_v0  ;;  %v724_v16 = vshll.u32 %v1956_v2, 16  ;;  %v447_v25 = vrot.slane %v1882_v9, 1  ;;  %v1781_v45 = vld [vmem:[%s2303_s1 + $0x60] sm:$0xff]  ;;  %v1783_v46 = vld [vmem:[%s2303_s1 + $0x70] sm:$0xff] }
  0x1b   : > { %v713_v10 = vshrl.u32 %v593_v3, 16  ;;  %v716_v11 = vshll.u32 %v593_v3, 16  ;;  %v723_v19 = vrot.slane %v721_v12, 1  ;;  %v600_v26 = vrot.slane %v593_v3, 1  ;;  %v2029_v3 = vld [vmem:[%s1864_s25 + $0x2c] sm:$0xff] }
  0x1c   : > { %925 = vmatpush.bf16.msra.mxu1 %v1775_v49  ;;  %1354 = vmatpush.bf16.msra.mxu0 %v1786_v53  ;;  %v726_v22 = vrot.slane %v724_v16, 2  ;;  %v601_v27 = vrot.slane %v1956_v2, 1  ;;  %v448_v30 = vsel %vm443_vm2, %v445_v0, %v447_v25  ;;  %v730_v32 = vshrl.u32 %v1972_v29, 16  ;;  %v2011_v53 = vld [vmem:[%s1864_s25 + $0x24] sm:$0xff]  ;;  %v702_v16 = vld [vmem:[%s1864_s25 + $0x38] sm:$0x3] }
  0x1d   : > { %1081 = vmatpush.bf16.msra.mxu2 %v1782_v44  ;;  %1242 = vmatpush.bf16.msra.mxu3 %v1784_v48  ;;  %v715_v17 = vrot.slane %v713_v10, 1  ;;  %v718_v18 = vrot.slane %v716_v11, 2  ;;  %v733_v33 = vshll.u32 %v1972_v29, 16  ;;  %v449_v38 = vrot.slane %v1890_v13, 1 }
  0x1e   : > { %v727_v24 = vor.u32 %v726_v22, %v723_v19  ;;  %v602_v31 = vsel %vm443_vm2, %v600_v26, %v601_v27  ;;  %v732_v35 = vrot.slane %v730_v32, 1  ;;  %v603_v39 = vrot.slane %v1972_v29, 1 }
  0x1f   : > { %v719_v23 = vor.u32 %v718_v18, %v715_v17  ;;  %v735_v36 = vrot.slane %v733_v33, 2  ;;  %v450_v41 = vsel %vm443_vm2, %v447_v25, %v449_v38  ;;  %v451_v50 = vrot.slane %v1906_v21, 1 }
  0x20   : > { %v604_v42 = vsel %vm443_vm2, %v601_v27, %v603_v39  ;;  %v748_v57 = vshrl.u32 %v2011_v53, 16  ;;  %v751_v58 = vshll.u32 %v2011_v53, 16  ;;  %1355 = vmatpush.bf16.msra.mxu0 %v1785_v59  ;;  %v607_v0 = vrot.slane %v2011_v53, 1  ;;  %v559_v27 = vld [vmem:[%s1864_s25 + $0x38] sm:$0x1] }
  0x21   : > { %v728_v28 = vsel %vm711_vm3, %v719_v23, %v727_v24  ;;  %v736_v37 = vor.u32 %v735_v36, %v732_v35  ;;  %1082 = vmatpush.bf16.msra.mxu2 %v1781_v45  ;;  %1243 = vmatpush.bf16.msra.mxu3 %v1783_v46  ;;  %v452_v54 = vsel %vm443_vm2, %v449_v38, %v451_v50  ;;  %v760_v10 = vshll.u32 %v2029_v3, 16  ;;  %v1292_v46 = vld [vmem:[%s1864_s25 + $0x8] sm:$0x8] }
  0x22   : > { %v750_v61 = vrot.slane %v748_v57, 1  ;;  %v753_v62 = vrot.slane %v751_v58, 2  ;;  %v591_v18 = vunpack.c.h.b16 %v1896_v15  ;;  %v709_v19 = vunpack.c.l.b16 %v702_v16 }
  0x23   : > { %v737_v40 = vsel %vm711_vm3, %v727_v24, %v736_v37  ;;  %v762_v12 = vrot.slane %v760_v10, 2  ;;  %v609_v22 = vrot.slane %v2029_v3, 1  ;;  %v874_v10 = vrot.slane %v1956_v2, 2 }
  0x24   : > { %v754_v63 = vor.u32 %v753_v62, %v750_v61  ;;  %v2045_v24 = vpack.c.b16 %v709_v19, %v591_v18  ;;  %vm1447_vm7 = vcmask 257024  }
  0x25   : > { %v610_v26 = vsel %vm443_vm2, %v607_v0, %v609_v22 }
  0x26   : > { %1557 = vmatmul.msk.bf16.gmra.mxu0 %vm298_vm1, %v250_v1  ;;  %v766_v15 = vshrl.u32 %v2045_v24, 16 }
  0x27   : > { %1559 = vmatmul.msk.bf16.gmra.mxu1 %vm298_vm1, %v266_v4 }
  0x2a   : > { %1590 = vmatmul.msk.bf16.vlgmr.msrb.gmra.mxu2 %vm298_vm1, %v446_v6  ;;  %1562 = vmatmul.msk.bf16.gmra.mxu3 %vm298_vm1, %v285_v5  ;;  %v757_v6 = vshrl.u32 %v2029_v3, 16 }
  0x2c   : > { %v759_v11 = vrot.slane %v757_v6, 1 }
  0x2e   : > { %v763_v17 = vor.u32 %v762_v12, %v759_v11 }
  0x30   : > { %v764_v23 = vsel %vm711_vm3, %v754_v63, %v763_v17 }
  0x36   : > { %1648 = vmatmul.msk.bf16.vlgmr.msrb.gmra.mxu0 %vm298_vm1, %v728_v28  ;;  %v592_v28 = vunpack.c.l.b16 %v559_v27 }
  0x37   : > { %1571 = vmatmul.msk.bf16.vlgmr.msrb.gmra.mxu1 %vm298_vm1, %v1876_v7  ;;  %v1987_v7 = vld [vmem:[%s1864_s25 + $0x1c] sm:$0xff] }
  0x38   : > { %v739_v43 = vshrl.u32 %v1987_v7, 16  ;;  %v742_v44 = vshll.u32 %v1987_v7, 16  ;;  %v605_v51 = vrot.slane %v1987_v7, 1  ;;  %v599_v32 = vpack.c.b16 %v592_v28, %v591_v18  ;;  %v2126_v28 = vld [vmem:[%s1864_s25 + $0x20] sm:$0xff] }
  0x3a   : > { %1591 = vmatmul.msk.bf16.gmra.mxu2 %vm298_vm1, %v448_v30  ;;  %1629 = vmatmul.msk.bf16.vlgmr.msrb.gmra.mxu3 %vm298_vm1, %v602_v31  ;;  %v741_v47 = vrot.slane %v739_v43, 1  ;;  %v744_v48 = vrot.slane %v742_v44, 2  ;;  %v606_v55 = vsel %vm443_vm2, %v603_v39, %v605_v51  ;;  %v608_v5 = vsel %vm443_vm2, %v605_v51, %v607_v0 }
  0x3b   : > { %v768_v30 = vrot.slane %v766_v15, 1  ;;  %v611_v35 = vrot.slane %v599_v32, 1  ;;  %v1009_v39 = vunpack.c.h.b16 %v1949_v56 }
  0x3c   : > { %v745_v49 = vor.u32 %v744_v48, %v741_v47  ;;  %v1299_v48 = vunpack.c.l.b16 %v1292_v46 }
  0x3d   : > { %v612_v36 = vsel %vm443_vm2, %v609_v22, %v611_v35 }
  0x3e   : > { %v746_v52 = vsel %vm711_vm3, %v736_v37, %v745_v49  ;;  %v755_v1 = vsel %vm711_vm3, %v745_v49, %v754_v63  ;;  %v975_v37 = vld [vmem:[%s1864_s25 + $0x8] sm:$0xc] }
  0x3f   : > { %v1008_v38 = vunpack.c.l.b16 %v975_v37 }
  0x46   : > { %1649 = vmatmul.msk.bf16.gmra.mxu0 %vm298_vm1, %v737_v40  ;;  %v2067_v40 = vld [vmem:[%s1864_s25 + $0x10] sm:$0xff] }
  0x47   : > { %1572 = vmatmul.msk.bf16.gmra.mxu1 %vm298_vm1, %v1879_v8  ;;  %v1774_v8 = vld [vmem:[%s2303_s1 + $0x50] sm:$0xff]  ;;  %v1030_v43 = vrot.slane %v2067_v40, 2 }
  0x48   : > { %926 = vmatpush.bf16.msra.mxu1 %v1774_v8  ;;  %v863_v8 = vld [vmem:[%s1864_s25 + $0x4] sm:$0xc] }
  0x49   : > { %v870_v49 = vunpack.c.l.b16 %v863_v8  ;;  %v1168_v8 = vshrl.u32 %v2126_v28, 16 }
  0x4a   : > { %1592 = vmatmul.msk.bf16.gmra.mxu2 %vm298_vm1, %v450_v41  ;;  %1630 = vmatmul.msk.bf16.gmra.mxu3 %vm298_vm1, %v604_v42  ;;  %v1022_v41 = vpack.c.b16 %v1009_v39, %v1008_v38 }
  0x4b   : > { %v871_v59 = vpack.c.b16 %v580_v60, %v870_v49 }
  0x4c   : > { %v1029_v42 = vrot.slane %v1022_v41, 2 }
  0x4d   : > { %v873_v6 = vrot.slane %v871_v59, 2 }
  0x4e   : > { %v1031_v47 = vsel %vm872_vm4, %v1029_v42, %v1030_v43 }
  0x4f   : > { %v875_v18 = vsel %vm872_vm4, %v873_v6, %v874_v10 }
  0x56   : > { %1650 = vmatmul.msk.bf16.gmra.mxu0 %vm298_vm1, %v746_v52  ;;  %v1150_v52 = vshrl.u32 %v2067_v40, 16 }
  0x57   : > { %1573 = vmatmul.msk.bf16.gmra.mxu1 %vm298_vm1, %v1882_v9  ;;  %v453_v9 = vrot.slane %v1893_v14, 1 }
  0x58   : > { %v1152_v0 = vrot.slane %v1150_v52, 2  ;;  %v2144_v52 = vld [vmem:[%s1864_s25 + $0x28] sm:$0xff] }
  0x59   : > { %v454_v4 = vsel %vm443_vm2, %v451_v50, %v453_v9  ;;  %v1142_v50 = vshrl.u32 %v1022_v41, 16 }
  0x5a   : > { %1593 = vmatmul.msk.bf16.gmra.mxu2 %vm298_vm1, %v452_v54  ;;  %1631 = vmatmul.msk.bf16.gmra.mxu3 %vm298_vm1, %v606_v55  ;;  %v1153_v54 = vshll.u32 %v2067_v40, 16  ;;  %v1300_v55 = vpack.c.b16 %v1009_v39, %v1299_v48 }
  0x5b   : > { %v1144_v62 = vrot.slane %v1142_v50, 2 }
  0x66   : > { %1651 = vmatmul.msk.bf16.gmra.mxu0 %vm298_vm1, %v755_v1  ;;  %v1155_v1 = vrot.slane %v1153_v54, 3 }
  0x67   : > { %1574 = vmatmul.msk.bf16.gmra.mxu1 %vm298_vm1, %v1890_v13  ;;  %v455_v13 = vrot.slane %v1919_v34, 1  ;;  %v769_v34 = vshll.u32 %v2045_v24, 16 }
  0x68   : > { %v1156_v60 = vor.u32 %v1155_v1, %v1152_v0  ;;  %v1036_v0 = vrot.slane %v2144_v52, 2 }
  0x69   : > { %v456_v25 = vsel %vm443_vm2, %v453_v9, %v455_v13  ;;  %v771_v31 = vrot.slane %v769_v34, 2  ;;  %v2096_v9 = vld [vmem:[%s1864_s25 + $0x18] sm:$0xff] }
  0x6a   : > { %1594 = vmatmul.msk.bf16.gmra.mxu2 %vm298_vm1, %v454_v4  ;;  %1632 = vmatmul.msk.bf16.gmra.mxu3 %vm298_vm1, %v608_v5  ;;  %v1302_v4 = vrot.slane %v1300_v55, 3  ;;  %v1303_v5 = vrot.slane %v2067_v40, 3  ;;  %v1032_v11 = vrot.slane %v2096_v9, 2  ;;  %v1305_v32 = vrot.slane %v2096_v9, 3 }
  0x6b   : > { %v772_v33 = vor.u32 %v771_v31, %v768_v30  ;;  %v1170_v55 = vrot.slane %v1168_v8, 2 }
  0x6c   : > { %v1304_v16 = vsel %vm1301_vm5, %v1302_v4, %v1303_v5  ;;  %v1033_v2 = vsel %vm872_vm4, %v1030_v43, %v1032_v11  ;;  %v1306_v37 = vsel %vm1301_vm5, %v1303_v5, %v1305_v32 }
  0x76   : > { %1652 = vmatmul.msk.bf16.gmra.mxu0 %vm298_vm1, %v764_v23 }
  0x77   : > { %1575 = vmatmul.msk.bf16.gmra.mxu1 %vm298_vm1, %v1906_v21  ;;  %v773_v21 = vsel %vm711_vm3, %v763_v17, %v772_v33 }
  0x7a   : > { %1595 = vmatmul.msk.bf16.gmra.mxu2 %vm298_vm1, %v456_v25  ;;  %1633 = vmatmul.msk.bf16.gmra.mxu3 %vm298_vm1, %v610_v26  ;;  %v1159_v25 = vshrl.u32 %v2096_v9, 16  ;;  %v1162_v26 = vshll.u32 %v2096_v9, 16 }
  0x7c   : > { %v1161_v30 = vrot.slane %v1159_v25, 2  ;;  %v1164_v31 = vrot.slane %v1162_v26, 3  ;;  %v1180_v25 = vshll.u32 %v2144_v52, 16 }
  0x86   : > { %1653 = vmatmul.msk.bf16.gmra.mxu0 %vm298_vm1, %v773_v21 }
  0x87   : > { %1576 = vmatmul.msk.bf16.gmra.mxu1 %vm298_vm1, %v1893_v14  ;;  %v363_v14 = vpack.c.b16 %v1903_v20, %v1903_v20  ;;  %v1145_v20 = vshll.u32 %v1022_v41, 16 }
  0x89   : > { %v1147_v63 = vrot.slane %v1145_v20, 3 }
  0x8a   : > { %1596 = vmatmul.msk.bf16.gmra.mxu2 %vm298_vm1, %v455_v13  ;;  %1634 = vmatmul.msk.bf16.gmra.mxu3 %vm298_vm1, %v612_v36  ;;  %v1165_v36 = vor.u32 %v1164_v31, %v1161_v30 }
  0x8b   : > { %v1148_v56 = vor.u32 %v1147_v63, %v1144_v62  ;;  %v1307_v62 = vrot.slane %v2126_v28, 3  ;;  %v878_v63 = vrot.slane %v1987_v7, 2 }
  0x8d   : > { %v1157_v22 = vsel %vm1140_vm6, %v1148_v56, %v1156_v60  ;;  %v1308_v5 = vsel %vm1301_vm5, %v1305_v32, %v1307_v62  ;;  %v2166_v32 = vld [vmem:[%s1864_s25 + $0x30] sm:$0xff] }
  0x93   : > { %v2070_v44 = vpop.f32.mrf.mxu0 }
  0x94   : > { %v2074_v45 = vpop.f32.mrf.mxu1 }
  0x96   : > { %1654 = vmatmul.msk.bf16.gmra.mxu0 %vm298_vm1, %v772_v33  ;;  %v876_v33 = vrot.slane %v1972_v29, 2  ;;  %v1166_v29 = vsel %vm1140_vm6, %v1156_v60, %v1165_v36 }
  0x97   : > { %1577 = vmatmul.msk.bf16.gmra.mxu1 %vm298_vm1, %v363_v14 }
  0x98   : > { %v877_v39 = vsel %vm872_vm4, %v874_v10, %v876_v33 }
  0x9a   : > { %1706 = vmatmul.msk.bf16.vlgmr.msra.gmra.mxu2 %vm298_vm1, %v1031_v47  ;;  %1635 = vmatmul.msk.bf16.gmra.mxu3 %vm298_vm1, %v611_v35  ;;  %v1034_v35 = vrot.slane %v2126_v28, 2  ;;  %v1171_v47 = vshll.u32 %v2126_v28, 16 }
  0x9b   : > { %v2083_v51 = vpop.f32.mrf.mxu0 }
  0x9c   : > { %v2087_v57 = vpop.f32.mrf.mxu1  ;;  %v1035_v43 = vsel %vm872_vm4, %v1032_v11, %v1034_v35  ;;  %v1173_v59 = vrot.slane %v1171_v47, 3  ;;  %v1037_v7 = vsel %vm872_vm4, %v1034_v35, %v1036_v0 }
  0x9d   : > { %v2089_v58 = vpop.f32.mrf.mxu2  ;;  %v2093_v61 = vpop.f32.mrf.mxu3 }
  0x9e   : > { %v1174_v4 = vor.u32 %v1173_v59, %v1170_v55  ;;  %v1189_v55 = vshll.u32 %v2166_v32, 16 }
  0xa3   : > { %v2101_v12 = vpop.f32.mrf.mxu0 }
  0xa4   : > { %v2104_v17 = vpop.f32.mrf.mxu1 }
  0xa5   : > { %v2107_v19 = vpop.f32.mrf.mxu2  ;;  %v2109_v13 = vpop.f32.mrf.mxu3 }
  0xa6   : > { %1744 = vmatmul.msk.bf16.vlgmr.msra.gmra.mxu0 %vm298_vm1, %v1304_v16  ;;  %v1175_v16 = vsel %vm1140_vm6, %v1165_v36, %v1174_v4  ;;  %v1309_v36 = vrot.slane %v2144_v52, 3 }
  0xa7   : > { %1667 = vmatmul.msk.bf16.vlgmr.msra.gmra.mxu1 %vm298_vm1, %v875_v18 }
  0xaa   : > { %1707 = vmatmul.msk.bf16.gmra.mxu2 %vm298_vm1, %v1033_v2  ;;  %1725 = vmatmul.msk.bf16.vlgmr.msra.gmra.mxu3 %vm298_vm1, %v1157_v22 }
  0xab   : > { %v2117_v23 = vpop.f32.mrf.mxu0 }
  0xac   : > { %v2121_v15 = vpop.f32.mrf.mxu1 }
  0xad   : > { %v499_v34 = vpop.f32.mrf.mxu2  ;;  %v2123_v27 = vpop.f32.mrf.mxu3 }
  0xb3   : > { %v816_v21 = vpop.f32.mrf.mxu0 }
  0xb4   : > { %v400_v38 = vpop.f32.mrf.mxu1 }
  0xb5   : > { %v501_v40 = vpop.f32.mrf.mxu2  ;;  %v361_v41 = vpop.f32.mrf.mxu3  ;;  %v401_v42 = vadd.f32 %v400_v38, %v2070_v44 }
  0xb6   : > { %1745 = vmatmul.msk.bf16.gmra.mxu0 %vm298_vm1, %v1306_v37  ;;  %v880_v37 = vrot.slane %v2011_v53, 2 }
  0xb7   : > { %1668 = vmatmul.msk.bf16.gmra.mxu1 %vm298_vm1, %v877_v39  ;;  %v533_v14 = vadd.f32 %v499_v34, %v401_v42  ;;  %v1038_v39 = vrot.slane %v2166_v32, 2 }
  0xb9   : > { %v1039_v53 = vsel %vm872_vm4, %v1036_v0, %v1038_v39 }
  0xba   : > { %1708 = vmatmul.msk.bf16.gmra.mxu2 %vm298_vm1, %v1035_v43  ;;  %1726 = vmatmul.msk.bf16.gmra.mxu3 %vm298_vm1, %v1166_v29  ;;  %v881_v43 = vsel %vm872_vm4, %v878_v63, %v880_v37 }
  0xbb   : > { %v818_v46 = vpop.f32.mrf.mxu0 }
  0xbc   : > { %v402_v44 = vpop.f32.mrf.mxu1 }
  0xbd   : > { %v504_v48 = vpop.f32.mrf.mxu2  ;;  %v655_v49 = vpop.f32.mrf.mxu3  ;;  %v403_v50 = vadd.f32 %v402_v44, %v2083_v51  ;;  %v879_v51 = vsel %vm872_vm4, %v876_v33, %v878_v63 }
  0xbe   : > { %v689_v20 = vadd.f32 %v655_v49, %v533_v14  ;;  %v988_v49 = vld [vmem:[%s1864_s25 + $0x3c] sm:$0x3] }
  0xbf   : > { %v534_v54 = vadd.f32 %v501_v40, %v403_v50 }
  0xc0   : > { %v2148_v9 = vadd.f32 %v816_v21, %v689_v20  ;;  %v1182_v21 = vrot.slane %v1180_v25, 3 }
  0xc3   : > { %v821_v1 = vpop.f32.mrf.mxu0 }
  0xc4   : > { %v405_v6 = vpop.f32.mrf.mxu1 }
  0xc5   : > { %v506_v10 = vpop.f32.mrf.mxu2  ;;  %v657_v11 = vpop.f32.mrf.mxu3  ;;  %v406_v56 = vadd.f32 %v405_v6, %v2101_v12  ;;  %v1177_v12 = vshrl.u32 %v2144_v52, 16 }
  0xc6   : > { %v690_v60 = vadd.f32 %v657_v11, %v534_v54  ;;  %1746 = vmatmul.msk.bf16.gmra.mxu0 %vm298_vm1, %v1308_v5  ;;  %v1186_v54 = vshrl.u32 %v2166_v32, 16  ;;  %v882_v11 = vrot.slane %v2029_v3, 2 }
  0xc7   : > { %1669 = vmatmul.msk.bf16.gmra.mxu1 %vm298_vm1, %v879_v51  ;;  %v535_v18 = vadd.f32 %v504_v48, %v406_v56  ;;  %v1179_v35 = vrot.slane %v1177_v12, 2  ;;  %v987_v48 = vld [vmem:[%s1864_s25 + $0x38] sm:$0xf]  ;;  %v1191_v51 = vrot.slane %v1189_v55, 3  ;;  %v1131_v56 = vld [vmem:[%s1864_s25 + $0x3c] sm:$0x7] }
  0xc8   : > { %v2158_v2 = vadd.f32 %v818_v46, %v690_v60  ;;  %v1020_v20 = vunpack.c.l.b16 %v987_v48  ;;  %v1188_v6 = vrot.slane %v1186_v54, 2  ;;  %v1138_v12 = vunpack.c.l.b16 %v1131_v56 }
  0xc9   : > { %v1183_v41 = vor.u32 %v1182_v21, %v1179_v35 }
  0xca   : > { %1709 = vmatmul.msk.bf16.gmra.mxu2 %vm298_vm1, %v1037_v7  ;;  %1727 = vmatmul.msk.bf16.gmra.mxu3 %vm298_vm1, %v1175_v16 }
  0xcb   : > { %v823_v22 = vpop.f32.mrf.mxu0  ;;  %v1184_v47 = vsel %vm1140_vm6, %v1174_v4, %v1183_v41 }
  0xcc   : > { %v407_v26 = vpop.f32.mrf.mxu1 }
  0xcd   : > { %v509_v34 = vpop.f32.mrf.mxu2  ;;  %v660_v28 = vpop.f32.mrf.mxu3  ;;  %v408_v30 = vadd.f32 %v407_v26, %v2117_v23  ;;  %v1310_v23 = vsel %vm1301_vm5, %v1307_v62, %v1309_v36 }
  0xce   : > { %v691_v31 = vadd.f32 %v660_v28, %v535_v18  ;;  %v1192_v18 = vor.u32 %v1191_v51, %v1188_v6 }
  0xcf   : > { %v536_v33 = vadd.f32 %v506_v10, %v408_v30  ;;  %v1311_v10 = vrot.slane %v2166_v32, 3 }
  0xd0   : > { %v2170_v38 = vadd.f32 %v821_v1, %v691_v31  ;;  %v1193_v31 = vsel %vm1140_vm6, %v1183_v41, %v1192_v18 }
  0xd3   : > { %v826_v40 = vpop.f32.mrf.mxu0 }
  0xd4   : > { %v410_v42 = vpop.f32.mrf.mxu1 }
  0xd5   : > { %v511_v29 = vpop.f32.mrf.mxu2  ;;  %v662_v14 = vpop.f32.mrf.mxu3  ;;  %v411_v46 = vadd.f32 %v410_v42, %v2074_v45  ;;  %v1021_v45 = vunpack.c.l.b16 %v988_v49 }
  0xd6   : > { %v692_v8 = vadd.f32 %v662_v14, %v536_v33  ;;  %1747 = vmatmul.msk.bf16.gmra.mxu0 %vm298_vm1, %v1310_v23  ;;  %v1139_v33 = vpack.c.b16 %v1138_v12, %v1020_v20 }
  0xd7   : > { %1670 = vmatmul.msk.bf16.gmra.mxu1 %vm298_vm1, %v881_v43  ;;  %v537_v44 = vadd.f32 %v509_v34, %v411_v46  ;;  %v1028_v4 = vpack.c.b16 %v1021_v45, %v1020_v20  ;;  %v884_v46 = vrot.slane %v2045_v24, 2 }
  0xd8   : > { %v2182_v50 = vadd.f32 %v823_v22, %v692_v8  ;;  %v1312_v22 = vsel %vm1301_vm5, %v1309_v36, %v1311_v10  ;;  %v1195_v36 = vshrl.u32 %v1139_v33, 16  ;;  %v1313_v14 = vrot.slane %v1139_v33, 3 }
  0xd9   : > { %v1040_v7 = vrot.slane %v1028_v4, 2  ;;  %v885_v49 = vsel %vm872_vm4, %v882_v11, %v884_v46 }
  0xda   : > { %1710 = vmatmul.msk.bf16.gmra.mxu2 %vm298_vm1, %v1039_v53  ;;  %1728 = vmatmul.msk.bf16.gmra.mxu3 %vm298_vm1, %v1184_v47 }
  0xdb   : > { %v828_v52 = vpop.f32.mrf.mxu0  ;;  %v1041_v3 = vsel %vm872_vm4, %v1038_v39, %v1040_v7 }
  0xdc   : > { %v412_v59 = vpop.f32.mrf.mxu1 }
  0xdd   : > { %v514_v62 = vpop.f32.mrf.mxu2  ;;  %v665_v63 = vpop.f32.mrf.mxu3  ;;  %v413_v0 = vadd.f32 %v412_v59, %v2087_v57  ;;  %v883_v57 = vsel %vm872_vm4, %v880_v37, %v882_v11 }
  0xde   : > { %v693_v1 = vadd.f32 %v665_v63, %v537_v44  ;;  %v1314_v44 = vsel %vm1301_vm5, %v1311_v10, %v1313_v14 }
  0xdf   : > { %v538_v5 = vadd.f32 %v511_v29, %v413_v0  ;;  %v1197_v29 = vrot.slane %v1195_v36, 2 }
  0xe0   : > { %v2192_v60 = vadd.f32 %v826_v40, %v693_v1 }
  0xe3   : > { %v831_v16 = vpop.f32.mrf.mxu0 }
  0xe4   : > { %v415_v25 = vpop.f32.mrf.mxu1 }
  0xe5   : > { %v516_v26 = vpop.f32.mrf.mxu2  ;;  %v667_v34 = vpop.f32.mrf.mxu3  ;;  %v416_v28 = vadd.f32 %v415_v25, %v2104_v17  ;;  %v1198_v17 = vshll.u32 %v1139_v33, 16 }
  0xe6   : > { %v694_v30 = vadd.f32 %v667_v34, %v538_v5  ;;  %1748 = vmatmul.msk.bf16.gmra.mxu0 %vm298_vm1, %v1312_v22 }
  0xe7   : > { %1671 = vmatmul.msk.bf16.gmra.mxu1 %vm298_vm1, %v883_v57  ;;  %v539_v32 = vadd.f32 %v514_v62, %v416_v28  ;;  %v1200_v41 = vrot.slane %v1198_v17, 3 }
  0xe8   : > { %v2201_v35 = vadd.f32 %v828_v52, %v694_v30 }
  0xe9   : > { %v1201_v47 = vor.u32 %v1200_v41, %v1197_v29 }
  0xea   : > { %1711 = vmatmul.msk.bf16.gmra.mxu2 %vm298_vm1, %v1041_v3  ;;  %1729 = vmatmul.msk.bf16.gmra.mxu3 %vm298_vm1, %v1193_v31 }
  0xeb   : > { %v833_v21 = vpop.f32.mrf.mxu0  ;;  %v1202_v24 = vsel %vm1140_vm6, %v1192_v18, %v1201_v47 }
  0xec   : > { %v417_v37 = vpop.f32.mrf.mxu1 }
  0xed   : > { %v519_v40 = vpop.f32.mrf.mxu2  ;;  %v670_v23 = vpop.f32.mrf.mxu3  ;;  %v418_v39 = vadd.f32 %v417_v37, %v2121_v15 }
  0xee   : > { %v695_v42 = vadd.f32 %v670_v23, %v539_v32 }
  0xef   : > { %v540_v43 = vadd.f32 %v516_v26, %v418_v39 }
  0xf0   : > { %v2207_v8 = vadd.f32 %v831_v16, %v695_v42 }
  0xf3   : > { %v836_v53 = vpop.f32.mrf.mxu0 }
  0xf4   : > { %v420_v48 = vpop.f32.mrf.mxu1 }
  0xf5   : > { %v521_v20 = vpop.f32.mrf.mxu2  ;;  %v672_v45 = vpop.f32.mrf.mxu3  ;;  %v421_v15 = vadd.f32 %v420_v48, %v2089_v58 }
  0xf6   : > { %v696_v52 = vadd.f32 %v672_v45, %v540_v43  ;;  %1749 = vmatmul.msk.bf16.gmra.mxu0 %vm298_vm1, %v1314_v44 }
  0xf7   : > { %1672 = vmatmul.msk.bf16.gmra.mxu1 %vm298_vm1, %v885_v49  ;;  %v541_v54 = vadd.f32 %v519_v40, %v421_v15  ;;  %v2240_v49 = vld [vmem:[%s2304_s2] ss:$0 sm:$0xff] }
  0xf8   : > { %v2215_v55 = vadd.f32 %v833_v21, %v696_v52 }
  0xfa   : > { %1712 = vmatmul.msk.bf16.gmra.mxu2 %vm298_vm1, %v1040_v7  ;;  %1730 = vmatmul.msk.bf16.gmra.mxu3 %vm298_vm1, %v1202_v24 }
  0xfb   : > { %v838_v59 = vpop.f32.mrf.mxu0 }
  0xfc   : > { %v422_v62 = vpop.f32.mrf.mxu1 }
  0xfd   : > { %v524_v63 = vpop.f32.mrf.mxu2  ;;  %v675_v0 = vpop.f32.mrf.mxu3  ;;  %v423_v58 = vadd.f32 %v422_v62, %v2107_v19 }
  0xfe   : > { %v697_v1 = vadd.f32 %v675_v0, %v541_v54 }
  0xff   : > { %v542_v4 = vadd.f32 %v521_v20, %v423_v58 }
 0x100   : > { %v2220_v5 = vadd.f32 %v836_v53, %v697_v1 }
 0x103   : > { %v841_v6 = vpop.f32.mrf.mxu0 }
 0x104   : > { %v425_v51 = vpop.f32.mrf.mxu1 }
 0x105   : > { %v526_v10 = vpop.f32.mrf.mxu2  ;;  %v677_v11 = vpop.f32.mrf.mxu3  ;;  %v426_v56 = vadd.f32 %v425_v51, %v2093_v61 }
 0x106   : > { %v698_v16 = vadd.f32 %v677_v11, %v542_v4  ;;  %1750 = vmatmul.msk.bf16.gmra.mxu0 %vm298_vm1, %v1313_v14 }
 0x107   : > { %1673 = vmatmul.msk.bf16.gmra.mxu1 %vm298_vm1, %v884_v46  ;;  %v543_v7 = vadd.f32 %v524_v63, %v426_v56 }
 0x108   : > { %v2225_v18 = vadd.f32 %v838_v59, %v698_v16 }
 0x10a   : > { %1731 = vmatmul.msk.bf16.gmra.mxu3 %vm298_vm1, %v1201_v47 }
 0x10b   : > { %v843_v19 = vpop.f32.mrf.mxu0 }
 0x10c   : > { %v427_v22 = vpop.f32.mrf.mxu1 }
 0x10d   : > { %v529_v12 = vpop.f32.mrf.mxu2  ;;  %v680_v25 = vpop.f32.mrf.mxu3  ;;  %v428_v57 = vadd.f32 %v427_v22, %v2109_v13 }
 0x10e   : > { %v699_v26 = vadd.f32 %v680_v25, %v543_v7 }
 0x10f   : > { %v544_v34 = vadd.f32 %v526_v10, %v428_v57 }
 0x110   : > { %v2229_v28 = vadd.f32 %v841_v6, %v699_v26 }
 0x113   : > { %v846_v61 = vpop.f32.mrf.mxu0 }
 0x114   : > { %v430_v30 = vpop.f32.mrf.mxu1 }
 0x115   : > { %v531_v3 = vpop.f32.mrf.mxu2  ;;  %v682_v31 = vpop.f32.mrf.mxu3  ;;  %v431_v32 = vadd.f32 %v430_v30, %v2123_v27 }
 0x116   : > { %v700_v33 = vadd.f32 %v682_v31, %v544_v34 }
 0x117   : > { %v545_v21 = vadd.f32 %v529_v12, %v431_v32 }
 0x118   : > { %v2232_v36 = vadd.f32 %v843_v19, %v700_v33 }
 0x11b   : > { %v848_v17 = vpop.f32.mrf.mxu0 }
 0x11c   : > { %v432_v37 = vpop.f32.mrf.mxu1 }
 0x11d   : > { %v1084_v40 = vpop.f32.mrf.mxu2  ;;  %v685_v23 = vpop.f32.mrf.mxu3 }
 0x11e   : > { %v701_v39 = vadd.f32 %v685_v23, %v545_v21 }
 0x120   : > { %v2234_v13 = vadd.f32 %v846_v61, %v701_v39 }
 0x123   : > { %v1357_v42 = vpop.f32.mrf.mxu0 }
 0x124   : > { %v928_v43 = vpop.f32.mrf.mxu1 }
 0x125   : > { %v1086_v29 = vpop.f32.mrf.mxu2  ;;  %v687_v41 = vpop.f32.mrf.mxu3  ;;  %v962_v14 = vadd.f32 %v928_v43, %v2148_v9 }
 0x127   : > { %v1118_v27 = vadd.f32 %v1084_v40, %v962_v14 }
 0x12b   : > { %v1359_v46 = vpop.f32.mrf.mxu0 }
 0x12c   : > { %v930_v53 = vpop.f32.mrf.mxu1 }
 0x12d   : > { %v1089_v47 = vpop.f32.mrf.mxu2  ;;  %v1245_v44 = vpop.f32.mrf.mxu3  ;;  %v963_v45 = vadd.f32 %v930_v53, %v2158_v2 }
 0x12e   : > { %v1279_v48 = vadd.f32 %v1245_v44, %v1118_v27 }
 0x12f   : > { %v1119_v9 = vadd.f32 %v1086_v29, %v963_v45 }
 0x130   : > { %v1391_v20 = vadd.f32 %v1357_v42, %v1279_v48 }
 0x132   : > { %v1408_v15 = vadd.f32 %v2240_v49, %v1391_v20 }
 0x133   : > { %v1362_v52 = vpop.f32.mrf.mxu0 }
 0x134   : > { %v1421_v24 = vmax.f32 %v1408_v15, 0.0  ;;  %v933_v54 = vpop.f32.mrf.mxu1 }
 0x135   : > { %v1091_v59 = vpop.f32.mrf.mxu2  ;;  %v1247_v62 = vpop.f32.mrf.mxu3  ;;  %v964_v58 = vadd.f32 %v933_v54, %v2170_v38 }
 0x136   : > { %v1434_v63 = vpack.c.bf16 %v1421_v24, %v1421_v24  ;;  %v1280_v0 = vadd.f32 %v1247_v62, %v1119_v9 }
 0x137   : > { %v1120_v51 = vadd.f32 %v1089_v47, %v964_v58 }
 0x138   : > { %1448 = vst.msk [vmem:[%s2248_s7] sm:$0xf] %vm1447_vm7, %v1434_v63  ;;  %v1392_v2 = vadd.f32 %v1359_v46, %v1280_v0 }
 0x13a   : > { %v1409_v1 = vadd.f32 %v2240_v49, %v1392_v2 }
 0x13b   : > { %v1364_v4 = vpop.f32.mrf.mxu0 }
 0x13c   : > { %v1422_v6 = vmax.f32 %v1409_v1, 0.0  ;;  %v935_v10 = vpop.f32.mrf.mxu1 }
 0x13d   : > { %v1094_v11 = vpop.f32.mrf.mxu2  ;;  %v1250_v56 = vpop.f32.mrf.mxu3  ;;  %v965_v22 = vadd.f32 %v935_v10, %v2182_v50 }
 0x13e   : > { %v1435_v16 = vpack.c.bf16 %v1422_v6, %v1422_v6  ;;  %v1281_v7 = vadd.f32 %v1250_v56, %v1120_v51 }
 0x13f   : > { %v1121_v57 = vadd.f32 %v1091_v59, %v965_v22 }
 0x140   : > { %1449 = vst.msk [vmem:[%s2248_s7 + $0x4] sm:$0xf] %vm1447_vm7, %v1435_v16  ;;  %v1393_v19 = vadd.f32 %v1362_v52, %v1281_v7 }
 0x142   : > { %v1410_v12 = vadd.f32 %v2240_v49, %v1393_v19 }
 0x143   : > { %v1367_v25 = vpop.f32.mrf.mxu0 }
 0x144   : > { %v1423_v38 = vmax.f32 %v1410_v12, 0.0  ;;  %v938_v26 = vpop.f32.mrf.mxu1 }
 0x145   : > { %v1096_v34 = vpop.f32.mrf.mxu2  ;;  %v1252_v61 = vpop.f32.mrf.mxu3  ;;  %v966_v32 = vadd.f32 %v938_v26, %v2192_v60 }
 0x146   : > { %v1436_v30 = vpack.c.bf16 %v1423_v38, %v1423_v38  ;;  %v1282_v3 = vadd.f32 %v1252_v61, %v1121_v57 }
 0x147   : > { %v1122_v17 = vadd.f32 %v1094_v11, %v966_v32 }
 0x148   : > { %1450 = vst.msk [vmem:[%s2248_s7 + $0x8] sm:$0xf] %vm1447_vm7, %v1436_v30  ;;  %v1394_v31 = vadd.f32 %v1364_v4, %v1282_v3 }
 0x14a   : > { %v1411_v33 = vadd.f32 %v2240_v49, %v1394_v31 }
 0x14b   : > { %v1369_v21 = vpop.f32.mrf.mxu0 }
 0x14c   : > { %v1424_v50 = vmax.f32 %v1411_v33, 0.0  ;;  %v940_v37 = vpop.f32.mrf.mxu1 }
 0x14d   : > { %v1099_v40 = vpop.f32.mrf.mxu2  ;;  %v1255_v23 = vpop.f32.mrf.mxu3  ;;  %v967_v29 = vadd.f32 %v940_v37, %v2201_v35 }
 0x14e   : > { %v1437_v39 = vpack.c.bf16 %v1424_v50, %v1424_v50  ;;  %v1283_v42 = vadd.f32 %v1255_v23, %v1122_v17 }
 0x14f   : > { %v1123_v46 = vadd.f32 %v1096_v34, %v967_v29 }
 0x150   : > { %1451 = vst.msk [vmem:[%s2248_s7 + $0xc] sm:$0xf] %vm1447_vm7, %v1437_v39  ;;  %v1395_v43 = vadd.f32 %v1367_v25, %v1283_v42 }
 0x152   : > { %v1412_v41 = vadd.f32 %v2240_v49, %v1395_v43 }
 0x153   : > { %v1372_v14 = vpop.f32.mrf.mxu0 }
 0x154   : > { %v1425_v60 = vmax.f32 %v1412_v41, 0.0  ;;  %v943_v27 = vpop.f32.mrf.mxu1 }
 0x155   : > { %v1101_v53 = vpop.f32.mrf.mxu2  ;;  %v1257_v47 = vpop.f32.mrf.mxu3  ;;  %v968_v45 = vadd.f32 %v943_v27, %v2207_v8 }
 0x156   : > { %v1438_v44 = vpack.c.bf16 %v1425_v60, %v1425_v60  ;;  %v1284_v48 = vadd.f32 %v1257_v47, %v1123_v46 }
 0x157   : > { %v1124_v24 = vadd.f32 %v1099_v40, %v968_v45 }
 0x158   : > { %1452 = vst.msk [vmem:[%s2248_s7 + $0x10] sm:$0xf] %vm1447_vm7, %v1438_v44  ;;  %v1396_v20 = vadd.f32 %v1369_v21, %v1284_v48 }
 0x15a   : > { %v1413_v15 = vadd.f32 %v2240_v49, %v1396_v20 }
 0x15b   : > { %v1374_v52 = vpop.f32.mrf.mxu0 }
 0x15c   : > { %v1426_v35 = vmax.f32 %v1413_v15, 0.0  ;;  %v945_v9 = vpop.f32.mrf.mxu1 }
 0x15d   : > { %v1104_v54 = vpop.f32.mrf.mxu2  ;;  %v1260_v59 = vpop.f32.mrf.mxu3  ;;  %v969_v2 = vadd.f32 %v945_v9, %v2215_v55 }
 0x15e   : > { %v1439_v62 = vpack.c.bf16 %v1426_v35, %v1426_v35  ;;  %v1285_v63 = vadd.f32 %v1260_v59, %v1124_v24 }
 0x15f   : > { %v1125_v4 = vadd.f32 %v1101_v53, %v969_v2 }
 0x160   : > { %1453 = vst.msk [vmem:[%s2248_s7 + $0x14] sm:$0xf] %vm1447_vm7, %v1439_v62  ;;  %v1397_v0 = vadd.f32 %v1372_v14, %v1285_v63 }
 0x162   : > { %v1414_v58 = vadd.f32 %v2240_v49, %v1397_v0 }
 0x163   : > { %v1377_v1 = vpop.f32.mrf.mxu0 }
 0x164   : > { %v1427_v8 = vmax.f32 %v1414_v58, 0.0  ;;  %v948_v6 = vpop.f32.mrf.mxu1 }
 0x165   : > { %v1106_v51 = vpop.f32.mrf.mxu2  ;;  %v1262_v10 = vpop.f32.mrf.mxu3  ;;  %v970_v7 = vadd.f32 %v948_v6, %v2220_v5 }
 0x166   : > { %v1440_v11 = vpack.c.bf16 %v1427_v8, %v1427_v8  ;;  %v1286_v56 = vadd.f32 %v1262_v10, %v1125_v4 }
 0x167   : > { %v1126_v12 = vadd.f32 %v1104_v54, %v970_v7 }
 0x168   : > { %1454 = vst.msk [vmem:[%s2248_s7 + $0x18] sm:$0xf] %vm1447_vm7, %v1440_v11  ;;  %v1398_v16 = vadd.f32 %v1374_v52, %v1286_v56 }
 0x16a   : > { %v1415_v19 = vadd.f32 %v2240_v49, %v1398_v16 }
 0x16b   : > { %v1379_v22 = vpop.f32.mrf.mxu0 }
 0x16c   : > { %v1428_v55 = vmax.f32 %v1415_v19, 0.0  ;;  %v950_v25 = vpop.f32.mrf.mxu1 }
 0x16d   : > { %v1109_v38 = vpop.f32.mrf.mxu2  ;;  %v1265_v57 = vpop.f32.mrf.mxu3  ;;  %v971_v30 = vadd.f32 %v950_v25, %v2225_v18 }
 0x16e   : > { %v1441_v26 = vpack.c.bf16 %v1428_v55, %v1428_v55  ;;  %v1287_v34 = vadd.f32 %v1265_v57, %v1126_v12 }
 0x16f   : > { %v1127_v32 = vadd.f32 %v1106_v51, %v971_v30 }
 0x170   : > { %1455 = vst.msk [vmem:[%s2248_s7 + $0x1c] sm:$0xf] %vm1447_vm7, %v1441_v26  ;;  %v1399_v61 = vadd.f32 %v1377_v1, %v1287_v34 }
 0x172   : > { %v1416_v3 = vadd.f32 %v2240_v49, %v1399_v61 }
 0x173   : > { %v1382_v31 = vpop.f32.mrf.mxu0 }
 0x174   : > { %v1429_v5 = vmax.f32 %v1416_v3, 0.0  ;;  %v953_v33 = vpop.f32.mrf.mxu1 }
 0x175   : > { %v1111_v21 = vpop.f32.mrf.mxu2  ;;  %v1267_v50 = vpop.f32.mrf.mxu3  ;;  %v972_v23 = vadd.f32 %v953_v33, %v2229_v28 }
 0x176   : > { %v1442_v17 = vpack.c.bf16 %v1429_v5, %v1429_v5  ;;  %v1288_v37 = vadd.f32 %v1267_v50, %v1127_v32 }
 0x177   : > { %v1128_v43 = vadd.f32 %v1109_v38, %v972_v23 }
 0x178   : > { %1456 = vst.msk [vmem:[%s2248_s7 + $0x20] sm:$0xf] %vm1447_vm7, %v1442_v17  ;;  %v1400_v40 = vadd.f32 %v1379_v22, %v1288_v37 }
 0x17a   : > { %v1417_v39 = vadd.f32 %v2240_v49, %v1400_v40 }
 0x17b   : > { %v1384_v42 = vpop.f32.mrf.mxu0 }
 0x17c   : > { %v1430_v18 = vmax.f32 %v1417_v39, 0.0  ;;  %v955_v29 = vpop.f32.mrf.mxu1 }
 0x17d   : > { %v1114_v41 = vpop.f32.mrf.mxu2  ;;  %v1270_v14 = vpop.f32.mrf.mxu3  ;;  %v973_v53 = vadd.f32 %v955_v29, %v2232_v36 }
 0x17e   : > { %v1443_v60 = vpack.c.bf16 %v1430_v18, %v1430_v18  ;;  %v1289_v46 = vadd.f32 %v1270_v14, %v1128_v43 }
 0x17f   : > { %v1129_v48 = vadd.f32 %v1111_v21, %v973_v53 }
 0x180   : > { %1457 = vst.msk [vmem:[%s2248_s7 + $0x24] sm:$0xf] %vm1447_vm7, %v1443_v60  ;;  %v1401_v27 = vadd.f32 %v1382_v31, %v1289_v46 }
 0x182   : > { %v1418_v47 = vadd.f32 %v2240_v49, %v1401_v27 }
 0x183   : > { %v1387_v44 = vpop.f32.mrf.mxu0 }
 0x184   : > { %v1431_v28 = vmax.f32 %v1418_v47, 0.0  ;;  %v958_v20 = vpop.f32.mrf.mxu1 }
 0x185   : > { %v1116_v45 = vpop.f32.mrf.mxu2  ;;  %v1272_v15 = vpop.f32.mrf.mxu3  ;;  %v974_v9 = vadd.f32 %v958_v20, %v2234_v13 }
 0x186   : > { %v1444_v52 = vpack.c.bf16 %v1431_v28, %v1431_v28  ;;  %v1290_v35 = vadd.f32 %v1272_v15, %v1129_v48 }
 0x187   : > { %v1130_v62 = vadd.f32 %v1114_v41, %v974_v9 }
 0x188   : > { %1458 = vst.msk [vmem:[%s2248_s7 + $0x28] sm:$0xf] %vm1447_vm7, %v1444_v52  ;;  %v1402_v24 = vadd.f32 %v1384_v42, %v1290_v35 }
 0x18a   : > { %v1419_v54 = vadd.f32 %v2240_v49, %v1402_v24 }
 0x18b   : > { %v1389_v36 = vpop.f32.mrf.mxu0 }
 0x18c   : > { %v1432_v59 = vmax.f32 %v1419_v54, 0.0  ;;  %v960_v63 = vpop.f32.mrf.mxu1 }
 0x18d   : > { %v1275_v0 = vpop.f32.mrf.mxu3 }
 0x18e   : > { %v1445_v2 = vpack.c.bf16 %v1432_v59, %v1432_v59  ;;  %v1291_v58 = vadd.f32 %v1275_v0, %v1130_v62 }
 0x190   : > { %1459 = vst.msk [vmem:[%s2248_s7 + $0x2c] sm:$0xf] %vm1447_vm7, %v1445_v2  ;;  %v1403_v1 = vadd.f32 %v1387_v44, %v1291_v58 }
 0x192   : > { %v1420_v8 = vadd.f32 %v2240_v49, %v1403_v1 }
 0x194   : > { %v1433_v4 = vmax.f32 %v1420_v8, 0.0 }
 0x195   : > { %v1277_v6 = vpop.f32.mrf.mxu3 }
 0x196   : > { %v1446_v51 = vpack.c.bf16 %v1433_v4, %v1433_v4 }
 0x198   : > { %1460 = vst.msk [vmem:[%s2248_s7 + $0x30] sm:$0xf] %vm1447_vm7, %v1446_v51 }
 0x199 PF: > { %s13_s12 = sadd.s32 1, %s1816_s12  }
 0x19a   : > { %p10_p4 = scmp.ge.s32.totalorder %s13_s12, 4  }
 0x19c   :  { %12 = sbr.rel (!%p10_p4) target bundleno = 1 (0x1), region = 70 }

// kernel: resnext_forward.28
= control target key start
LH: loop header
LB: loop body
LE: loop exit
PB: predicated region body
PF: predicated region fallthrough
CT: control target
= control target key end

     0   :  { %vm68_vm0 = vcmask 523264   ;;  %vm114_vm1 = vcmask 519168   ;;  %s237_s1 = inlined_call_operand.vmem [shape: bf16[64,64], index: 1, kind: input, shape index: {}]   ;;  %s238_s2 = inlined_call_operand.vmem [shape: f32[1,64], index: 2, kind: input, shape index: {}]   ;;  %s239_s0 = inlined_call_operand.vmem [shape: bf16[32,64], index: 0, kind: input, shape index: {}]   ;;  %s240_s3 = inlined_call_operand.vmem [shape: bf16[32,64], index: 3, kind: input, shape index: {}]   ;;  %s241_s4 = inlined_call_operand.vmem [shape: bf16[32,64], index: 4, kind: output, shape index: {}]  }
   0x1   :  { %v154_v0 = vld [vmem:[%s237_s1 + $0x18] sm:$0xff]  ;;  %v153_v1 = vld [vmem:[%s237_s1 + $0x10] sm:$0xff]  ;;  %v152_v2 = vld [vmem:[%s237_s1 + $0x8] sm:$0xff] }
   0x2   :  { %79 = vmatpush.bf16.msra.mxu0 %v154_v0  ;;  %164 = vmatpush.bf16.msra.mxu1 %v154_v0  ;;  %v151_v3 = vld [vmem:[%s237_s1] sm:$0xff]  ;;  %v150_v5 = vld [vmem:[%s239_s0 + $0x8] sm:$0xff] }
   0x3   :  { %v149_v4 = vld [vmem:[%s239_s0] sm:$0xff]  ;;  %v163_v7 = vld [vmem:[%s240_s3 + $0x8] sm:$0xff]  }
   0x4   :  { %v156_v6 = vld [vmem:[%s240_s3] sm:$0xff]   ;;  %v161_v10 = vunpack.c.l.bf16 %v163_v7  ;;  %v162_v22 = vunpack.c.h.bf16 %v163_v7 }
   0x5   :  { %v168_v8 = vld [vmem:[%s238_s2] ss:$0 sm:$0xff]  ;;  %v157_v9 = vunpack.c.l.bf16 %v156_v6  ;;  %v158_v21 = vunpack.c.h.bf16 %v156_v6 }
   0x6   :  { %80 = vmatpush.bf16.msra.mxu0 %v153_v1  ;;  %165 = vmatpush.bf16.msra.mxu1 %v153_v1 }
   0xa   :  { %81 = vmatpush.bf16.msra.mxu0 %v152_v2  ;;  %166 = vmatpush.bf16.msra.mxu1 %v152_v2 }
   0xe   :  { %82 = vmatpush.bf16.msra.mxu0 %v151_v3  ;;  %167 = vmatpush.bf16.msra.mxu1 %v151_v3 }
  0x11   :  { %147 = vmatmul.msk.bf16.vlgmr.msra.gmra.mxu0 %vm68_vm0, %v149_v4  ;;  %148 = vmatmul.msk.bf16.vlgmr.msra.gmra.mxu1 %vm68_vm0, %v150_v5 }
  0x8e   :  { %v84_v11 = vpop.f32.mrf.mxu0  ;;  %v89_v12 = vpop.f32.mrf.mxu1 }
  0x8f   :  { %v85_v13 = vadd.f32 %v168_v8, %v84_v11  ;;  %v90_v14 = vadd.f32 %v168_v8, %v89_v12 }
  0x91   :  { %v102_v15 = vadd.f32 %v157_v9, %v85_v13  ;;  %v104_v16 = vadd.f32 %v161_v10, %v90_v14 }
  0x93   :  { %v106_v17 = vmax.f32 %v102_v15, 0.0  ;;  %v108_v18 = vmax.f32 %v104_v16, 0.0 }
  0x95   :  { %v110_v19 = vpack.c.bf16 %v106_v17, %v106_v17  ;;  %v112_v20 = vpack.c.bf16 %v108_v18, %v108_v18 }
  0x96   :  { %v86_v23 = vpop.f32.mrf.mxu0  ;;  %v91_v24 = vpop.f32.mrf.mxu1 }
  0x97   :  { %115 = vst.msk [vmem:[%s241_s4] sm:$0xf] %vm114_vm1, %v110_v19  ;;  %v87_v25 = vadd.f32 %v168_v8, %v86_v23  ;;  %v92_v26 = vadd.f32 %v168_v8, %v91_v24 }
  0x98   :  { %117 = vst.msk [vmem:[%s241_s4 + $0x8] sm:$0xf] %vm114_vm1, %v112_v20 }
  0x99   :  { %v103_v27 = vadd.f32 %v158_v21, %v87_v25  ;;  %v105_v28 = vadd.f32 %v162_v22, %v92_v26 }
  0x9b   :  { %v107_v29 = vmax.f32 %v103_v27, 0.0  ;;  %v109_v30 = vmax.f32 %v105_v28, 0.0 }
  0x9d   :  { %v111_v31 = vpack.c.bf16 %v107_v29, %v107_v29  ;;  %v113_v32 = vpack.c.bf16 %v109_v30, %v109_v30 }
  0x9f   :  { %116 = vst.msk [vmem:[%s241_s4 + $0x4] sm:$0xf] %vm114_vm1, %v111_v31 }
  0xa0   :  { %118 = vst.msk [vmem:[%s241_s4 + $0xc] sm:$0xf] %vm114_vm1, %v113_v32 }

// kernel: resnext_forward.27
= control target key start
LH: loop header
LB: loop body
LE: loop exit
PB: predicated region body
PF: predicated region fallthrough
CT: control target
= control target key end

     0   :  { %vm49_vm0 = vcmask 261120   ;;  %vm79_vm1 = vcmask 519168   ;;  %s160_s1 = inlined_call_operand.vmem [shape: bf16[32,64], index: 1, kind: input, shape index: {}]   ;;  %s161_s2 = inlined_call_operand.vmem [shape: f32[1,64], index: 2, kind: input, shape index: {}]   ;;  %s162_s0 = inlined_call_operand.vmem [shape: bf16[32,32], index: 0, kind: input, shape index: {}]   ;;  %s163_s3 = inlined_call_operand.vmem [shape: bf16[32,64], index: 3, kind: output, shape index: {}]  }
   0x1   :  { %v109_v0 = vld [vmem:[%s160_s1 + $0x8] sm:$0xff]  ;;  %v108_v1 = vld [vmem:[%s160_s1] sm:$0xff] }
   0x2   :  { %62 = vmatpush.bf16.msra.mxu0 %v109_v0  ;;  %110 = vmatpush.bf16.msra.mxu1 %v109_v0  ;;  %v106_v2 = vld [vmem:[%s162_s0] sm:$0xff]  ;;  %v107_v3 = vld [vmem:[%s162_s0 + $0x8] sm:$0xff] }
   0x3   :  { %v112_v4 = vld [vmem:[%s161_s2] ss:$0 sm:$0xff] }
   0x6   :  { %63 = vmatpush.bf16.msra.mxu0 %v108_v1  ;;  %111 = vmatpush.bf16.msra.mxu1 %v108_v1 }
   0x9   :  { %104 = vmatmul.msk.bf16.vlgmr.msra.gmra.mxu0 %vm49_vm0, %v106_v2  ;;  %105 = vmatmul.msk.bf16.vlgmr.msra.gmra.mxu1 %vm49_vm0, %v107_v3 }
  0x86   :  { %v65_v5 = vpop.f32.mrf.mxu0  ;;  %v70_v6 = vpop.f32.mrf.mxu1 }
  0x87   :  { %v66_v7 = vadd.f32 %v112_v4, %v65_v5  ;;  %v71_v8 = vadd.f32 %v112_v4, %v70_v6 }
  0x89   :  { %v75_v9 = vpack.c.bf16 %v66_v7, %v66_v7  ;;  %v77_v10 = vpack.c.bf16 %v71_v8, %v71_v8 }
  0x8b   :  { %80 = vst.msk [vmem:[%s163_s3] sm:$0xf] %vm79_vm1, %v75_v9 }
  0x8c   :  { %82 = vst.msk [vmem:[%s163_s3 + $0x8] sm:$0xf] %vm79_vm1, %v77_v10 }
  0x8e   :  { %v67_v11 = vpop.f32.mrf.mxu0  ;;  %v72_v12 = vpop.f32.mrf.mxu1 }
  0x8f   :  { %v68_v13 = vadd.f32 %v112_v4, %v67_v11  ;;  %v73_v14 = vadd.f32 %v112_v4, %v72_v12 }
  0x91   :  { %v76_v15 = vpack.c.bf16 %v68_v13, %v68_v13  ;;  %v78_v16 = vpack.c.bf16 %v73_v14, %v73_v14 }
  0x93   :  { %81 = vst.msk [vmem:[%s163_s3 + $0x4] sm:$0xf] %vm79_vm1, %v76_v15 }
  0x94   :  { %83 = vst.msk [vmem:[%s163_s3 + $0xc] sm:$0xf] %vm79_vm1, %v78_v16 }

// kernel: resnext_forward.29
= control target key start
LH: loop header
LB: loop body
LE: loop exit
PB: predicated region body
PF: predicated region fallthrough
CT: control target
= control target key end

     0   :  { %v148_v2 = vmov 16.0   ;;  %vm23_vm0 = vcmask 523264   ;;  %s211_s0 = inlined_call_operand.vmem [shape: bf16[2,16,64], index: 0, kind: input, shape index: {}]   ;;  %s212_s1 = inlined_call_operand.vmem [shape: f32[64,10], index: 1, kind: input, shape index: {}]   ;;  %s213_s2 = inlined_call_operand.vmem [shape: f32[1,10], index: 2, kind: input, shape index: {}]   ;;  %s214_s3 = inlined_call_operand.hbm [shape: f32[2,10], index: 3, kind: output, shape index: {}]  }
   0x1   :  { %v58_v0 = vld [vmem:[%s212_s1 + $0x38] sm:$0xff]  ;;  %v57_v1 = vld [vmem:[%s212_s1 + $0x30] sm:$0xff]  ;;  %120 = vrcp.f32 %v148_v2  ;;  %v56_v3 = vld [vmem:[%s212_s1 + $0x28] sm:$0xff] }
   0x2   :  { %77 = vmatpush.msra.mxu0 %v58_v0  ;;  %v109_v4 = vld [vmem:[%s211_s0] sm:$0xff]   ;;  %v116_v7 = vld [vmem:[%s211_s0 + $0x8] sm:$0xff]  }
   0x3   :  { %v110_v5 = vunpack.c.l.bf16 %v109_v4  ;;  %v111_v6 = vunpack.c.h.bf16 %v109_v4  ;;  %v55_v8 = vld [vmem:[%s212_s1 + $0x20] sm:$0xff]  ;;  %v114_v9 = vunpack.c.l.bf16 %v116_v7  ;;  %v115_v10 = vunpack.c.h.bf16 %v116_v7 }
   0x4   :  { %78 = vmatpush.msra.mxu0 %v57_v1 }
   0x5   :  { %8 = vsyncpa [#allocation3], 0  ;;  %v24_v11 = vsel %vm23_vm0, %v110_v5, 0.0  ;;  %v25_v12 = vsel %vm23_vm0, %v111_v6, 0.0  ;;  %v54_v13 = vld [vmem:[%s212_s1 + $0x18] sm:$0xff]  ;;  %v33_v15 = vsel %vm23_vm0, %v114_v9, 0.0 }
   0x6   :  { %79 = vmatpush.msra.mxu0 %v56_v3  ;;  %v26_v14 = vadd.f32 %v25_v12, %v24_v11  ;;  %v34_v16 = vsel %vm23_vm0, %v115_v10, 0.0  ;;  %v53_v19 = vld [vmem:[%s212_s1 + $0x10] sm:$0xff]  ;;  %v52_v23 = vld [vmem:[%s212_s1 + $0x8] sm:$0xff]  ;;  %v51_v27 = vld [vmem:[%s212_s1] sm:$0xff]  ;;  %vm65_vm2 = vcmask 1041409   ;;  %s149_s5 = smov [#allocation2]  }
   0x7   :  { %v121_v17 = vpop.eup %120  ;;  %v35_v18 = vadd.f32 %v34_v16, %v33_v15  ;;  %v119_v42 = vld [vmem:[%s213_s2] ss:$0 sm:$0xff]  ;;  %s96_s6 = sshll.u32 %s149_s5, 4  ;;  %s98_s9 = sshll.u32 %s214_s3, 4  ;;  %vm89_vm3 = vcmask 74752   ;;  %s97_s6 = int_to_ptr.vmem [resolvable:$true] %s96_s6  ;;  %s99_s9 = int_to_ptr.hbm [resolvable:$true] %s98_s9 }
   0x8   :  { %80 = vmatpush.msra.mxu0 %v55_v8  ;;  %v27_v20 = vrot.slane %v26_v14, 4  ;;  %v43_v21 = vmul.f32 16.0, %v121_v17  ;;  %vm47_vm1 = vweird.f32 %v121_v17 }
   0x9   :  { %v36_v22 = vrot.slane %v35_v18, 4 }
   0xa   :  { %81 = vmatpush.msra.mxu0 %v54_v13  ;;  %v28_v24 = vadd.f32 %v27_v20, %v26_v14  ;;  %v44_v25 = vsub.f32 1.0, %v43_v21 }
   0xb   :  { %v37_v26 = vadd.f32 %v36_v22, %v35_v18 }
   0xc   :  { %82 = vmatpush.msra.mxu0 %v53_v19  ;;  %v29_v28 = vrot.slane %v28_v24, 2  ;;  %v45_v29 = vmul.f32 %v121_v17, %v44_v25 }
   0xd   :  { %v38_v30 = vrot.slane %v37_v26, 2 }
   0xe   :  { %83 = vmatpush.msra.mxu0 %v52_v23  ;;  %v30_v31 = vadd.f32 %v29_v28, %v28_v24  ;;  %v46_v32 = vadd.f32 %v121_v17, %v45_v29 }
   0xf   :  { %v39_v33 = vadd.f32 %v38_v30, %v37_v26 }
  0x10   :  { %84 = vmatpush.msra.mxu0 %v51_v27  ;;  %v31_v34 = vrot.slane %v30_v31, 1  ;;  %v48_v36 = vsel %vm47_vm1, %v121_v17, %v46_v32 }
  0x11   :  { %v40_v35 = vrot.slane %v39_v33, 1 }
  0x12   :  { %v32_v37 = vadd.f32 %v31_v34, %v30_v31 }
  0x13   :  { %v41_v38 = vadd.f32 %v40_v35, %v39_v33 }
  0x14   :  { %v49_v39 = vmul.f32 %v48_v36, %v32_v37 }
  0x15   :  { %v50_v40 = vmul.f32 %v48_v36, %v41_v38 }
  0x17   :  { %v66_v41 = vsel %vm65_vm2, %v50_v40, %v49_v39 }
  0x18   :  { %107 = vmatmul.msk.f32.vlgmr.msra.gmra.mxu0 %vm23_vm0, %v66_v41 }
  0x95   :  { %v86_v43 = vpop.f32.mrf.mxu0 }
  0x96   :  { %v87_v44 = vadd.f32 %v119_v42, %v86_v43 }
  0x98   :  { %90 = vst.msk [vmem:[#allocation2] sm:$0x3] %vm89_vm3, %v87_v44 }
  0x99   :  { %101 = dma.vmem_to_hbm [thread:$0]  %s97_s6, 32, %s99_s9, [#allocation3]  }
  0x9a   :  { %146 = dma.done.wait [#allocation3], 32  }
  0x9b   :  { %147 = vsyncadd [#allocation3], 4294967264 }
  0x9c   :  { %106 = vsyncpa [#allocation3], 1 }

// kernel: resnext_forward.26
= control target key start
LH: loop header
LB: loop body
LE: loop exit
PB: predicated region body
PF: predicated region fallthrough
CT: control target
= control target key end

     0   :  { %vm369_vm0 = vcmask 523264   ;;  %vm479_vm1 = vcmask 519168   ;;  %s932_s1 = inlined_call_operand.vmem [shape: bf16[576,64], index: 1, kind: input, shape index: {}]   ;;  %s933_s2 = inlined_call_operand.vmem [shape: f32[1,64], index: 2, kind: input, shape index: {}]   ;;  %s934_s0 = inlined_call_operand.vmem [shape: bf16[32,576], index: 0, kind: input, shape index: {}]   ;;  %s935_s3 = inlined_call_operand.vmem [shape: bf16[32,64], index: 3, kind: output, shape index: {}]  }
   0x1   :  { %v691_v0 = vld [vmem:[%s932_s1 + $0x38] sm:$0xff]  ;;  %v690_v4 = vld [vmem:[%s932_s1 + $0x30] sm:$0xff]  ;;  %v689_v8 = vld [vmem:[%s932_s1 + $0x28] sm:$0xff] }
   0x2   :  { %v699_v1 = vld [vmem:[%s932_s1 + $0x78] sm:$0xff]  ;;  %376 = vmatpush.bf16.msra.mxu0 %v691_v0  ;;  %v698_v5 = vld [vmem:[%s932_s1 + $0x70] sm:$0xff]  ;;  %v697_v9 = vld [vmem:[%s932_s1 + $0x68] sm:$0xff] }
   0x3   :  { %v707_v2 = vld [vmem:[%s932_s1 + $0xb8] sm:$0xff]  ;;  %395 = vmatpush.bf16.msra.mxu1 %v699_v1  ;;  %v706_v6 = vld [vmem:[%s932_s1 + $0xb0] sm:$0xff]  ;;  %v705_v10 = vld [vmem:[%s932_s1 + $0xa8] sm:$0xff] }
   0x4   :  { %v715_v3 = vld [vmem:[%s932_s1 + $0xf8] sm:$0xff]  ;;  %414 = vmatpush.bf16.msra.mxu2 %v707_v2  ;;  %v714_v7 = vld [vmem:[%s932_s1 + $0xf0] sm:$0xff]  ;;  %v713_v11 = vld [vmem:[%s932_s1 + $0xe8] sm:$0xff] }
   0x5   :  { %433 = vmatpush.bf16.msra.mxu3 %v715_v3  ;;  %v688_v12 = vld [vmem:[%s932_s1 + $0x20] sm:$0xff]  ;;  %v687_v16 = vld [vmem:[%s932_s1 + $0x18] sm:$0xff]  ;;  %v686_v20 = vld [vmem:[%s932_s1 + $0x10] sm:$0xff] }
   0x6   :  { %377 = vmatpush.bf16.msra.mxu0 %v690_v4  ;;  %v696_v13 = vld [vmem:[%s932_s1 + $0x60] sm:$0xff]  ;;  %v695_v17 = vld [vmem:[%s932_s1 + $0x58] sm:$0xff]  ;;  %v694_v21 = vld [vmem:[%s932_s1 + $0x50] sm:$0xff] }
   0x7   :  { %396 = vmatpush.bf16.msra.mxu1 %v698_v5  ;;  %v704_v14 = vld [vmem:[%s932_s1 + $0xa0] sm:$0xff]  ;;  %v703_v18 = vld [vmem:[%s932_s1 + $0x98] sm:$0xff]  ;;  %v702_v22 = vld [vmem:[%s932_s1 + $0x90] sm:$0xff] }
   0x8   :  { %415 = vmatpush.bf16.msra.mxu2 %v706_v6  ;;  %v712_v15 = vld [vmem:[%s932_s1 + $0xe0] sm:$0xff]  ;;  %v711_v19 = vld [vmem:[%s932_s1 + $0xd8] sm:$0xff]  ;;  %v710_v23 = vld [vmem:[%s932_s1 + $0xd0] sm:$0xff] }
   0x9   :  { %434 = vmatpush.bf16.msra.mxu3 %v714_v7  ;;  %v685_v24 = vld [vmem:[%s932_s1 + $0x8] sm:$0xff]  ;;  %v684_v28 = vld [vmem:[%s932_s1] sm:$0xff]  ;;  %v676_v33 = vld [vmem:[%s934_s0 + $0x10] sm:$0xf0] }
   0xa   :  { %378 = vmatpush.bf16.msra.mxu0 %v689_v8  ;;  %v693_v25 = vld [vmem:[%s932_s1 + $0x48] sm:$0xff]  ;;  %v692_v29 = vld [vmem:[%s932_s1 + $0x40] sm:$0xff]  ;;  %v492_v35 = vld [vmem:[%s934_s0 + $0x14] sm:$0xf0] }
   0xb   :  { %397 = vmatpush.bf16.msra.mxu1 %v697_v9  ;;  %v701_v26 = vld [vmem:[%s932_s1 + $0x88] sm:$0xff]  ;;  %v700_v30 = vld [vmem:[%s932_s1 + $0x80] sm:$0xff]  ;;  %v677_v37 = vld [vmem:[%s934_s0 + $0x18] sm:$0xf0] }
   0xc   :  { %416 = vmatpush.bf16.msra.mxu2 %v705_v10  ;;  %v709_v27 = vld [vmem:[%s932_s1 + $0xc8] sm:$0xff]  ;;  %v708_v31 = vld [vmem:[%s932_s1 + $0xc0] sm:$0xff]  ;;  %v719_v40 = vld [vmem:[%s932_s1 + $0x118] sm:$0xff] }
   0xd   :  { %435 = vmatpush.bf16.msra.mxu3 %v713_v11  ;;  %v490_v32 = vld [vmem:[%s934_s0] sm:$0xf]  ;;  %v674_v34 = vld [vmem:[%s934_s0 + $0x4] sm:$0xf]  ;;  %v498_v36 = vld [vmem:[%s934_s0 + $0x8] sm:$0xf] }
   0xe   :  { %379 = vmatpush.bf16.msra.mxu0 %v688_v12  ;;  %v675_v38 = vld [vmem:[%s934_s0 + $0xc] sm:$0xf]  ;;  %v500_v39 = vld [vmem:[%s934_s0 + $0x1c] sm:$0xf0]  ;;  %v491_v41 = vor.u32 %v676_v33, %v490_v32  ;;  %v495_v42 = vor.u32 %v674_v34, %v492_v35  ;;  %v499_v43 = vor.u32 %v677_v37, %v498_v36  ;;  %v718_v45 = vld [vmem:[%s932_s1 + $0x110] sm:$0xff] }
   0xf   :  { %398 = vmatpush.bf16.msra.mxu1 %v696_v13  ;;  %v503_v44 = vor.u32 %v675_v38, %v500_v39  ;;  %v717_v46 = vld [vmem:[%s932_s1 + $0x108] sm:$0xff]  ;;  %v716_v47 = vld [vmem:[%s932_s1 + $0x100] sm:$0xff]  ;;  %v681_v49 = vld [vmem:[%s934_s0 + $0x38] sm:$0xf0] }
  0x10   :  { %417 = vmatpush.bf16.msra.mxu2 %v704_v14  ;;  %v510_v48 = vld [vmem:[%s934_s0 + $0x28] sm:$0xf]  ;;  %v679_v50 = vld [vmem:[%s934_s0 + $0x2c] sm:$0xf]  ;;  %v512_v51 = vld [vmem:[%s934_s0 + $0x3c] sm:$0xf0] }
  0x11   :  { %436 = vmatpush.bf16.msra.mxu3 %v712_v15  ;;  %v518_v52 = vld [vmem:[%s934_s0 + $0x30] sm:$0xf]  ;;  %v682_v53 = vld [vmem:[%s934_s0 + $0x40] sm:$0xf0]  ;;  %v680_v54 = vld [vmem:[%s934_s0 + $0x34] sm:$0xf]  ;;  %v511_v56 = vor.u32 %v681_v49, %v510_v48  ;;  %v515_v57 = vor.u32 %v679_v50, %v512_v51 }
  0x12   :  { %380 = vmatpush.bf16.msra.mxu0 %v687_v16  ;;  %v520_v55 = vld [vmem:[%s934_s0 + $0x44] sm:$0xf0]  ;;  %v519_v58 = vor.u32 %v682_v53, %v518_v52  ;;  %v506_v60 = vld [vmem:[%s934_s0 + $0x10] sm:$0xf]  ;;  %v678_v61 = vld [vmem:[%s934_s0 + $0x20] sm:$0xf0] }
  0x13   :  { %399 = vmatpush.bf16.msra.mxu1 %v695_v17  ;;  %v523_v59 = vor.u32 %v680_v54, %v520_v55  ;;  %v526_v62 = vld [vmem:[%s934_s0 + $0x38] sm:$0xf]  ;;  %v683_v63 = vld [vmem:[%s934_s0 + $0x48] sm:$0xf0]  ;;  %v507_v0 = vor.u32 %v678_v61, %v506_v60  ;;  %v724_v11 = vld [vmem:[%s933_s2] ss:$0 sm:$0xff] }
  0x14   :  { %418 = vmatpush.bf16.msra.mxu2 %v703_v18  ;;  %v527_v1 = vor.u32 %v683_v63, %v526_v62 }
  0x15   :  { %437 = vmatpush.bf16.msra.mxu3 %v711_v19 }
  0x16   :  { %381 = vmatpush.bf16.msra.mxu0 %v686_v20 }
  0x17   :  { %400 = vmatpush.bf16.msra.mxu1 %v694_v21 }
  0x18   :  { %419 = vmatpush.bf16.msra.mxu2 %v702_v22 }
  0x19   :  { %438 = vmatpush.bf16.msra.mxu3 %v710_v23 }
  0x1a   :  { %382 = vmatpush.bf16.msra.mxu0 %v685_v24 }
  0x1b   :  { %401 = vmatpush.bf16.msra.mxu1 %v693_v25 }
  0x1c   :  { %420 = vmatpush.bf16.msra.mxu2 %v701_v26 }
  0x1d   :  { %439 = vmatpush.bf16.msra.mxu3 %v709_v27 }
  0x1e   :  { %383 = vmatpush.bf16.msra.mxu0 %v684_v28 }
  0x1f   :  { %402 = vmatpush.bf16.msra.mxu1 %v692_v29 }
  0x20   :  { %421 = vmatpush.bf16.msra.mxu2 %v700_v30 }
  0x21   :  { %440 = vmatpush.bf16.msra.mxu3 %v708_v31  ;;  %384 = vmatmul.bf16.vlgmr.msra.gmra.mxu0 %v491_v41 }
  0x22   :  { %456 = vmatpush.bf16.msrb.mxu0 %v719_v40  ;;  %403 = vmatmul.bf16.vlgmr.msra.gmra.mxu1 %v495_v42 }
  0x23   :  { %720 = vmatpush.bf16.msrb.mxu1 %v719_v40  ;;  %422 = vmatmul.bf16.vlgmr.msra.gmra.mxu2 %v499_v43 }
  0x24   :  { %441 = vmatmul.bf16.vlgmr.msra.gmra.mxu3 %v503_v44 }
  0x26   :  { %457 = vmatpush.bf16.msrb.mxu0 %v718_v45 }
  0x27   :  { %721 = vmatpush.bf16.msrb.mxu1 %v718_v45 }
  0x2a   :  { %458 = vmatpush.bf16.msrb.mxu0 %v717_v46 }
  0x2b   :  { %722 = vmatpush.bf16.msrb.mxu1 %v717_v46 }
  0x2e   :  { %459 = vmatpush.bf16.msrb.mxu0 %v716_v47 }
  0x2f   :  { %723 = vmatpush.bf16.msrb.mxu1 %v716_v47 }
  0x31   :  { %389 = vmatmul.bf16.gmra.mxu0 %v511_v56 }
  0x32   :  { %408 = vmatmul.bf16.gmra.mxu1 %v515_v57 }
  0x33   :  { %427 = vmatmul.bf16.gmra.mxu2 %v519_v58 }
  0x34   :  { %446 = vmatmul.bf16.gmra.mxu3 %v523_v59 }
  0x41   :  { %672 = vmatmul.msk.bf16.vlgmr.msrb.gmra.mxu0 %vm369_vm0, %v507_v0 }
  0x42   :  { %673 = vmatmul.msk.bf16.vlgmr.msrb.gmra.mxu1 %vm369_vm0, %v527_v1 }
  0x9e   :  { %v385_v2 = vpop.f32.mrf.mxu0 }
  0x9f   :  { %v404_v3 = vpop.f32.mrf.mxu1  ;;  %v386_v13 = vadd.f32 %v724_v11, %v385_v2 }
  0xa1   :  { %v405_v18 = vadd.f32 %v404_v3, %v386_v13 }
  0xa6   :  { %v423_v4 = vpop.f32.mrf.mxu2  ;;  %v387_v6 = vpop.f32.mrf.mxu0 }
  0xa7   :  { %v442_v5 = vpop.f32.mrf.mxu3  ;;  %v406_v7 = vpop.f32.mrf.mxu1  ;;  %v424_v20 = vadd.f32 %v423_v4, %v405_v18  ;;  %v388_v23 = vadd.f32 %v724_v11, %v387_v6 }
  0xa9   :  { %v443_v25 = vadd.f32 %v442_v5, %v424_v20  ;;  %v407_v30 = vadd.f32 %v406_v7, %v388_v23 }
  0xae   :  { %v425_v8 = vpop.f32.mrf.mxu2  ;;  %v390_v9 = vpop.f32.mrf.mxu0 }
  0xaf   :  { %v409_v10 = vpop.f32.mrf.mxu1  ;;  %v444_v12 = vpop.f32.mrf.mxu3  ;;  %v391_v14 = vadd.f32 %v724_v11, %v390_v9  ;;  %v426_v34 = vadd.f32 %v425_v8, %v407_v30 }
  0xb1   :  { %v410_v19 = vadd.f32 %v409_v10, %v391_v14  ;;  %v445_v41 = vadd.f32 %v444_v12, %v426_v34 }
  0xb6   :  { %v428_v15 = vpop.f32.mrf.mxu2  ;;  %v392_v16 = vpop.f32.mrf.mxu0 }
  0xb7   :  { %v411_v17 = vpop.f32.mrf.mxu1  ;;  %v429_v21 = vadd.f32 %v428_v15, %v410_v19  ;;  %v447_v22 = vpop.f32.mrf.mxu3  ;;  %v393_v24 = vadd.f32 %v724_v11, %v392_v16 }
  0xb9   :  { %v448_v26 = vadd.f32 %v447_v22, %v429_v21  ;;  %v412_v31 = vadd.f32 %v411_v17, %v393_v24 }
  0xbe   :  { %v430_v27 = vpop.f32.mrf.mxu2  ;;  %v461_v28 = vpop.f32.mrf.mxu0 }
  0xbf   :  { %v466_v29 = vpop.f32.mrf.mxu1  ;;  %v462_v32 = vadd.f32 %v461_v28, %v443_v25  ;;  %v431_v35 = vadd.f32 %v430_v27, %v412_v31  ;;  %v449_v40 = vpop.f32.mrf.mxu3 }
  0xc0   :  { %v467_v33 = vadd.f32 %v466_v29, %v448_v26 }
  0xc1   :  { %v471_v36 = vmax.f32 %v462_v32, 0.0  ;;  %v450_v42 = vadd.f32 %v449_v40, %v431_v35 }
  0xc2   :  { %v473_v37 = vmax.f32 %v467_v33, 0.0 }
  0xc3   :  { %v475_v38 = vpack.c.bf16 %v471_v36, %v471_v36 }
  0xc4   :  { %v477_v39 = vpack.c.bf16 %v473_v37, %v473_v37 }
  0xc5   :  { %480 = vst.msk [vmem:[%s935_s3] sm:$0xf] %vm479_vm1, %v475_v38 }
  0xc6   :  { %482 = vst.msk [vmem:[%s935_s3 + $0x8] sm:$0xf] %vm479_vm1, %v477_v39  ;;  %v463_v43 = vpop.f32.mrf.mxu0 }
  0xc7   :  { %v468_v44 = vpop.f32.mrf.mxu1  ;;  %v464_v45 = vadd.f32 %v463_v43, %v445_v41 }
  0xc8   :  { %v469_v46 = vadd.f32 %v468_v44, %v450_v42 }
  0xc9   :  { %v472_v47 = vmax.f32 %v464_v45, 0.0 }
  0xca   :  { %v474_v48 = vmax.f32 %v469_v46, 0.0 }
  0xcb   :  { %v476_v49 = vpack.c.bf16 %v472_v47, %v472_v47 }
  0xcc   :  { %v478_v50 = vpack.c.bf16 %v474_v48, %v474_v48 }
  0xcd   :  { %481 = vst.msk [vmem:[%s935_s3 + $0x4] sm:$0xf] %vm479_vm1, %v476_v49 }
  0xce   :  { %483 = vst.msk [vmem:[%s935_s3 + $0xc] sm:$0xf] %vm479_vm1, %v478_v50 }

</bundles_post_ra>
